<compile_context>
chip_gen: v7x
topology: tpu7x:2x2x1
jax: 0.10.0
libtpu: 0.0.40
codegen_flags: <defaults>
</compile_context>

<pallas_src>
import functools

import numpy as np
import jax
import jax.numpy as jnp
from jax.experimental import pallas as pl
from jax.experimental.pallas import tpu as pltpu


# ------------------------------ fused kernel -------------------------------

def _fused_encoder_kernel(*refs, num_deep_layers, eps):
    # refs = [p1, W1cat, b1] + [G_l, W_l, b_l]*num_deep_layers
    #        + [Wfc, fc_b, ln_g, ln_b] + [out]
    i = 0
    p1_ref, w1_ref, b1_ref = refs[i], refs[i + 1], refs[i + 2]
    i += 3
    layers = []
    for _ in range(num_deep_layers):
        layers.append((refs[i], refs[i + 1], refs[i + 2]))
        i += 3
    wfc_ref, fcb_ref, gamma_ref, beta_ref = refs[i:i + 4]
    o_ref = refs[i + 4]

    # ----- layer 1: input already im2col'ed outside -> single MXU matmul -----
    acc1 = jnp.dot(w1_ref[...], p1_ref[...],
                   preferred_element_type=jnp.float32)          # (32, B*H1*W1)
    a = jnp.maximum(acc1 + b1_ref[...], 0.0).astype(jnp.bfloat16)

    # ----- layers 2..4: per-tap exact 0/1 gather-as-matmul, f32 accumulate -----
    for gmat_ref, w_ref, b_ref in layers:
        n_taps = gmat_ref.shape[0]
        c_out = w_ref.shape[1]
        s_out = gmat_ref.shape[2]
        acc = jnp.zeros((c_out, s_out), jnp.float32)
        for t in range(n_taps):                                  # static unroll over 3x3 taps
            gathered = jnp.dot(a, gmat_ref[t],
                               preferred_element_type=jnp.float32)   # (C_in, S_out)
            acc = acc + jnp.dot(w_ref[t], gathered.astype(jnp.bfloat16),
                                preferred_element_type=jnp.float32)  # (C_out, S_out)
        a = jnp.maximum(acc + b_ref[...], 0.0).astype(jnp.bfloat16)

    # ----- FC + LayerNorm, computed transposed:  y = Wfc @ a_flat + b  (F, B) -----
    y = jnp.dot(wfc_ref[...], a, preferred_element_type=jnp.float32) + fcb_ref[...]
    mu = jnp.mean(y, axis=0, keepdims=True)
    var = jnp.mean((y - mu) ** 2, axis=0, keepdims=True)         # biased var, torch LN
    o_ref[...] = ((y - mu) * jax.lax.rsqrt(var + eps)) * gamma_ref[...] + beta_ref[...]


# --------------------------- trace-time constants ---------------------------

@functools.lru_cache(maxsize=None)
def _gather_mats_np(batch, h, w, k, stride):
    """0/1 selection matrices: tap t maps (b,h,w) columns -> (b,oh,ow) columns."""
    oh = (h - k) // stride + 1
    ow = (w - k) // stride + 1
    mats = np.zeros((k * k, batch * h * w, batch * oh * ow), np.float32)
    b = np.arange(batch)[:, None, None]
    oi = np.arange(oh)[None, :, None]
    oj = np.arange(ow)[None, None, :]
    col = ((b * oh + oi) * ow + oj).reshape(-1)
    for kh in range(k):
        for kw in range(k):
            row = ((b * h + (oi * stride + kh)) * w + (oj * stride + kw)).reshape(-1)
            mats[kh * k + kw, row, col] = 1.0
    return mats, oh, ow


def _im2col_nchw(x, k, stride):
    """Pure layout plumbing (wrapper-side): (B,C,H,W) -> (k*k*C, B*OH*OW) patches.

    Row order is tap-major (t*C + c, t = kh*k + kw); column order is (b, oh, ow),
    matching both the layer-1 concatenated weight and the layer-2 gather matrices.
    """
    B, C, H, W = x.shape
    oh = (H - k) // stride + 1
    ow = (W - k) // stride + 1
    taps = []
    for kh in range(k):
        for kw in range(k):
            taps.append(x[:, :, kh:kh + stride * (oh - 1) + 1:stride,
                             kw:kw + stride * (ow - 1) + 1:stride])   # (B, C, oh, ow)
    p = jnp.stack(taps, axis=0)                     # (k*k, B, C, oh, ow)
    p = jnp.transpose(p, (0, 2, 1, 3, 4))           # (k*k, C, B, oh, ow)
    return p.reshape(k * k * C, B * oh * ow), oh, ow


# -------------------------------- parameters --------------------------------

def init_params(key, obs_channels=4, feature_dim=256, num_layers=4,
                num_filters=32, h=16, w=16):
    """Deterministic synthetic weights with PixelEncoder's shapes/semantics."""
    keys = jax.random.split(key, 2 * num_layers + 2)
    in_ch = 2 * obs_channels                      # goal_flag=True: obs ++ goal channels
    conv1 = None
    convs = []
    spatial, ch = h, in_ch
    for i in range(num_layers):
        stride = 2 if i == 0 else 1
        w_pt = jax.random.normal(keys[2 * i], (num_filters, ch, 3, 3), jnp.float32) * 0.05
        b_pt = jax.random.normal(keys[2 * i + 1], (num_filters,), jnp.float32) * 0.01
        if i == 0:
            w_pt = w_pt * (1.0 / 255.0)           # fold the encoder's obs/255 into conv1
            # (Cout, Cin, kh, kw) -> (Cout, kh, kw, Cin) -> (Cout, 9*Cin); row = t*Cin+cin
            w_cat = jnp.transpose(w_pt, (0, 2, 3, 1)).reshape(num_filters, 9 * ch)
            conv1 = (w_cat.astype(jnp.bfloat16),
                     b_pt.reshape(num_filters, 1).astype(jnp.float32),
                     stride)
        else:
            # per-tap stack (9, Cout, Cin), t = kh*3 + kw
            w_stk = jnp.transpose(w_pt, (2, 3, 0, 1)).reshape(9, num_filters, ch)
            convs.append((w_stk.astype(jnp.bfloat16),
                          b_pt.reshape(num_filters, 1).astype(jnp.float32),
                          stride))
        ch = num_filters
        spatial = (spatial - 3) // stride + 1
    flat = num_filters * spatial * spatial
    fc_w_pt = jax.random.normal(keys[-2], (feature_dim, flat), jnp.float32) * 0.05
    fc_b = jax.random.normal(keys[-1], (feature_dim,), jnp.float32) * 0.01
    return dict(
        conv1=conv1,
        convs=convs,
        fc_w=fc_w_pt.astype(jnp.bfloat16),        # (feature_dim, flat);  flat == 32 here
        fc_b=fc_b.reshape(feature_dim, 1),
        ln_g=jnp.ones((feature_dim, 1), jnp.float32),
        ln_b=jnp.zeros((feature_dim, 1), jnp.float32),
    )


# --------------------------------- forward ----------------------------------

def paired_state_goal_forward(params, obs, goal=None, detach=False):
    """Equivalent of PairedStateGoal.forward(obs, goal, detach)  (forward values)."""
    if goal is not None:
        obs = jnp.concatenate([obs, goal], axis=1)        # NCHW channel concat (dim=1)
    B, C, H, W = obs.shape

    w1_cat, b1, stride1 = params["conv1"]
    p1, h_l, w_l = _im2col_nchw(obs.astype(jnp.float32), 3, stride1)
    inputs = [p1.astype(jnp.bfloat16), w1_cat, b1]

    for w_stk, b_col, stride in params["convs"]:
        g_np, h_l, w_l = _gather_mats_np(B, h_l, w_l, 3, stride)
        inputs += [jnp.asarray(g_np, jnp.bfloat16), w_stk, b_col]
    assert h_l == 1 and w_l == 1, "fused FC assumes the conv stack ends at 1x1 spatial"
    # TODO(synk): general final spatial (e.g. 84x84 inputs -> 35x35) needs per-position
    # FC terms or an in-kernel flatten; not required for this 16x16 configuration.
    inputs += [params["fc_w"], params["fc_b"], params["ln_g"], params["ln_b"]]

    feature_dim = params["fc_w"].shape[0]
    vmem = pltpu.MemorySpace.VMEM
    out_t = pl.pallas_call(
        functools.partial(_fused_encoder_kernel,
                          num_deep_layers=len(params["convs"]), eps=1e-5),
        out_shape=jax.ShapeDtypeStruct((feature_dim, B), jnp.float32),
        in_specs=[pl.BlockSpec(memory_space=vmem)] * len(inputs),
        out_specs=pl.BlockSpec(memory_space=vmem),
    )(*inputs)

    # TODO(synk): `detach=True` only changes gradients (stop-grad on conv features);
    # forward values are identical, and a custom VJP around the fused kernel would be
    # needed to reproduce it exactly for training.
    return out_t.T                                        # (B, feature_dim)


# --------------------------- pure-JAX reference ------------------------------

def _reference_forward(params, obs, goal):
    x = jnp.concatenate([obs, goal], axis=1).astype(jnp.float32)   # scale folded into W1
    w1_cat, b1, stride1 = params["conv1"]
    cout = w1_cat.shape[0]
    cin = w1_cat.shape[1] // 9
    w1 = jnp.transpose(w1_cat.astype(jnp.float32).reshape(cout, 3, 3, cin), (0, 3, 1, 2))
    x = jax.lax.conv_general_dilated(x, w1, (stride1, stride1), "VALID",
                                     dimension_numbers=("NCHW", "OIHW", "NCHW"))
    x = jnp.maximum(x + b1.reshape(1, -1, 1, 1), 0.0)
    for w_stk, b_col, stride in params["convs"]:
        co, ci = w_stk.shape[1], w_stk.shape[2]
        w4 = jnp.transpose(w_stk.astype(jnp.float32).reshape(3, 3, co, ci), (2, 3, 0, 1))
        x = jax.lax.conv_general_dilated(x, w4, (stride, stride), "VALID",
                                         dimension_numbers=("NCHW", "OIHW", "NCHW"))
        x = jnp.maximum(x + b_col.reshape(1, -1, 1, 1), 0.0)
    h = x.reshape(x.shape[0], -1)                                   # NCHW flatten
    y = h @ params["fc_w"].astype(jnp.float32).T + params["fc_b"].reshape(1, -1)
    mu = y.mean(-1, keepdims=True)
    var = ((y - mu) ** 2).mean(-1, keepdims=True)
    return ((y - mu) * jax.lax.rsqrt(var + 1e-5)) * params["ln_g"].reshape(1, -1) \
        + params["ln_b"].reshape(1, -1)


if __name__ == "__main__":
    key = jax.random.PRNGKey(0)
    k_obs, k_goal, k_params = jax.random.split(key, 3)
    # small pixel-like inputs (values in [0, 255), like uint8 frames cast to float)
    obs = jax.random.uniform(k_obs, (2, 4, 16, 16), jnp.float32, 0.0, 255.0)
    goal = jax.random.uniform(k_goal, (2, 4, 16, 16), jnp.float32, 0.0, 255.0)
    params = init_params(k_params, obs_channels=4, feature_dim=256,
                         num_layers=4, num_filters=32, h=16, w=16)

    # close over params so strides stay static; obs/goal are the traced args
    fwd = jax.jit(lambda o, g: paired_state_goal_forward(params, o, g))
    z = fwd(obs, goal)
    jax.block_until_ready(z)
    assert z.shape == (2, 256) and z.dtype == jnp.float32

    # correctness vs pure-JAX reference (loose tol: kernel matmuls run in bf16)
    z_ref = _reference_forward(params, obs, goal)
    np.testing.assert_allclose(np.asarray(z), np.asarray(z_ref), rtol=0.15, atol=0.15)

    print("KERNEL_OK")
</pallas_src>

<mosaic_0001>
module attributes {stable_mosaic.version = 11 : i64} {
  func.func @_fused_encoder_kernel(%arg0: memref<72x98xbf16, #tpu.memory_space<vmem>>, %arg1: memref<32x72xbf16, #tpu.memory_space<vmem>>, %arg2: memref<32x1xf32, #tpu.memory_space<vmem>>, %arg3: memref<9x98x50xbf16, #tpu.memory_space<vmem>>, %arg4: memref<9x32x32xbf16, #tpu.memory_space<vmem>>, %arg5: memref<32x1xf32, #tpu.memory_space<vmem>>, %arg6: memref<9x50x18xbf16, #tpu.memory_space<vmem>>, %arg7: memref<9x32x32xbf16, #tpu.memory_space<vmem>>, %arg8: memref<32x1xf32, #tpu.memory_space<vmem>>, %arg9: memref<9x18x2xbf16, #tpu.memory_space<vmem>>, %arg10: memref<9x32x32xbf16, #tpu.memory_space<vmem>>, %arg11: memref<32x1xf32, #tpu.memory_space<vmem>>, %arg12: memref<256x32xbf16, #tpu.memory_space<vmem>>, %arg13: memref<256x1xf32, #tpu.memory_space<vmem>>, %arg14: memref<256x1xf32, #tpu.memory_space<vmem>>, %arg15: memref<256x1xf32, #tpu.memory_space<vmem>>, %arg16: memref<256x2xf32, #tpu.memory_space<vmem>>) attributes {dimension_semantics = [], scalar_prefetch = 0 : i64, scratch_operands = 0 : i64, tpu.core_type = #tpu.core_type<tc>} {
    %c0 = arith.constant 0 : index
    %c0_0 = arith.constant 0 : index
    %0 = vector.load %arg1[%c0, %c0_0] : memref<32x72xbf16, #tpu.memory_space<vmem>>, vector<32x72xbf16>
    %c0_1 = arith.constant 0 : index
    %c0_2 = arith.constant 0 : index
    %1 = vector.load %arg0[%c0_1, %c0_2] : memref<72x98xbf16, #tpu.memory_space<vmem>>, vector<72x98xbf16>
    %cst = arith.constant dense<0.000000e+00> : vector<32x98xf32>
    %2 = tpu.matmul %0, %1, %cst {dimension_numbers = #tpu.dot_dimension_numbers<[1], [0], [0], [1], [0, 0, 1, 1], [], []>} : vector<32x72xbf16>, vector<72x98xbf16>, vector<32x98xf32> -> vector<32x98xf32>
    %c0_3 = arith.constant 0 : index
    %c0_4 = arith.constant 0 : index
    %3 = vector.load %arg2[%c0_3, %c0_4] : memref<32x1xf32, #tpu.memory_space<vmem>>, vector<32x1xf32>
    %4 = vector.broadcast %3 : vector<32x1xf32> to vector<32x98xf32>
    %5 = arith.addf %2, %4 : vector<32x98xf32>
    %cst_5 = arith.constant 0.000000e+00 : f32
    %6 = vector.broadcast %cst_5 : f32 to vector<32x98xf32>
    %7 = arith.maximumf %5, %6 : vector<32x98xf32>
    %8 = arith.truncf %7 : vector<32x98xf32> to vector<32x98xbf16>
    %cst_6 = arith.constant 0.000000e+00 : f32
    %9 = vector.broadcast %cst_6 : f32 to vector<32x50xf32>
    %c0_7 = arith.constant 0 : index
    %c0_8 = arith.constant 0 : index
    %c0_9 = arith.constant 0 : index
    %10 = vector.load %arg3[%c0_7, %c0_8, %c0_9] : memref<9x98x50xbf16, #tpu.memory_space<vmem>>, vector<1x98x50xbf16>
    %11 = vector.shape_cast %10 : vector<1x98x50xbf16> to vector<98x50xbf16>
    %cst_10 = arith.constant dense<0.000000e+00> : vector<32x50xf32>
    %12 = tpu.matmul %8, %11, %cst_10 {dimension_numbers = #tpu.dot_dimension_numbers<[1], [0], [0], [1], [0, 0, 1, 1], [], []>} : vector<32x98xbf16>, vector<98x50xbf16>, vector<32x50xf32> -> vector<32x50xf32>
    %c0_11 = arith.constant 0 : index
    %c0_12 = arith.constant 0 : index
    %c0_13 = arith.constant 0 : index
    %13 = vector.load %arg4[%c0_11, %c0_12, %c0_13] : memref<9x32x32xbf16, #tpu.memory_space<vmem>>, vector<1x32x32xbf16>
    %14 = vector.shape_cast %13 : vector<1x32x32xbf16> to vector<32x32xbf16>
    %15 = arith.truncf %12 : vector<32x50xf32> to vector<32x50xbf16>
    %cst_14 = arith.constant dense<0.000000e+00> : vector<32x50xf32>
    %16 = tpu.matmul %14, %15, %cst_14 {dimension_numbers = #tpu.dot_dimension_numbers<[1], [0], [0], [1], [0, 0, 1, 1], [], []>} : vector<32x32xbf16>, vector<32x50xbf16>, vector<32x50xf32> -> vector<32x50xf32>
    %17 = arith.addf %9, %16 : vector<32x50xf32>
    %c1 = arith.constant 1 : index
    %c0_15 = arith.constant 0 : index
    %c0_16 = arith.constant 0 : index
    %18 = vector.load %arg3[%c1, %c0_15, %c0_16] : memref<9x98x50xbf16, #tpu.memory_space<vmem>>, vector<1x98x50xbf16>
    %19 = vector.shape_cast %18 : vector<1x98x50xbf16> to vector<98x50xbf16>
    %cst_17 = arith.constant dense<0.000000e+00> : vector<32x50xf32>
    %20 = tpu.matmul %8, %19, %cst_17 {dimension_numbers = #tpu.dot_dimension_numbers<[1], [0], [0], [1], [0, 0, 1, 1], [], []>} : vector<32x98xbf16>, vector<98x50xbf16>, vector<32x50xf32> -> vector<32x50xf32>
    %c1_18 = arith.constant 1 : index
    %c0_19 = arith.constant 0 : index
    %c0_20 = arith.constant 0 : index
    %21 = vector.load %arg4[%c1_18, %c0_19, %c0_20] : memref<9x32x32xbf16, #tpu.memory_space<vmem>>, vector<1x32x32xbf16>
    %22 = vector.shape_cast %21 : vector<1x32x32xbf16> to vector<32x32xbf16>
    %23 = arith.truncf %20 : vector<32x50xf32> to vector<32x50xbf16>
    %cst_21 = arith.constant dense<0.000000e+00> : vector<32x50xf32>
    %24 = tpu.matmul %22, %23, %cst_21 {dimension_numbers = #tpu.dot_dimension_numbers<[1], [0], [0], [1], [0, 0, 1, 1], [], []>} : vector<32x32xbf16>, vector<32x50xbf16>, vector<32x50xf32> -> vector<32x50xf32>
    %25 = arith.addf %17, %24 : vector<32x50xf32>
    %c2 = arith.constant 2 : index
    %c0_22 = arith.constant 0 : index
    %c0_23 = arith.constant 0 : index
    %26 = vector.load %arg3[%c2, %c0_22, %c0_23] : memref<9x98x50xbf16, #tpu.memory_space<vmem>>, vector<1x98x50xbf16>
    %27 = vector.shape_cast %26 : vector<1x98x50xbf16> to vector<98x50xbf16>
    %cst_24 = arith.constant dense<0.000000e+00> : vector<32x50xf32>
    %28 = tpu.matmul %8, %27, %cst_24 {dimension_numbers = #tpu.dot_dimension_numbers<[1], [0], [0], [1], [0, 0, 1, 1], [], []>} : vector<32x98xbf16>, vector<98x50xbf16>, vector<32x50xf32> -> vector<32x50xf32>
    %c2_25 = arith.constant 2 : index
    %c0_26 = arith.constant 0 : index
    %c0_27 = arith.constant 0 : index
    %29 = vector.load %arg4[%c2_25, %c0_26, %c0_27] : memref<9x32x32xbf16, #tpu.memory_space<vmem>>, vector<1x32x32xbf16>
    %30 = vector.shape_cast %29 : vector<1x32x32xbf16> to vector<32x32xbf16>
    %31 = arith.truncf %28 : vector<32x50xf32> to vector<32x50xbf16>
    %cst_28 = arith.constant dense<0.000000e+00> : vector<32x50xf32>
    %32 = tpu.matmul %30, %31, %cst_28 {dimension_numbers = #tpu.dot_dimension_numbers<[1], [0], [0], [1], [0, 0, 1, 1], [], []>} : vector<32x32xbf16>, vector<32x50xbf16>, vector<32x50xf32> -> vector<32x50xf32>
    %33 = arith.addf %25, %32 : vector<32x50xf32>
    %c3 = arith.constant 3 : index
    %c0_29 = arith.constant 0 : index
    %c0_30 = arith.constant 0 : index
    %34 = vector.load %arg3[%c3, %c0_29, %c0_30] : memref<9x98x50xbf16, #tpu.memory_space<vmem>>, vector<1x98x50xbf16>
    %35 = vector.shape_cast %34 : vector<1x98x50xbf16> to vector<98x50xbf16>
    %cst_31 = arith.constant dense<0.000000e+00> : vector<32x50xf32>
    %36 = tpu.matmul %8, %35, %cst_31 {dimension_numbers = #tpu.dot_dimension_numbers<[1], [0], [0], [1], [0, 0, 1, 1], [], []>} : vector<32x98xbf16>, vector<98x50xbf16>, vector<32x50xf32> -> vector<32x50xf32>
    %c3_32 = arith.constant 3 : index
    %c0_33 = arith.constant 0 : index
    %c0_34 = arith.constant 0 : index
    %37 = vector.load %arg4[%c3_32, %c0_33, %c0_34] : memref<9x32x32xbf16, #tpu.memory_space<vmem>>, vector<1x32x32xbf16>
    %38 = vector.shape_cast %37 : vector<1x32x32xbf16> to vector<32x32xbf16>
    %39 = arith.truncf %36 : vector<32x50xf32> to vector<32x50xbf16>
    %cst_35 = arith.constant dense<0.000000e+00> : vector<32x50xf32>
    %40 = tpu.matmul %38, %39, %cst_35 {dimension_numbers = #tpu.dot_dimension_numbers<[1], [0], [0], [1], [0, 0, 1, 1], [], []>} : vector<32x32xbf16>, vector<32x50xbf16>, vector<32x50xf32> -> vector<32x50xf32>
    %41 = arith.addf %33, %40 : vector<32x50xf32>
    %c4 = arith.constant 4 : index
    %c0_36 = arith.constant 0 : index
    %c0_37 = arith.constant 0 : index
    %42 = vector.load %arg3[%c4, %c0_36, %c0_37] : memref<9x98x50xbf16, #tpu.memory_space<vmem>>, vector<1x98x50xbf16>
    %43 = vector.shape_cast %42 : vector<1x98x50xbf16> to vector<98x50xbf16>
    %cst_38 = arith.constant dense<0.000000e+00> : vector<32x50xf32>
    %44 = tpu.matmul %8, %43, %cst_38 {dimension_numbers = #tpu.dot_dimension_numbers<[1], [0], [0], [1], [0, 0, 1, 1], [], []>} : vector<32x98xbf16>, vector<98x50xbf16>, vector<32x50xf32> -> vector<32x50xf32>
    %c4_39 = arith.constant 4 : index
    %c0_40 = arith.constant 0 : index
    %c0_41 = arith.constant 0 : index
    %45 = vector.load %arg4[%c4_39, %c0_40, %c0_41] : memref<9x32x32xbf16, #tpu.memory_space<vmem>>, vector<1x32x32xbf16>
    %46 = vector.shape_cast %45 : vector<1x32x32xbf16> to vector<32x32xbf16>
    %47 = arith.truncf %44 : vector<32x50xf32> to vector<32x50xbf16>
    %cst_42 = arith.constant dense<0.000000e+00> : vector<32x50xf32>
    %48 = tpu.matmul %46, %47, %cst_42 {dimension_numbers = #tpu.dot_dimension_numbers<[1], [0], [0], [1], [0, 0, 1, 1], [], []>} : vector<32x32xbf16>, vector<32x50xbf16>, vector<32x50xf32> -> vector<32x50xf32>
    %49 = arith.addf %41, %48 : vector<32x50xf32>
    %c5 = arith.constant 5 : index
    %c0_43 = arith.constant 0 : index
    %c0_44 = arith.constant 0 : index
    %50 = vector.load %arg3[%c5, %c0_43, %c0_44] : memref<9x98x50xbf16, #tpu.memory_space<vmem>>, vector<1x98x50xbf16>
    %51 = vector.shape_cast %50 : vector<1x98x50xbf16> to vector<98x50xbf16>
    %cst_45 = arith.constant dense<0.000000e+00> : vector<32x50xf32>
    %52 = tpu.matmul %8, %51, %cst_45 {dimension_numbers = #tpu.dot_dimension_numbers<[1], [0], [0], [1], [0, 0, 1, 1], [], []>} : vector<32x98xbf16>, vector<98x50xbf16>, vector<32x50xf32> -> vector<32x50xf32>
    %c5_46 = arith.constant 5 : index
    %c0_47 = arith.constant 0 : index
    %c0_48 = arith.constant 0 : index
    %53 = vector.load %arg4[%c5_46, %c0_47, %c0_48] : memref<9x32x32xbf16, #tpu.memory_space<vmem>>, vector<1x32x32xbf16>
    %54 = vector.shape_cast %53 : vector<1x32x32xbf16> to vector<32x32xbf16>
    %55 = arith.truncf %52 : vector<32x50xf32> to vector<32x50xbf16>
    %cst_49 = arith.constant dense<0.000000e+00> : vector<32x50xf32>
    %56 = tpu.matmul %54, %55, %cst_49 {dimension_numbers = #tpu.dot_dimension_numbers<[1], [0], [0], [1], [0, 0, 1, 1], [], []>} : vector<32x32xbf16>, vector<32x50xbf16>, vector<32x50xf32> -> vector<32x50xf32>
    %57 = arith.addf %49, %56 : vector<32x50xf32>
    %c6 = arith.constant 6 : index
    %c0_50 = arith.constant 0 : index
    %c0_51 = arith.constant 0 : index
    %58 = vector.load %arg3[%c6, %c0_50, %c0_51] : memref<9x98x50xbf16, #tpu.memory_space<vmem>>, vector<1x98x50xbf16>
    %59 = vector.shape_cast %58 : vector<1x98x50xbf16> to vector<98x50xbf16>
    %cst_52 = arith.constant dense<0.000000e+00> : vector<32x50xf32>
    %60 = tpu.matmul %8, %59, %cst_52 {dimension_numbers = #tpu.dot_dimension_numbers<[1], [0], [0], [1], [0, 0, 1, 1], [], []>} : vector<32x98xbf16>, vector<98x50xbf16>, vector<32x50xf32> -> vector<32x50xf32>
    %c6_53 = arith.constant 6 : index
    %c0_54 = arith.constant 0 : index
    %c0_55 = arith.constant 0 : index
    %61 = vector.load %arg4[%c6_53, %c0_54, %c0_55] : memref<9x32x32xbf16, #tpu.memory_space<vmem>>, vector<1x32x32xbf16>
    %62 = vector.shape_cast %61 : vector<1x32x32xbf16> to vector<32x32xbf16>
    %63 = arith.truncf %60 : vector<32x50xf32> to vector<32x50xbf16>
    %cst_56 = arith.constant dense<0.000000e+00> : vector<32x50xf32>
    %64 = tpu.matmul %62, %63, %cst_56 {dimension_numbers = #tpu.dot_dimension_numbers<[1], [0], [0], [1], [0, 0, 1, 1], [], []>} : vector<32x32xbf16>, vector<32x50xbf16>, vector<32x50xf32> -> vector<32x50xf32>
    %65 = arith.addf %57, %64 : vector<32x50xf32>
    %c7 = arith.constant 7 : index
    %c0_57 = arith.constant 0 : index
    %c0_58 = arith.constant 0 : index
    %66 = vector.load %arg3[%c7, %c0_57, %c0_58] : memref<9x98x50xbf16, #tpu.memory_space<vmem>>, vector<1x98x50xbf16>
    %67 = vector.shape_cast %66 : vector<1x98x50xbf16> to vector<98x50xbf16>
    %cst_59 = arith.constant dense<0.000000e+00> : vector<32x50xf32>
    %68 = tpu.matmul %8, %67, %cst_59 {dimension_numbers = #tpu.dot_dimension_numbers<[1], [0], [0], [1], [0, 0, 1, 1], [], []>} : vector<32x98xbf16>, vector<98x50xbf16>, vector<32x50xf32> -> vector<32x50xf32>
    %c7_60 = arith.constant 7 : index
    %c0_61 = arith.constant 0 : index
    %c0_62 = arith.constant 0 : index
    %69 = vector.load %arg4[%c7_60, %c0_61, %c0_62] : memref<9x32x32xbf16, #tpu.memory_space<vmem>>, vector<1x32x32xbf16>
    %70 = vector.shape_cast %69 : vector<1x32x32xbf16> to vector<32x32xbf16>
    %71 = arith.truncf %68 : vector<32x50xf32> to vector<32x50xbf16>
    %cst_63 = arith.constant dense<0.000000e+00> : vector<32x50xf32>
    %72 = tpu.matmul %70, %71, %cst_63 {dimension_numbers = #tpu.dot_dimension_numbers<[1], [0], [0], [1], [0, 0, 1, 1], [], []>} : vector<32x32xbf16>, vector<32x50xbf16>, vector<32x50xf32> -> vector<32x50xf32>
    %73 = arith.addf %65, %72 : vector<32x50xf32>
    %c8 = arith.constant 8 : index
    %c0_64 = arith.constant 0 : index
    %c0_65 = arith.constant 0 : index
    %74 = vector.load %arg3[%c8, %c0_64, %c0_65] : memref<9x98x50xbf16, #tpu.memory_space<vmem>>, vector<1x98x50xbf16>
    %75 = vector.shape_cast %74 : vector<1x98x50xbf16> to vector<98x50xbf16>
    %cst_66 = arith.constant dense<0.000000e+00> : vector<32x50xf32>
    %76 = tpu.matmul %8, %75, %cst_66 {dimension_numbers = #tpu.dot_dimension_numbers<[1], [0], [0], [1], [0, 0, 1, 1], [], []>} : vector<32x98xbf16>, vector<98x50xbf16>, vector<32x50xf32> -> vector<32x50xf32>
    %c8_67 = arith.constant 8 : index
    %c0_68 = arith.constant 0 : index
    %c0_69 = arith.constant 0 : index
    %77 = vector.load %arg4[%c8_67, %c0_68, %c0_69] : memref<9x32x32xbf16, #tpu.memory_space<vmem>>, vector<1x32x32xbf16>
    %78 = vector.shape_cast %77 : vector<1x32x32xbf16> to vector<32x32xbf16>
    %79 = arith.truncf %76 : vector<32x50xf32> to vector<32x50xbf16>
    %cst_70 = arith.constant dense<0.000000e+00> : vector<32x50xf32>
    %80 = tpu.matmul %78, %79, %cst_70 {dimension_numbers = #tpu.dot_dimension_numbers<[1], [0], [0], [1], [0, 0, 1, 1], [], []>} : vector<32x32xbf16>, vector<32x50xbf16>, vector<32x50xf32> -> vector<32x50xf32>
    %81 = arith.addf %73, %80 : vector<32x50xf32>
    %c0_71 = arith.constant 0 : index
    %c0_72 = arith.constant 0 : index
    %82 = vector.load %arg5[%c0_71, %c0_72] : memref<32x1xf32, #tpu.memory_space<vmem>>, vector<32x1xf32>
    %83 = vector.broadcast %82 : vector<32x1xf32> to vector<32x50xf32>
    %84 = arith.addf %81, %83 : vector<32x50xf32>
    %cst_73 = arith.constant 0.000000e+00 : f32
    %85 = vector.broadcast %cst_73 : f32 to vector<32x50xf32>
    %86 = arith.maximumf %84, %85 : vector<32x50xf32>
    %87 = arith.truncf %86 : vector<32x50xf32> to vector<32x50xbf16>
    %cst_74 = arith.constant 0.000000e+00 : f32
    %88 = vector.broadcast %cst_74 : f32 to vector<32x18xf32>
    %c0_75 = arith.constant 0 : index
    %c0_76 = arith.constant 0 : index
    %c0_77 = arith.constant 0 : index
    %89 = vector.load %arg6[%c0_75, %c0_76, %c0_77] : memref<9x50x18xbf16, #tpu.memory_space<vmem>>, vector<1x50x18xbf16>
    %90 = vector.shape_cast %89 : vector<1x50x18xbf16> to vector<50x18xbf16>
    %cst_78 = arith.constant dense<0.000000e+00> : vector<32x18xf32>
    %91 = tpu.matmul %87, %90, %cst_78 {dimension_numbers = #tpu.dot_dimension_numbers<[1], [0], [0], [1], [0, 0, 1, 1], [], []>} : vector<32x50xbf16>, vector<50x18xbf16>, vector<32x18xf32> -> vector<32x18xf32>
    %c0_79 = arith.constant 0 : index
    %c0_80 = arith.constant 0 : index
    %c0_81 = arith.constant 0 : index
    %92 = vector.load %arg7[%c0_79, %c0_80, %c0_81] : memref<9x32x32xbf16, #tpu.memory_space<vmem>>, vector<1x32x32xbf16>
    %93 = vector.shape_cast %92 : vector<1x32x32xbf16> to vector<32x32xbf16>
    %94 = arith.truncf %91 : vector<32x18xf32> to vector<32x18xbf16>
    %cst_82 = arith.constant dense<0.000000e+00> : vector<32x18xf32>
    %95 = tpu.matmul %93, %94, %cst_82 {dimension_numbers = #tpu.dot_dimension_numbers<[1], [0], [0], [1], [0, 0, 1, 1], [], []>} : vector<32x32xbf16>, vector<32x18xbf16>, vector<32x18xf32> -> vector<32x18xf32>
    %96 = arith.addf %88, %95 : vector<32x18xf32>
    %c1_83 = arith.constant 1 : index
    %c0_84 = arith.constant 0 : index
    %c0_85 = arith.constant 0 : index
    %97 = vector.load %arg6[%c1_83, %c0_84, %c0_85] : memref<9x50x18xbf16, #tpu.memory_space<vmem>>, vector<1x50x18xbf16>
    %98 = vector.shape_cast %97 : vector<1x50x18xbf16> to vector<50x18xbf16>
    %cst_86 = arith.constant dense<0.000000e+00> : vector<32x18xf32>
    %99 = tpu.matmul %87, %98, %cst_86 {dimension_numbers = #tpu.dot_dimension_numbers<[1], [0], [0], [1], [0, 0, 1, 1], [], []>} : vector<32x50xbf16>, vector<50x18xbf16>, vector<32x18xf32> -> vector<32x18xf32>
    %c1_87 = arith.constant 1 : index
    %c0_88 = arith.constant 0 : index
    %c0_89 = arith.constant 0 : index
    %100 = vector.load %arg7[%c1_87, %c0_88, %c0_89] : memref<9x32x32xbf16, #tpu.memory_space<vmem>>, vector<1x32x32xbf16>
    %101 = vector.shape_cast %100 : vector<1x32x32xbf16> to vector<32x32xbf16>
    %102 = arith.truncf %99 : vector<32x18xf32> to vector<32x18xbf16>
    %cst_90 = arith.constant dense<0.000000e+00> : vector<32x18xf32>
    %103 = tpu.matmul %101, %102, %cst_90 {dimension_numbers = #tpu.dot_dimension_numbers<[1], [0], [0], [1], [0, 0, 1, 1], [], []>} : vector<32x32xbf16>, vector<32x18xbf16>, vector<32x18xf32> -> vector<32x18xf32>
    %104 = arith.addf %96, %103 : vector<32x18xf32>
    %c2_91 = arith.constant 2 : index
    %c0_92 = arith.constant 0 : index
    %c0_93 = arith.constant 0 : index
    %105 = vector.load %arg6[%c2_91, %c0_92, %c0_93] : memref<9x50x18xbf16, #tpu.memory_space<vmem>>, vector<1x50x18xbf16>
    %106 = vector.shape_cast %105 : vector<1x50x18xbf16> to vector<50x18xbf16>
    %cst_94 = arith.constant dense<0.000000e+00> : vector<32x18xf32>
    %107 = tpu.matmul %87, %106, %cst_94 {dimension_numbers = #tpu.dot_dimension_numbers<[1], [0], [0], [1], [0, 0, 1, 1], [], []>} : vector<32x50xbf16>, vector<50x18xbf16>, vector<32x18xf32> -> vector<32x18xf32>
    %c2_95 = arith.constant 2 : index
    %c0_96 = arith.constant 0 : index
    %c0_97 = arith.constant 0 : index
    %108 = vector.load %arg7[%c2_95, %c0_96, %c0_97] : memref<9x32x32xbf16, #tpu.memory_space<vmem>>, vector<1x32x32xbf16>
    %109 = vector.shape_cast %108 : vector<1x32x32xbf16> to vector<32x32xbf16>
    %110 = arith.truncf %107 : vector<32x18xf32> to vector<32x18xbf16>
    %cst_98 = arith.constant dense<0.000000e+00> : vector<32x18xf32>
    %111 = tpu.matmul %109, %110, %cst_98 {dimension_numbers = #tpu.dot_dimension_numbers<[1], [0], [0], [1], [0, 0, 1, 1], [], []>} : vector<32x32xbf16>, vector<32x18xbf16>, vector<32x18xf32> -> vector<32x18xf32>
    %112 = arith.addf %104, %111 : vector<32x18xf32>
    %c3_99 = arith.constant 3 : index
    %c0_100 = arith.constant 0 : index
    %c0_101 = arith.constant 0 : index
    %113 = vector.load %arg6[%c3_99, %c0_100, %c0_101] : memref<9x50x18xbf16, #tpu.memory_space<vmem>>, vector<1x50x18xbf16>
    %114 = vector.shape_cast %113 : vector<1x50x18xbf16> to vector<50x18xbf16>
    %cst_102 = arith.constant dense<0.000000e+00> : vector<32x18xf32>
    %115 = tpu.matmul %87, %114, %cst_102 {dimension_numbers = #tpu.dot_dimension_numbers<[1], [0], [0], [1], [0, 0, 1, 1], [], []>} : vector<32x50xbf16>, vector<50x18xbf16>, vector<32x18xf32> -> vector<32x18xf32>
    %c3_103 = arith.constant 3 : index
    %c0_104 = arith.constant 0 : index
    %c0_105 = arith.constant 0 : index
    %116 = vector.load %arg7[%c3_103, %c0_104, %c0_105] : memref<9x32x32xbf16, #tpu.memory_space<vmem>>, vector<1x32x32xbf16>
    %117 = vector.shape_cast %116 : vector<1x32x32xbf16> to vector<32x32xbf16>
    %118 = arith.truncf %115 : vector<32x18xf32> to vector<32x18xbf16>
    %cst_106 = arith.constant dense<0.000000e+00> : vector<32x18xf32>
    %119 = tpu.matmul %117, %118, %cst_106 {dimension_numbers = #tpu.dot_dimension_numbers<[1], [0], [0], [1], [0, 0, 1, 1], [], []>} : vector<32x32xbf16>, vector<32x18xbf16>, vector<32x18xf32> -> vector<32x18xf32>
    %120 = arith.addf %112, %119 : vector<32x18xf32>
    %c4_107 = arith.constant 4 : index
    %c0_108 = arith.constant 0 : index
    %c0_109 = arith.constant 0 : index
    %121 = vector.load %arg6[%c4_107, %c0_108, %c0_109] : memref<9x50x18xbf16, #tpu.memory_space<vmem>>, vector<1x50x18xbf16>
    %122 = vector.shape_cast %121 : vector<1x50x18xbf16> to vector<50x18xbf16>
    %cst_110 = arith.constant dense<0.000000e+00> : vector<32x18xf32>
    %123 = tpu.matmul %87, %122, %cst_110 {dimension_numbers = #tpu.dot_dimension_numbers<[1], [0], [0], [1], [0, 0, 1, 1], [], []>} : vector<32x50xbf16>, vector<50x18xbf16>, vector<32x18xf32> -> vector<32x18xf32>
    %c4_111 = arith.constant 4 : index
    %c0_112 = arith.constant 0 : index
    %c0_113 = arith.constant 0 : index
    %124 = vector.load %arg7[%c4_111, %c0_112, %c0_113] : memref<9x32x32xbf16, #tpu.memory_space<vmem>>, vector<1x32x32xbf16>
    %125 = vector.shape_cast %124 : vector<1x32x32xbf16> to vector<32x32xbf16>
    %126 = arith.truncf %123 : vector<32x18xf32> to vector<32x18xbf16>
    %cst_114 = arith.constant dense<0.000000e+00> : vector<32x18xf32>
    %127 = tpu.matmul %125, %126, %cst_114 {dimension_numbers = #tpu.dot_dimension_numbers<[1], [0], [0], [1], [0, 0, 1, 1], [], []>} : vector<32x32xbf16>, vector<32x18xbf16>, vector<32x18xf32> -> vector<32x18xf32>
    %128 = arith.addf %120, %127 : vector<32x18xf32>
    %c5_115 = arith.constant 5 : index
    %c0_116 = arith.constant 0 : index
    %c0_117 = arith.constant 0 : index
    %129 = vector.load %arg6[%c5_115, %c0_116, %c0_117] : memref<9x50x18xbf16, #tpu.memory_space<vmem>>, vector<1x50x18xbf16>
    %130 = vector.shape_cast %129 : vector<1x50x18xbf16> to vector<50x18xbf16>
    %cst_118 = arith.constant dense<0.000000e+00> : vector<32x18xf32>
    %131 = tpu.matmul %87, %130, %cst_118 {dimension_numbers = #tpu.dot_dimension_numbers<[1], [0], [0], [1], [0, 0, 1, 1], [], []>} : vector<32x50xbf16>, vector<50x18xbf16>, vector<32x18xf32> -> vector<32x18xf32>
    %c5_119 = arith.constant 5 : index
    %c0_120 = arith.constant 0 : index
    %c0_121 = arith.constant 0 : index
    %132 = vector.load %arg7[%c5_119, %c0_120, %c0_121] : memref<9x32x32xbf16, #tpu.memory_space<vmem>>, vector<1x32x32xbf16>
    %133 = vector.shape_cast %132 : vector<1x32x32xbf16> to vector<32x32xbf16>
    %134 = arith.truncf %131 : vector<32x18xf32> to vector<32x18xbf16>
    %cst_122 = arith.constant dense<0.000000e+00> : vector<32x18xf32>
    %135 = tpu.matmul %133, %134, %cst_122 {dimension_numbers = #tpu.dot_dimension_numbers<[1], [0], [0], [1], [0, 0, 1, 1], [], []>} : vector<32x32xbf16>, vector<32x18xbf16>, vector<32x18xf32> -> vector<32x18xf32>
    %136 = arith.addf %128, %135 : vector<32x18xf32>
    %c6_123 = arith.constant 6 : index
    %c0_124 = arith.constant 0 : index
    %c0_125 = arith.constant 0 : index
    %137 = vector.load %arg6[%c6_123, %c0_124, %c0_125] : memref<9x50x18xbf16, #tpu.memory_space<vmem>>, vector<1x50x18xbf16>
    %138 = vector.shape_cast %137 : vector<1x50x18xbf16> to vector<50x18xbf16>
    %cst_126 = arith.constant dense<0.000000e+00> : vector<32x18xf32>
    %139 = tpu.matmul %87, %138, %cst_126 {dimension_numbers = #tpu.dot_dimension_numbers<[1], [0], [0], [1], [0, 0, 1, 1], [], []>} : vector<32x50xbf16>, vector<50x18xbf16>, vector<32x18xf32> -> vector<32x18xf32>
    %c6_127 = arith.constant 6 : index
    %c0_128 = arith.constant 0 : index
    %c0_129 = arith.constant 0 : index
    %140 = vector.load %arg7[%c6_127, %c0_128, %c0_129] : memref<9x32x32xbf16, #tpu.memory_space<vmem>>, vector<1x32x32xbf16>
    %141 = vector.shape_cast %140 : vector<1x32x32xbf16> to vector<32x32xbf16>
    %142 = arith.truncf %139 : vector<32x18xf32> to vector<32x18xbf16>
    %cst_130 = arith.constant dense<0.000000e+00> : vector<32x18xf32>
    %143 = tpu.matmul %141, %142, %cst_130 {dimension_numbers = #tpu.dot_dimension_numbers<[1], [0], [0], [1], [0, 0, 1, 1], [], []>} : vector<32x32xbf16>, vector<32x18xbf16>, vector<32x18xf32> -> vector<32x18xf32>
    %144 = arith.addf %136, %143 : vector<32x18xf32>
    %c7_131 = arith.constant 7 : index
    %c0_132 = arith.constant 0 : index
    %c0_133 = arith.constant 0 : index
    %145 = vector.load %arg6[%c7_131, %c0_132, %c0_133] : memref<9x50x18xbf16, #tpu.memory_space<vmem>>, vector<1x50x18xbf16>
    %146 = vector.shape_cast %145 : vector<1x50x18xbf16> to vector<50x18xbf16>
    %cst_134 = arith.constant dense<0.000000e+00> : vector<32x18xf32>
    %147 = tpu.matmul %87, %146, %cst_134 {dimension_numbers = #tpu.dot_dimension_numbers<[1], [0], [0], [1], [0, 0, 1, 1], [], []>} : vector<32x50xbf16>, vector<50x18xbf16>, vector<32x18xf32> -> vector<32x18xf32>
    %c7_135 = arith.constant 7 : index
    %c0_136 = arith.constant 0 : index
    %c0_137 = arith.constant 0 : index
    %148 = vector.load %arg7[%c7_135, %c0_136, %c0_137] : memref<9x32x32xbf16, #tpu.memory_space<vmem>>, vector<1x32x32xbf16>
    %149 = vector.shape_cast %148 : vector<1x32x32xbf16> to vector<32x32xbf16>
    %150 = arith.truncf %147 : vector<32x18xf32> to vector<32x18xbf16>
    %cst_138 = arith.constant dense<0.000000e+00> : vector<32x18xf32>
    %151 = tpu.matmul %149, %150, %cst_138 {dimension_numbers = #tpu.dot_dimension_numbers<[1], [0], [0], [1], [0, 0, 1, 1], [], []>} : vector<32x32xbf16>, vector<32x18xbf16>, vector<32x18xf32> -> vector<32x18xf32>
    %152 = arith.addf %144, %151 : vector<32x18xf32>
    %c8_139 = arith.constant 8 : index
    %c0_140 = arith.constant 0 : index
    %c0_141 = arith.constant 0 : index
    %153 = vector.load %arg6[%c8_139, %c0_140, %c0_141] : memref<9x50x18xbf16, #tpu.memory_space<vmem>>, vector<1x50x18xbf16>
    %154 = vector.shape_cast %153 : vector<1x50x18xbf16> to vector<50x18xbf16>
    %cst_142 = arith.constant dense<0.000000e+00> : vector<32x18xf32>
    %155 = tpu.matmul %87, %154, %cst_142 {dimension_numbers = #tpu.dot_dimension_numbers<[1], [0], [0], [1], [0, 0, 1, 1], [], []>} : vector<32x50xbf16>, vector<50x18xbf16>, vector<32x18xf32> -> vector<32x18xf32>
    %c8_143 = arith.constant 8 : index
    %c0_144 = arith.constant 0 : index
    %c0_145 = arith.constant 0 : index
    %156 = vector.load %arg7[%c8_143, %c0_144, %c0_145] : memref<9x32x32xbf16, #tpu.memory_space<vmem>>, vector<1x32x32xbf16>
    %157 = vector.shape_cast %156 : vector<1x32x32xbf16> to vector<32x32xbf16>
    %158 = arith.truncf %155 : vector<32x18xf32> to vector<32x18xbf16>
    %cst_146 = arith.constant dense<0.000000e+00> : vector<32x18xf32>
    %159 = tpu.matmul %157, %158, %cst_146 {dimension_numbers = #tpu.dot_dimension_numbers<[1], [0], [0], [1], [0, 0, 1, 1], [], []>} : vector<32x32xbf16>, vector<32x18xbf16>, vector<32x18xf32> -> vector<32x18xf32>
    %160 = arith.addf %152, %159 : vector<32x18xf32>
    %c0_147 = arith.constant 0 : index
    %c0_148 = arith.constant 0 : index
    %161 = vector.load %arg8[%c0_147, %c0_148] : memref<32x1xf32, #tpu.memory_space<vmem>>, vector<32x1xf32>
    %162 = vector.broadcast %161 : vector<32x1xf32> to vector<32x18xf32>
    %163 = arith.addf %160, %162 : vector<32x18xf32>
    %cst_149 = arith.constant 0.000000e+00 : f32
    %164 = vector.broadcast %cst_149 : f32 to vector<32x18xf32>
    %165 = arith.maximumf %163, %164 : vector<32x18xf32>
    %166 = arith.truncf %165 : vector<32x18xf32> to vector<32x18xbf16>
    %cst_150 = arith.constant 0.000000e+00 : f32
    %167 = vector.broadcast %cst_150 : f32 to vector<32x2xf32>
    %c0_151 = arith.constant 0 : index
    %c0_152 = arith.constant 0 : index
    %c0_153 = arith.constant 0 : index
    %168 = vector.load %arg9[%c0_151, %c0_152, %c0_153] : memref<9x18x2xbf16, #tpu.memory_space<vmem>>, vector<1x18x2xbf16>
    %169 = vector.shape_cast %168 : vector<1x18x2xbf16> to vector<18x2xbf16>
    %cst_154 = arith.constant dense<0.000000e+00> : vector<32x2xf32>
    %170 = tpu.matmul %166, %169, %cst_154 {dimension_numbers = #tpu.dot_dimension_numbers<[1], [0], [0], [1], [0, 0, 1, 1], [], []>} : vector<32x18xbf16>, vector<18x2xbf16>, vector<32x2xf32> -> vector<32x2xf32>
    %c0_155 = arith.constant 0 : index
    %c0_156 = arith.constant 0 : index
    %c0_157 = arith.constant 0 : index
    %171 = vector.load %arg10[%c0_155, %c0_156, %c0_157] : memref<9x32x32xbf16, #tpu.memory_space<vmem>>, vector<1x32x32xbf16>
    %172 = vector.shape_cast %171 : vector<1x32x32xbf16> to vector<32x32xbf16>
    %173 = arith.truncf %170 : vector<32x2xf32> to vector<32x2xbf16>
    %cst_158 = arith.constant dense<0.000000e+00> : vector<32x2xf32>
    %174 = tpu.matmul %172, %173, %cst_158 {dimension_numbers = #tpu.dot_dimension_numbers<[1], [0], [0], [1], [0, 0, 1, 1], [], []>} : vector<32x32xbf16>, vector<32x2xbf16>, vector<32x2xf32> -> vector<32x2xf32>
    %175 = arith.addf %167, %174 : vector<32x2xf32>
    %c1_159 = arith.constant 1 : index
    %c0_160 = arith.constant 0 : index
    %c0_161 = arith.constant 0 : index
    %176 = vector.load %arg9[%c1_159, %c0_160, %c0_161] : memref<9x18x2xbf16, #tpu.memory_space<vmem>>, vector<1x18x2xbf16>
    %177 = vector.shape_cast %176 : vector<1x18x2xbf16> to vector<18x2xbf16>
    %cst_162 = arith.constant dense<0.000000e+00> : vector<32x2xf32>
    %178 = tpu.matmul %166, %177, %cst_162 {dimension_numbers = #tpu.dot_dimension_numbers<[1], [0], [0], [1], [0, 0, 1, 1], [], []>} : vector<32x18xbf16>, vector<18x2xbf16>, vector<32x2xf32> -> vector<32x2xf32>
    %c1_163 = arith.constant 1 : index
    %c0_164 = arith.constant 0 : index
    %c0_165 = arith.constant 0 : index
    %179 = vector.load %arg10[%c1_163, %c0_164, %c0_165] : memref<9x32x32xbf16, #tpu.memory_space<vmem>>, vector<1x32x32xbf16>
    %180 = vector.shape_cast %179 : vector<1x32x32xbf16> to vector<32x32xbf16>
    %181 = arith.truncf %178 : vector<32x2xf32> to vector<32x2xbf16>
    %cst_166 = arith.constant dense<0.000000e+00> : vector<32x2xf32>
    %182 = tpu.matmul %180, %181, %cst_166 {dimension_numbers = #tpu.dot_dimension_numbers<[1], [0], [0], [1], [0, 0, 1, 1], [], []>} : vector<32x32xbf16>, vector<32x2xbf16>, vector<32x2xf32> -> vector<32x2xf32>
    %183 = arith.addf %175, %182 : vector<32x2xf32>
    %c2_167 = arith.constant 2 : index
    %c0_168 = arith.constant 0 : index
    %c0_169 = arith.constant 0 : index
    %184 = vector.load %arg9[%c2_167, %c0_168, %c0_169] : memref<9x18x2xbf16, #tpu.memory_space<vmem>>, vector<1x18x2xbf16>
    %185 = vector.shape_cast %184 : vector<1x18x2xbf16> to vector<18x2xbf16>
    %cst_170 = arith.constant dense<0.000000e+00> : vector<32x2xf32>
    %186 = tpu.matmul %166, %185, %cst_170 {dimension_numbers = #tpu.dot_dimension_numbers<[1], [0], [0], [1], [0, 0, 1, 1], [], []>} : vector<32x18xbf16>, vector<18x2xbf16>, vector<32x2xf32> -> vector<32x2xf32>
    %c2_171 = arith.constant 2 : index
    %c0_172 = arith.constant 0 : index
    %c0_173 = arith.constant 0 : index
    %187 = vector.load %arg10[%c2_171, %c0_172, %c0_173] : memref<9x32x32xbf16, #tpu.memory_space<vmem>>, vector<1x32x32xbf16>
    %188 = vector.shape_cast %187 : vector<1x32x32xbf16> to vector<32x32xbf16>
    %189 = arith.truncf %186 : vector<32x2xf32> to vector<32x2xbf16>
    %cst_174 = arith.constant dense<0.000000e+00> : vector<32x2xf32>
    %190 = tpu.matmul %188, %189, %cst_174 {dimension_numbers = #tpu.dot_dimension_numbers<[1], [0], [0], [1], [0, 0, 1, 1], [], []>} : vector<32x32xbf16>, vector<32x2xbf16>, vector<32x2xf32> -> vector<32x2xf32>
    %191 = arith.addf %183, %190 : vector<32x2xf32>
    %c3_175 = arith.constant 3 : index
    %c0_176 = arith.constant 0 : index
    %c0_177 = arith.constant 0 : index
    %192 = vector.load %arg9[%c3_175, %c0_176, %c0_177] : memref<9x18x2xbf16, #tpu.memory_space<vmem>>, vector<1x18x2xbf16>
    %193 = vector.shape_cast %192 : vector<1x18x2xbf16> to vector<18x2xbf16>
    %cst_178 = arith.constant dense<0.000000e+00> : vector<32x2xf32>
    %194 = tpu.matmul %166, %193, %cst_178 {dimension_numbers = #tpu.dot_dimension_numbers<[1], [0], [0], [1], [0, 0, 1, 1], [], []>} : vector<32x18xbf16>, vector<18x2xbf16>, vector<32x2xf32> -> vector<32x2xf32>
    %c3_179 = arith.constant 3 : index
    %c0_180 = arith.constant 0 : index
    %c0_181 = arith.constant 0 : index
    %195 = vector.load %arg10[%c3_179, %c0_180, %c0_181] : memref<9x32x32xbf16, #tpu.memory_space<vmem>>, vector<1x32x32xbf16>
    %196 = vector.shape_cast %195 : vector<1x32x32xbf16> to vector<32x32xbf16>
    %197 = arith.truncf %194 : vector<32x2xf32> to vector<32x2xbf16>
    %cst_182 = arith.constant dense<0.000000e+00> : vector<32x2xf32>
    %198 = tpu.matmul %196, %197, %cst_182 {dimension_numbers = #tpu.dot_dimension_numbers<[1], [0], [0], [1], [0, 0, 1, 1], [], []>} : vector<32x32xbf16>, vector<32x2xbf16>, vector<32x2xf32> -> vector<32x2xf32>
    %199 = arith.addf %191, %198 : vector<32x2xf32>
    %c4_183 = arith.constant 4 : index
    %c0_184 = arith.constant 0 : index
    %c0_185 = arith.constant 0 : index
    %200 = vector.load %arg9[%c4_183, %c0_184, %c0_185] : memref<9x18x2xbf16, #tpu.memory_space<vmem>>, vector<1x18x2xbf16>
    %201 = vector.shape_cast %200 : vector<1x18x2xbf16> to vector<18x2xbf16>
    %cst_186 = arith.constant dense<0.000000e+00> : vector<32x2xf32>
    %202 = tpu.matmul %166, %201, %cst_186 {dimension_numbers = #tpu.dot_dimension_numbers<[1], [0], [0], [1], [0, 0, 1, 1], [], []>} : vector<32x18xbf16>, vector<18x2xbf16>, vector<32x2xf32> -> vector<32x2xf32>
    %c4_187 = arith.constant 4 : index
    %c0_188 = arith.constant 0 : index
    %c0_189 = arith.constant 0 : index
    %203 = vector.load %arg10[%c4_187, %c0_188, %c0_189] : memref<9x32x32xbf16, #tpu.memory_space<vmem>>, vector<1x32x32xbf16>
    %204 = vector.shape_cast %203 : vector<1x32x32xbf16> to vector<32x32xbf16>
    %205 = arith.truncf %202 : vector<32x2xf32> to vector<32x2xbf16>
    %cst_190 = arith.constant dense<0.000000e+00> : vector<32x2xf32>
    %206 = tpu.matmul %204, %205, %cst_190 {dimension_numbers = #tpu.dot_dimension_numbers<[1], [0], [0], [1], [0, 0, 1, 1], [], []>} : vector<32x32xbf16>, vector<32x2xbf16>, vector<32x2xf32> -> vector<32x2xf32>
    %207 = arith.addf %199, %206 : vector<32x2xf32>
    %c5_191 = arith.constant 5 : index
    %c0_192 = arith.constant 0 : index
    %c0_193 = arith.constant 0 : index
    %208 = vector.load %arg9[%c5_191, %c0_192, %c0_193] : memref<9x18x2xbf16, #tpu.memory_space<vmem>>, vector<1x18x2xbf16>
    %209 = vector.shape_cast %208 : vector<1x18x2xbf16> to vector<18x2xbf16>
    %cst_194 = arith.constant dense<0.000000e+00> : vector<32x2xf32>
    %210 = tpu.matmul %166, %209, %cst_194 {dimension_numbers = #tpu.dot_dimension_numbers<[1], [0], [0], [1], [0, 0, 1, 1], [], []>} : vector<32x18xbf16>, vector<18x2xbf16>, vector<32x2xf32> -> vector<32x2xf32>
    %c5_195 = arith.constant 5 : index
    %c0_196 = arith.constant 0 : index
    %c0_197 = arith.constant 0 : index
    %211 = vector.load %arg10[%c5_195, %c0_196, %c0_197] : memref<9x32x32xbf16, #tpu.memory_space<vmem>>, vector<1x32x32xbf16>
    %212 = vector.shape_cast %211 : vector<1x32x32xbf16> to vector<32x32xbf16>
    %213 = arith.truncf %210 : vector<32x2xf32> to vector<32x2xbf16>
    %cst_198 = arith.constant dense<0.000000e+00> : vector<32x2xf32>
    %214 = tpu.matmul %212, %213, %cst_198 {dimension_numbers = #tpu.dot_dimension_numbers<[1], [0], [0], [1], [0, 0, 1, 1], [], []>} : vector<32x32xbf16>, vector<32x2xbf16>, vector<32x2xf32> -> vector<32x2xf32>
    %215 = arith.addf %207, %214 : vector<32x2xf32>
    %c6_199 = arith.constant 6 : index
    %c0_200 = arith.constant 0 : index
    %c0_201 = arith.constant 0 : index
    %216 = vector.load %arg9[%c6_199, %c0_200, %c0_201] : memref<9x18x2xbf16, #tpu.memory_space<vmem>>, vector<1x18x2xbf16>
    %217 = vector.shape_cast %216 : vector<1x18x2xbf16> to vector<18x2xbf16>
    %cst_202 = arith.constant dense<0.000000e+00> : vector<32x2xf32>
    %218 = tpu.matmul %166, %217, %cst_202 {dimension_numbers = #tpu.dot_dimension_numbers<[1], [0], [0], [1], [0, 0, 1, 1], [], []>} : vector<32x18xbf16>, vector<18x2xbf16>, vector<32x2xf32> -> vector<32x2xf32>
    %c6_203 = arith.constant 6 : index
    %c0_204 = arith.constant 0 : index
    %c0_205 = arith.constant 0 : index
    %219 = vector.load %arg10[%c6_203, %c0_204, %c0_205] : memref<9x32x32xbf16, #tpu.memory_space<vmem>>, vector<1x32x32xbf16>
    %220 = vector.shape_cast %219 : vector<1x32x32xbf16> to vector<32x32xbf16>
    %221 = arith.truncf %218 : vector<32x2xf32> to vector<32x2xbf16>
    %cst_206 = arith.constant dense<0.000000e+00> : vector<32x2xf32>
    %222 = tpu.matmul %220, %221, %cst_206 {dimension_numbers = #tpu.dot_dimension_numbers<[1], [0], [0], [1], [0, 0, 1, 1], [], []>} : vector<32x32xbf16>, vector<32x2xbf16>, vector<32x2xf32> -> vector<32x2xf32>
    %223 = arith.addf %215, %222 : vector<32x2xf32>
    %c7_207 = arith.constant 7 : index
    %c0_208 = arith.constant 0 : index
    %c0_209 = arith.constant 0 : index
    %224 = vector.load %arg9[%c7_207, %c0_208, %c0_209] : memref<9x18x2xbf16, #tpu.memory_space<vmem>>, vector<1x18x2xbf16>
    %225 = vector.shape_cast %224 : vector<1x18x2xbf16> to vector<18x2xbf16>
    %cst_210 = arith.constant dense<0.000000e+00> : vector<32x2xf32>
    %226 = tpu.matmul %166, %225, %cst_210 {dimension_numbers = #tpu.dot_dimension_numbers<[1], [0], [0], [1], [0, 0, 1, 1], [], []>} : vector<32x18xbf16>, vector<18x2xbf16>, vector<32x2xf32> -> vector<32x2xf32>
    %c7_211 = arith.constant 7 : index
    %c0_212 = arith.constant 0 : index
    %c0_213 = arith.constant 0 : index
    %227 = vector.load %arg10[%c7_211, %c0_212, %c0_213] : memref<9x32x32xbf16, #tpu.memory_space<vmem>>, vector<1x32x32xbf16>
    %228 = vector.shape_cast %227 : vector<1x32x32xbf16> to vector<32x32xbf16>
    %229 = arith.truncf %226 : vector<32x2xf32> to vector<32x2xbf16>
    %cst_214 = arith.constant dense<0.000000e+00> : vector<32x2xf32>
    %230 = tpu.matmul %228, %229, %cst_214 {dimension_numbers = #tpu.dot_dimension_numbers<[1], [0], [0], [1], [0, 0, 1, 1], [], []>} : vector<32x32xbf16>, vector<32x2xbf16>, vector<32x2xf32> -> vector<32x2xf32>
    %231 = arith.addf %223, %230 : vector<32x2xf32>
    %c8_215 = arith.constant 8 : index
    %c0_216 = arith.constant 0 : index
    %c0_217 = arith.constant 0 : index
    %232 = vector.load %arg9[%c8_215, %c0_216, %c0_217] : memref<9x18x2xbf16, #tpu.memory_space<vmem>>, vector<1x18x2xbf16>
    %233 = vector.shape_cast %232 : vector<1x18x2xbf16> to vector<18x2xbf16>
    %cst_218 = arith.constant dense<0.000000e+00> : vector<32x2xf32>
    %234 = tpu.matmul %166, %233, %cst_218 {dimension_numbers = #tpu.dot_dimension_numbers<[1], [0], [0], [1], [0, 0, 1, 1], [], []>} : vector<32x18xbf16>, vector<18x2xbf16>, vector<32x2xf32> -> vector<32x2xf32>
    %c8_219 = arith.constant 8 : index
    %c0_220 = arith.constant 0 : index
    %c0_221 = arith.constant 0 : index
    %235 = vector.load %arg10[%c8_219, %c0_220, %c0_221] : memref<9x32x32xbf16, #tpu.memory_space<vmem>>, vector<1x32x32xbf16>
    %236 = vector.shape_cast %235 : vector<1x32x32xbf16> to vector<32x32xbf16>
    %237 = arith.truncf %234 : vector<32x2xf32> to vector<32x2xbf16>
    %cst_222 = arith.constant dense<0.000000e+00> : vector<32x2xf32>
    %238 = tpu.matmul %236, %237, %cst_222 {dimension_numbers = #tpu.dot_dimension_numbers<[1], [0], [0], [1], [0, 0, 1, 1], [], []>} : vector<32x32xbf16>, vector<32x2xbf16>, vector<32x2xf32> -> vector<32x2xf32>
    %239 = arith.addf %231, %238 : vector<32x2xf32>
    %c0_223 = arith.constant 0 : index
    %c0_224 = arith.constant 0 : index
    %240 = vector.load %arg11[%c0_223, %c0_224] : memref<32x1xf32, #tpu.memory_space<vmem>>, vector<32x1xf32>
    %241 = vector.broadcast %240 : vector<32x1xf32> to vector<32x2xf32>
    %242 = arith.addf %239, %241 : vector<32x2xf32>
    %cst_225 = arith.constant 0.000000e+00 : f32
    %243 = vector.broadcast %cst_225 : f32 to vector<32x2xf32>
    %244 = arith.maximumf %242, %243 : vector<32x2xf32>
    %245 = arith.truncf %244 : vector<32x2xf32> to vector<32x2xbf16>
    %c0_226 = arith.constant 0 : index
    %c0_227 = arith.constant 0 : index
    %246 = vector.load %arg12[%c0_226, %c0_227] : memref<256x32xbf16, #tpu.memory_space<vmem>>, vector<256x32xbf16>
    %cst_228 = arith.constant dense<0.000000e+00> : vector<256x2xf32>
    %247 = tpu.matmul %246, %245, %cst_228 {dimension_numbers = #tpu.dot_dimension_numbers<[1], [0], [0], [1], [0, 0, 1, 1], [], []>} : vector<256x32xbf16>, vector<32x2xbf16>, vector<256x2xf32> -> vector<256x2xf32>
    %c0_229 = arith.constant 0 : index
    %c0_230 = arith.constant 0 : index
    %248 = vector.load %arg13[%c0_229, %c0_230] : memref<256x1xf32, #tpu.memory_space<vmem>>, vector<256x1xf32>
    %249 = vector.broadcast %248 : vector<256x1xf32> to vector<256x2xf32>
    %250 = arith.addf %247, %249 : vector<256x2xf32>
    %cst_231 = arith.constant dense<0.000000e+00> : vector<2xf32>
    %251 = vector.multi_reduction <add>, %250, %cst_231 [0] : vector<256x2xf32> to vector<2xf32>
    %252 = vector.shape_cast %251 : vector<2xf32> to vector<1x2xf32>
    %cst_232 = arith.constant 2.560000e+02 : f32
    %253 = vector.broadcast %cst_232 : f32 to vector<1x2xf32>
    %254 = arith.divf %252, %253 : vector<1x2xf32>
    %255 = vector.broadcast %254 : vector<1x2xf32> to vector<256x2xf32>
    %256 = arith.subf %250, %255 : vector<256x2xf32>
    %257 = arith.mulf %256, %256 : vector<256x2xf32>
    %cst_233 = arith.constant dense<0.000000e+00> : vector<2xf32>
    %258 = vector.multi_reduction <add>, %257, %cst_233 [0] : vector<256x2xf32> to vector<2xf32>
    %259 = vector.shape_cast %258 : vector<2xf32> to vector<1x2xf32>
    %cst_234 = arith.constant 2.560000e+02 : f32
    %260 = vector.broadcast %cst_234 : f32 to vector<1x2xf32>
    %261 = arith.divf %259, %260 : vector<1x2xf32>
    %262 = vector.broadcast %254 : vector<1x2xf32> to vector<256x2xf32>
    %263 = arith.subf %250, %262 : vector<256x2xf32>
    %cst_235 = arith.constant 9.99999974E-6 : f32
    %264 = vector.broadcast %cst_235 : f32 to vector<1x2xf32>
    %265 = arith.addf %261, %264 : vector<1x2xf32>
    %266 = math.rsqrt %265 : vector<1x2xf32>
    %267 = vector.broadcast %266 : vector<1x2xf32> to vector<256x2xf32>
    %268 = arith.mulf %263, %267 : vector<256x2xf32>
    %c0_236 = arith.constant 0 : index
    %c0_237 = arith.constant 0 : index
    %269 = vector.load %arg14[%c0_236, %c0_237] : memref<256x1xf32, #tpu.memory_space<vmem>>, vector<256x1xf32>
    %270 = vector.broadcast %269 : vector<256x1xf32> to vector<256x2xf32>
    %271 = arith.mulf %268, %270 : vector<256x2xf32>
    %c0_238 = arith.constant 0 : index
    %c0_239 = arith.constant 0 : index
    %272 = vector.load %arg15[%c0_238, %c0_239] : memref<256x1xf32, #tpu.memory_space<vmem>>, vector<256x1xf32>
    %273 = vector.broadcast %272 : vector<256x1xf32> to vector<256x2xf32>
    %274 = arith.addf %271, %273 : vector<256x2xf32>
    %c0_240 = arith.constant 0 : index
    %c0_241 = arith.constant 0 : index
    %275 = vector.load %arg16[%c0_240, %c0_241] : memref<256x2xf32, #tpu.memory_space<vmem>>, vector<256x2xf32>
    tpu.vector_store %arg16[%c0_240, %c0_241], %274 {strides = array<i32>} : memref<256x2xf32, #tpu.memory_space<vmem>>, vector<256x2xf32>,
    return
  }
}

</mosaic_0001>

<bundles_post_ra>
// kernel: _lambda_.1
= control target key start
LH: loop header
LB: loop body
LE: loop exit
PB: predicated region body
PF: predicated region fallthrough
CT: control target
= control target key end

     0   :  { %v7676_v0 = vmov 0   ;;  %vm128_vm0 = vcmask 588800   ;;  %vm135_vm1 = vcmask 1043456   ;;  %vm253_vm2 = vcmask 1040384   ;;  %s9714_s2 = inlined_call_operand.vmem [shape: f32[32,1], index: 2, kind: input, shape index: {}]   ;;  %s9715_s0 = inlined_call_operand.vmem [shape: bf16[72,98], index: 0, kind: input, shape index: {}]   ;;  %s9716_s5 = inlined_call_operand.vmem [shape: f32[32,1], index: 5, kind: input, shape index: {}]   ;;  %s9717_s1 = inlined_call_operand.vmem [shape: bf16[32,72], index: 1, kind: input, shape index: {}]   ;;  %s9718_s8 = inlined_call_operand.vmem [shape: f32[32,1], index: 8, kind: input, shape index: {}]   ;;  %s9719_s11 = inlined_call_operand.vmem [shape: f32[32,1], index: 11, kind: input, shape index: {}]   ;;  %s9720_s13 = inlined_call_operand.vmem [shape: f32[256,1], index: 13, kind: input, shape index: {}]   ;;  %s9721_s3 = inlined_call_operand.vmem [shape: bf16[9,98,50], index: 3, kind: input, shape index: {}]   ;;  %s9722_s14 = inlined_call_operand.vmem [shape: f32[256,1], index: 14, kind: input, shape index: {}]   ;;  %s9723_s15 = inlined_call_operand.vmem [shape: f32[256,1], index: 15, kind: input, shape index: {}]   ;;  %s9724_s4 = inlined_call_operand.vmem [shape: bf16[9,32,32], index: 4, kind: input, shape index: {}]   ;;  %s9725_s6 = inlined_call_operand.vmem [shape: bf16[9,50,18], index: 6, kind: input, shape index: {}]   ;;  %s9726_s7 = inlined_call_operand.vmem [shape: bf16[9,32,32], index: 7, kind: input, shape index: {}]   ;;  %s9727_s9 = inlined_call_operand.vmem [shape: bf16[9,18,2], index: 9, kind: input, shape index: {}]   ;;  %s9728_s10 = inlined_call_operand.vmem [shape: bf16[9,32,32], index: 10, kind: input, shape index: {}]   ;;  %s9729_s12 = inlined_call_operand.vmem [shape: bf16[256,32], index: 12, kind: input, shape index: {}]   ;;  %s9730_s16 = inlined_call_operand.vmem [shape: f32[256,2], index: 16, kind: output, shape index: {}]  }
   0x1   :  { %9732 = sst [smem:[#allocation40_spill]] %s9714_s2  ;;  %7479 = vset.pattern.permute.xlu1 %v7676_v0  ;;  %7478 = vset.pattern.permute.xlu0 %v7676_v0  ;;  %v7480_v3 = vld [vmem:[%s9715_s0] sm:$0xff]   ;;  %v7481_v6 = vld [vmem:[%s9715_s0 + $0x8] sm:$0xff]   ;;  %v7482_v9 = vld [vmem:[%s9715_s0 + $0x10] sm:$0xff]   ;;  %vm246_vm3 = vcmask 801792   ;;  %vm434_vm4 = vcmask 261120  }
   0x2   :  { %s9733_s23 = sld [smem:[#allocation40_spill]]  ;;  %6741 = vmatprep.subr.bf16.mxu0 %v7480_v3  ;;  %v1823_v7 = vld [vmem:[%s9716_s5 + $0x8] sm:$0xff]  ;;  %v1822_v8 = vld [vmem:[%s9716_s5] sm:$0xff]  ;;  %v1825_v10 = vld [vmem:[%s9716_s5 + $0x18] sm:$0xff]  ;;  %vm1884_vm5 = vcmask 408576   ;;  %vm3312_vm6 = vcmask 146432  }
   0x3   :  { %6742 = vmatpush3.bf16.msra.mxu0 %v7480_v3  ;;  %v7485_v11 = vld [vmem:[%s9717_s1] sm:$0xff]   ;;  %v1824_v12 = vld [vmem:[%s9716_s5 + $0x10] sm:$0xff]  ;;  %v7483_v13 = vld [vmem:[%s9715_s0 + $0x18] sm:$0xff]   ;;  %vm5113_vm7 = vcmask 15360  }
   0x4   :  { %6743 = vmatprep.subr.bf16.mxu0 %v7481_v6  ;;  %6751 = vmatprep.mubr.msk.bf16.mxu0 %vm128_vm0, %v7485_v11  ;;  %v7484_v14 = vld [vmem:[%s9715_s0 + $0x20] ss:$0 sps:$4 sm:$0xff]   ;;  %v3267_v15 = vld [vmem:[%s9718_s8 + $0x8] sm:$0xff]  ;;  %v3269_v18 = vld [vmem:[%s9718_s8 + $0x18] sm:$0xff] }
   0x5   :  { %v3266_v16 = vld [vmem:[%s9718_s8] sm:$0xff]  ;;  %v137_v17 = vsel %vm135_vm1, %v7484_v14, 0  ;;  %v3268_v19 = vld [vmem:[%s9718_s8 + $0x10] sm:$0xff]  ;;  %v7486_v20 = vld [vmem:[%s9717_s1 + $0x8] sm:$0xff]  }
   0x6   :  { %v4567_v21 = vld [vmem:[%s9719_s11 + $0x8] sm:$0xff]  ;;  %v4566_v22 = vld [vmem:[%s9719_s11] sm:$0xff]  ;;  %v4569_v23 = vld [vmem:[%s9719_s11 + $0x18] sm:$0xff] }
   0x7   :  { %6744 = vmatpush3.bf16.msra.mxu0 %v7481_v6  ;;  %v4568_v24 = vld [vmem:[%s9719_s11 + $0x10] sm:$0xff]  ;;  %v4633_v25 = vld [vmem:[%s9720_s13 + $0x8] sm:$0xff]  ;;  %v4632_v26 = vld [vmem:[%s9720_s13] sm:$0xff] }
   0x8   :  { %v69_v1 = vld [vmem:[%s9733_s23 + $0x10] sm:$0xff]  ;;  %v67_v2 = vld [vmem:[%s9733_s23] sm:$0xff]  ;;  %v70_v4 = vld [vmem:[%s9733_s23 + $0x18] sm:$0xff]  ;;  %6745 = vmatprep.subr.bf16.mxu0 %v7482_v9 }
   0x9   :  { %83 = vperm.xlu1 %7479, %v69_v1   ;;  %73 = vperm.xlu0 %7478, %v67_v2   ;;  %v68_v5 = vld [vmem:[%s9733_s23 + $0x8] sm:$0xff]  ;;  %v4635_v27 = vld [vmem:[%s9720_s13 + $0x18] sm:$0xff]  ;;  %v4634_v28 = vld [vmem:[%s9720_s13 + $0x10] sm:$0xff] }
   0xa   :  { %v4637_v29 = vld [vmem:[%s9720_s13 + $0x28] sm:$0xff]  ;;  %v4636_v30 = vld [vmem:[%s9720_s13 + $0x20] sm:$0xff]  ;;  %v4639_v31 = vld [vmem:[%s9720_s13 + $0x38] sm:$0xff] }
   0xb   :  { %6746 = vmatpush3.bf16.msra.mxu0 %v7482_v9  ;;  %v4638_v32 = vld [vmem:[%s9720_s13 + $0x30] sm:$0xff]  ;;  %v4641_v33 = vld [vmem:[%s9720_s13 + $0x48] sm:$0xff]  ;;  %v4640_v34 = vld [vmem:[%s9720_s13 + $0x40] sm:$0xff] }
   0xc   :  { %6747 = vmatprep.subr.bf16.mxu0 %v7483_v13  ;;  %v4643_v35 = vld [vmem:[%s9720_s13 + $0x58] sm:$0xff]  ;;  %v4642_v36 = vld [vmem:[%s9720_s13 + $0x50] sm:$0xff]  ;;  %v4645_v37 = vld [vmem:[%s9720_s13 + $0x68] sm:$0xff] }
   0xd   :  { %88 = vperm.xlu1 %7479, %v70_v4   ;;  %78 = vperm.xlu0 %7478, %v68_v5   ;;  %v4644_v38 = vld [vmem:[%s9720_s13 + $0x60] sm:$0xff]  ;;  %v4647_v39 = vld [vmem:[%s9720_s13 + $0x78] sm:$0xff]  ;;  %v4646_v40 = vld [vmem:[%s9720_s13 + $0x70] sm:$0xff] }
   0xe   :  { %v4649_v41 = vld [vmem:[%s9720_s13 + $0x88] sm:$0xff]  ;;  %v4648_v42 = vld [vmem:[%s9720_s13 + $0x80] sm:$0xff]  ;;  %v4651_v43 = vld [vmem:[%s9720_s13 + $0x98] sm:$0xff] }
   0xf   :  { %6748 = vmatpush3.bf16.msra.mxu0 %v7483_v13  ;;  %v4650_v44 = vld [vmem:[%s9720_s13 + $0x90] sm:$0xff]  ;;  %v4653_v45 = vld [vmem:[%s9720_s13 + $0xa8] sm:$0xff]  ;;  %v4652_v46 = vld [vmem:[%s9720_s13 + $0xa0] sm:$0xff] }
  0x10   :  { %7449 = vmatprep.subr.msk.bf16.mxu0 %vm135_vm1, %v7484_v14  ;;  %v4655_v47 = vld [vmem:[%s9720_s13 + $0xb8] sm:$0xff]  ;;  %v4654_v48 = vld [vmem:[%s9720_s13 + $0xb0] sm:$0xff]  ;;  %v4657_v49 = vld [vmem:[%s9720_s13 + $0xc8] sm:$0xff] }
  0x11   :  { %1833 = vperm.xlu1 %7479, %v1823_v7   ;;  %1828 = vperm.xlu0 %7478, %v1822_v8   ;;  %v4656_v50 = vld [vmem:[%s9720_s13 + $0xc0] sm:$0xff]  ;;  %v4659_v51 = vld [vmem:[%s9720_s13 + $0xd8] sm:$0xff]  ;;  %v4658_v52 = vld [vmem:[%s9720_s13 + $0xd0] sm:$0xff] }
  0x12   :  { %v4661_v53 = vld [vmem:[%s9720_s13 + $0xe8] sm:$0xff]  ;;  %v4660_v54 = vld [vmem:[%s9720_s13 + $0xe0] sm:$0xff]  ;;  %v7487_v55 = vld [vmem:[%s9721_s3 + $0x34] sm:$0xff]  }
  0x13   :  { %6750 = vmatpush3.bf16.msra.mxu0 %v137_v17  ;;  %v7488_v56 = vld [vmem:[%s9721_s3] sm:$0xff]   ;;  %v4663_v57 = vld [vmem:[%s9720_s13 + $0xf8] sm:$0xff]  ;;  %v4662_v58 = vld [vmem:[%s9720_s13 + $0xf0] sm:$0xff] }
  0x14   :  { %6773 = vmatprep.subr.bf16.mxu0 %v7487_v55  ;;  %6755 = vmatprep.subr.bf16.mxu1 %v7488_v56  ;;  %v7489_v59 = vld [vmem:[%s9721_s3 + $0x3c] sm:$0xff]   ;;  %v7490_v60 = vld [vmem:[%s9721_s3 + $0x8] sm:$0xff]   ;;  %v7492_v0 = vld [vmem:[%s9721_s3 + $0x10] sm:$0xff]  }
  0x15   :  { %1843 = vperm.xlu1 %7479, %v1825_v10   ;;  %1838 = vperm.xlu0 %7478, %v1824_v12   ;;  %v5354_v61 = vld [vmem:[%s9722_s14 + $0x8] sm:$0xff]  ;;  %v5353_v62 = vld [vmem:[%s9722_s14] sm:$0xff]  ;;  %v5356_v1 = vld [vmem:[%s9722_s14 + $0x18] sm:$0xff] }
  0x16   :  { %6752 = vmatmul.mubr.msk.bf16.vlgmr.msra.gmra.mrb[0].mxu0 %vm128_vm0, %v7486_v20  ;;  %6756 = vmatpush3.bf16.msra.mxu1 %v7488_v56  ;;  %v7491_v63 = vld [vmem:[%s9721_s3 + $0x44] sm:$0xff]   ;;  %v5355_v2 = vld [vmem:[%s9722_s14 + $0x10] sm:$0xff]  ;;  %v7494_v4 = vld [vmem:[%s9721_s3 + $0x18] sm:$0xff]  }
  0x17   :  { %6774 = vmatpush3.bf16.msra.mxu0 %v7487_v55  ;;  %6757 = vmatprep.subr.bf16.mxu1 %v7490_v60  ;;  %v7493_v3 = vld [vmem:[%s9721_s3 + $0x4c] sm:$0xff]   ;;  %v5357_v6 = vld [vmem:[%s9722_s14 + $0x20] sm:$0xff]  ;;  %v7495_v7 = vld [vmem:[%s9721_s3 + $0x54] sm:$0xff]  }
  0x18   :  { %6775 = vmatprep.subr.bf16.mxu0 %v7489_v59  ;;  %v5358_v5 = vld [vmem:[%s9722_s14 + $0x28] sm:$0xff]  ;;  %v7496_v8 = vld [vmem:[%s9721_s3 + $0x20] sm:$0xff]   ;;  %v5360_v9 = vld [vmem:[%s9722_s14 + $0x38] sm:$0xff] }
  0x19   :  { %3277 = vperm.xlu1 %7479, %v3267_v15   ;;  %3272 = vperm.xlu0 %7478, %v3266_v16   ;;  %v5359_v10 = vld [vmem:[%s9722_s14 + $0x30] sm:$0xff]  ;;  %v7497_v11 = vld [vmem:[%s9721_s3 + $0x5c] sm:$0xff]   ;;  %v5362_v12 = vld [vmem:[%s9722_s14 + $0x48] sm:$0xff] }
  0x1a   :  { %6758 = vmatpush3.bf16.msra.mxu1 %v7490_v60  ;;  %v5361_v13 = vld [vmem:[%s9722_s14 + $0x40] sm:$0xff]  ;;  %v7498_v14 = vld [vmem:[%s9721_s3 + $0x28] sm:$0xff]   ;;  %v7500_v16 = vld [vmem:[%s9721_s3 + $0x30] ss:$0 sps:$4 sm:$0x11]  }
  0x1b   :  { %6776 = vmatpush3.bf16.msra.mxu0 %v7489_v59  ;;  %6759 = vmatprep.subr.bf16.mxu1 %v7492_v0  ;;  %v7499_v15 = vld [vmem:[%s9721_s3 + $0x64] ss:$0 sps:$4 sm:$0x11]   ;;  %v5364_v17 = vld [vmem:[%s9722_s14 + $0x58] sm:$0xff]  ;;  %v255_v20 = vsel %vm253_vm2, %v7500_v16, 0  ;;  %v5591_v59 = vld [vmem:[%s9723_s15 + $0x70] sm:$0xff] }
  0x1c   :  { %6777 = vmatprep.subr.bf16.mxu0 %v7491_v63  ;;  %v5589_v55 = vld [vmem:[%s9723_s15 + $0x60] sm:$0xff]  ;;  %v5594_v60 = vld [vmem:[%s9723_s15 + $0x88] sm:$0xff] }
  0x1d   :  { %3287 = vperm.xlu1 %7479, %v3269_v18   ;;  %3282 = vperm.xlu0 %7478, %v3268_v19   ;;  %v366_v18 = vsel %vm253_vm2, %v7499_v15, 0  ;;  %v5363_v19 = vld [vmem:[%s9722_s14 + $0x50] sm:$0xff] }
  0x1e   :  { %6760 = vmatpush3.bf16.msra.mxu1 %v7492_v0  ;;  %v5596_v0 = vld [vmem:[%s9723_s15 + $0x98] sm:$0xff] }
  0x1f   :  { %6778 = vmatpush3.bf16.msra.mxu0 %v7491_v63  ;;  %6761 = vmatprep.subr.bf16.mxu1 %v7494_v4 }
  0x20   :  { %6779 = vmatprep.subr.bf16.mxu0 %v7493_v3 }
  0x21   :  { %4577 = vperm.xlu1 %7479, %v4567_v21   ;;  %4572 = vperm.xlu0 %7478, %v4566_v22   ;;  %v8014_v21 = vld [vmem:[%s9721_s3 + $0x9c] sm:$0xff]   ;;  %v5366_v22 = vld [vmem:[%s9722_s14 + $0x68] sm:$0xff] }
  0x22   :  { %6762 = vmatpush3.bf16.msra.mxu1 %v7494_v4  ;;  %v5598_v4 = vld [vmem:[%s9723_s15 + $0xa8] sm:$0xff] }
  0x23   :  { %6780 = vmatpush3.bf16.msra.mxu0 %v7493_v3  ;;  %6763 = vmatprep.subr.bf16.mxu1 %v7496_v8 }
  0x24   :  { %6781 = vmatprep.subr.bf16.mxu0 %v7495_v7 }
  0x25   :  { %4587 = vperm.xlu1 %7479, %v4569_v23   ;;  %4582 = vperm.xlu0 %7478, %v4568_v24   ;;  %v5365_v23 = vld [vmem:[%s9722_s14 + $0x60] sm:$0xff]  ;;  %v5368_v24 = vld [vmem:[%s9722_s14 + $0x78] sm:$0xff] }
  0x26   :  { %6764 = vmatpush3.bf16.msra.mxu1 %v7496_v8 }
  0x27   :  { %6782 = vmatpush3.bf16.msra.mxu0 %v7495_v7  ;;  %6765 = vmatprep.subr.bf16.mxu1 %v7498_v14  ;;  %v5599_v7 = vld [vmem:[%s9723_s15 + $0xb0] sm:$0xff] }
  0x28   :  { %6783 = vmatprep.subr.bf16.mxu0 %v7497_v11 }
  0x29   :  { %4671 = vperm.xlu1 %7479, %v4633_v25   ;;  %4666 = vperm.xlu0 %7478, %v4632_v26   ;;  %v5367_v25 = vld [vmem:[%s9722_s14 + $0x70] sm:$0xff]  ;;  %v5370_v26 = vld [vmem:[%s9722_s14 + $0x88] sm:$0xff] }
  0x2a   :  { %6766 = vmatpush3.bf16.msra.mxu1 %v7498_v14  ;;  %v5604_v14 = vld [vmem:[%s9723_s15 + $0xd8] sm:$0xff] }
  0x2b   :  { %6784 = vmatpush3.bf16.msra.mxu0 %v7497_v11  ;;  %7450 = vmatprep.subr.msk.bf16.mxu1 %vm253_vm2, %v7500_v16  ;;  %v5601_v11 = vld [vmem:[%s9723_s15 + $0xc0] sm:$0xff]  ;;  %v5606_v16 = vld [vmem:[%s9723_s15 + $0xe8] sm:$0xff] }
  0x2c   :  { %7451 = vmatprep.subr.msk.bf16.mxu0 %vm253_vm2, %v7499_v15  ;;  %v5603_v15 = vld [vmem:[%s9723_s15 + $0xd0] sm:$0xff] }
  0x2d   :  { %4681 = vperm.xlu1 %7479, %v4635_v27   ;;  %4676 = vperm.xlu0 %7478, %v4634_v28   ;;  %v5369_v27 = vld [vmem:[%s9722_s14 + $0x80] sm:$0xff]  ;;  %v5372_v28 = vld [vmem:[%s9722_s14 + $0x98] sm:$0xff] }
  0x2e   :  { %6768 = vmatpush3.bf16.msra.mxu1 %v255_v20  ;;  %v5608_v20 = vld [vmem:[%s9723_s15 + $0xf8] sm:$0xff] }
  0x2f   :  { %6786 = vmatpush3.bf16.msra.mxu0 %v366_v18 }
  0x30   :  { %6833 = vmatprep.subr.bf16.mxu0 %v8014_v21 }
  0x31   :  { %4691 = vperm.xlu1 %7479, %v4637_v29   ;;  %4686 = vperm.xlu0 %7478, %v4636_v30   ;;  %v5371_v29 = vld [vmem:[%s9722_s14 + $0x90] sm:$0xff]  ;;  %v5374_v30 = vld [vmem:[%s9722_s14 + $0xa8] sm:$0xff] }
  0x35   :  { %4701 = vperm.xlu1 %7479, %v4639_v31   ;;  %4696 = vperm.xlu0 %7478, %v4638_v32   ;;  %v5373_v31 = vld [vmem:[%s9722_s14 + $0xa0] sm:$0xff]  ;;  %v5376_v32 = vld [vmem:[%s9722_s14 + $0xb8] sm:$0xff] }
  0x39   :  { %4711 = vperm.xlu1 %7479, %v4641_v33   ;;  %4706 = vperm.xlu0 %7478, %v4640_v34   ;;  %v5375_v33 = vld [vmem:[%s9722_s14 + $0xb0] sm:$0xff]  ;;  %v5378_v34 = vld [vmem:[%s9722_s14 + $0xc8] sm:$0xff] }
  0x3d   :  { %4721 = vperm.xlu1 %7479, %v4643_v35   ;;  %4716 = vperm.xlu0 %7478, %v4642_v36   ;;  %v5377_v35 = vld [vmem:[%s9722_s14 + $0xc0] sm:$0xff]  ;;  %v5380_v36 = vld [vmem:[%s9722_s14 + $0xd8] sm:$0xff] }
  0x41   :  { %4731 = vperm.xlu1 %7479, %v4645_v37   ;;  %4726 = vperm.xlu0 %7478, %v4644_v38   ;;  %v5379_v37 = vld [vmem:[%s9722_s14 + $0xd0] sm:$0xff]  ;;  %v5382_v38 = vld [vmem:[%s9722_s14 + $0xe8] sm:$0xff] }
  0x45   :  { %4741 = vperm.xlu1 %7479, %v4647_v39   ;;  %4736 = vperm.xlu0 %7478, %v4646_v40   ;;  %v5381_v39 = vld [vmem:[%s9722_s14 + $0xe0] sm:$0xff]  ;;  %v5384_v40 = vld [vmem:[%s9722_s14 + $0xf8] sm:$0xff] }
  0x49   :  { %4751 = vperm.xlu1 %7479, %v4649_v41   ;;  %4746 = vperm.xlu0 %7478, %v4648_v42   ;;  %v5383_v41 = vld [vmem:[%s9722_s14 + $0xf0] sm:$0xff]  ;;  %v5578_v42 = vld [vmem:[%s9723_s15 + $0x8] sm:$0xff] }
  0x4d   :  { %4761 = vperm.xlu1 %7479, %v4651_v43   ;;  %4756 = vperm.xlu0 %7478, %v4650_v44   ;;  %v5577_v43 = vld [vmem:[%s9723_s15] sm:$0xff]  ;;  %v5580_v44 = vld [vmem:[%s9723_s15 + $0x18] sm:$0xff] }
  0x51   :  { %4771 = vperm.xlu1 %7479, %v4653_v45   ;;  %4766 = vperm.xlu0 %7478, %v4652_v46   ;;  %v5579_v45 = vld [vmem:[%s9723_s15 + $0x10] sm:$0xff]  ;;  %v5582_v46 = vld [vmem:[%s9723_s15 + $0x28] sm:$0xff] }
  0x55   :  { %4781 = vperm.xlu1 %7479, %v4655_v47   ;;  %4776 = vperm.xlu0 %7478, %v4654_v48   ;;  %v5581_v47 = vld [vmem:[%s9723_s15 + $0x20] sm:$0xff]  ;;  %v5584_v48 = vld [vmem:[%s9723_s15 + $0x38] sm:$0xff] }
  0x59   :  { %4791 = vperm.xlu1 %7479, %v4657_v49   ;;  %4786 = vperm.xlu0 %7478, %v4656_v50   ;;  %v5583_v49 = vld [vmem:[%s9723_s15 + $0x30] sm:$0xff]  ;;  %v5586_v50 = vld [vmem:[%s9723_s15 + $0x48] sm:$0xff] }
  0x5d   :  { %4801 = vperm.xlu1 %7479, %v4659_v51   ;;  %4796 = vperm.xlu0 %7478, %v4658_v52   ;;  %v5585_v51 = vld [vmem:[%s9723_s15 + $0x40] sm:$0xff]  ;;  %v5588_v52 = vld [vmem:[%s9723_s15 + $0x58] sm:$0xff] }
  0x61   :  { %4811 = vperm.xlu1 %7479, %v4661_v53   ;;  %4806 = vperm.xlu0 %7478, %v4660_v54   ;;  %v5587_v53 = vld [vmem:[%s9723_s15 + $0x50] sm:$0xff]  ;;  %v5590_v54 = vld [vmem:[%s9723_s15 + $0x68] sm:$0xff] }
  0x65   :  { %4821 = vperm.xlu1 %7479, %v4663_v57   ;;  %4816 = vperm.xlu0 %7478, %v4662_v58   ;;  %v5592_v58 = vld [vmem:[%s9723_s15 + $0x78] sm:$0xff] }
  0x69   :  { %5392 = vperm.xlu1 %7479, %v5354_v61   ;;  %5387 = vperm.xlu0 %7478, %v5353_v62   ;;  %v5593_v61 = vld [vmem:[%s9723_s15 + $0x80] sm:$0xff] }
  0x6d   :  { %5402 = vperm.xlu1 %7479, %v5356_v1   ;;  %5397 = vperm.xlu0 %7478, %v5355_v2   ;;  %v5595_v1 = vld [vmem:[%s9723_s15 + $0x90] sm:$0xff] }
  0x71   :  { %5412 = vperm.xlu1 %7479, %v5358_v5   ;;  %5407 = vperm.xlu0 %7478, %v5357_v6   ;;  %v5597_v5 = vld [vmem:[%s9723_s15 + $0xa0] sm:$0xff]  ;;  %v5600_v6 = vld [vmem:[%s9723_s15 + $0xb8] sm:$0xff] }
  0x75   :  { %5422 = vperm.xlu1 %7479, %v5360_v9   ;;  %5417 = vperm.xlu0 %7478, %v5359_v10   ;;  %v5602_v10 = vld [vmem:[%s9723_s15 + $0xc8] sm:$0xff] }
  0x79   :  { %5432 = vperm.xlu1 %7479, %v5362_v12   ;;  %5427 = vperm.xlu0 %7478, %v5361_v13  }
  0x7d   :  { %5442 = vperm.xlu1 %7479, %v5364_v17   ;;  %5437 = vperm.xlu0 %7478, %v5363_v19   ;;  %v5605_v17 = vld [vmem:[%s9723_s15 + $0xe0] sm:$0xff] }
  0x81   :  { %5452 = vperm.xlu1 %7479, %v5366_v22   ;;  %5447 = vperm.xlu0 %7478, %v5365_v23   ;;  %v5607_v22 = vld [vmem:[%s9723_s15 + $0xf0] sm:$0xff] }
  0x85   :  { %5462 = vperm.xlu1 %7479, %v5368_v24   ;;  %5457 = vperm.xlu0 %7478, %v5367_v25  }
  0x88   :  { %v84_v56 = vpop.permute.xlu1 %83  ;;  %v74_v57 = vpop.permute.xlu0 %73 }
  0x89   :  { %5472 = vperm.xlu1 %7479, %v5370_v26   ;;  %5467 = vperm.xlu0 %7478, %v5369_v27  }
  0x8c   :  { %v89_v62 = vpop.permute.xlu1 %88  ;;  %v79_v63 = vpop.permute.xlu0 %78 }
  0x8d   :  { %5482 = vperm.xlu1 %7479, %v5372_v28   ;;  %5477 = vperm.xlu0 %7478, %v5371_v29  }
  0x90   :  { %v8137_v2 = vpop.permute.xlu1 %1833  ;;  %v8139_v3 = vpop.permute.xlu0 %1828 }
  0x91   :  { %5492 = vperm.xlu1 %7479, %v5374_v30   ;;  %5487 = vperm.xlu0 %7478, %v5373_v31  }
  0x94   :  { %v8153_v8 = vpop.permute.xlu1 %1843  ;;  %v8155_v9 = vpop.permute.xlu0 %1838 }
  0x95   :  { %5502 = vperm.xlu1 %7479, %v5376_v32   ;;  %5497 = vperm.xlu0 %7478, %v5375_v33  }
  0x98   :  { %v8163_v12 = vpop.permute.xlu1 %3277  ;;  %v8165_v13 = vpop.permute.xlu0 %3272 }
  0x99   :  { %5512 = vperm.xlu1 %7479, %v5378_v34   ;;  %5507 = vperm.xlu0 %7478, %v5377_v35  }
  0x9c   :  { %v8179_v18 = vpop.permute.xlu1 %3287  ;;  %v8181_v19 = vpop.permute.xlu0 %3282 }
  0x9d   :  { %5522 = vperm.xlu1 %7479, %v5380_v36   ;;  %5517 = vperm.xlu0 %7478, %v5379_v37  }
  0xa0   :  { %v8189_v23 = vpop.permute.xlu1 %4577  ;;  %v8191_v24 = vpop.permute.xlu0 %4572 }
  0xa1   :  { %5532 = vperm.xlu1 %7479, %v5382_v38   ;;  %5527 = vperm.xlu0 %7478, %v5381_v39   ;;  %v7502_v39 = vld [vmem:[%s9721_s3 + $0xa4] sm:$0xff]  }
  0xa5   :  { %5542 = vperm.xlu1 %7479, %v5384_v40   ;;  %5537 = vperm.xlu0 %7478, %v5383_v41   ;;  %v7503_v40 = vld [vmem:[%s9721_s3 + $0xac] sm:$0xff]   ;;  %v7504_v41 = vld [vmem:[%s9721_s3 + $0xb4] sm:$0xff]  }
  0xa9   :  { %5616 = vperm.xlu1 %7479, %v5578_v42   ;;  %5611 = vperm.xlu0 %7478, %v5577_v43   ;;  %v7506_v42 = vld [vmem:[%s9721_s3 + $0xc4] sm:$0xff]   ;;  %v7507_v43 = vld [vmem:[%s9721_s3 + $0xcc] ss:$0 sps:$4 sm:$0x11]  }
  0xad   :  { %5626 = vperm.xlu1 %7479, %v5580_v44   ;;  %5621 = vperm.xlu0 %7478, %v5579_v45   ;;  %v790_v44 = vsel %vm253_vm2, %v7507_v43, 0  ;;  %v7508_v45 = vld [vmem:[%s9721_s3 + $0xd0] sm:$0xff]  }
  0xb1   :  { %5636 = vperm.xlu1 %7479, %v5582_v46   ;;  %5631 = vperm.xlu0 %7478, %v5581_v47   ;;  %v7509_v46 = vld [vmem:[%s9721_s3 + $0xd8] sm:$0xff]   ;;  %v7510_v47 = vld [vmem:[%s9721_s3 + $0xe0] sm:$0xff]  }
  0xb5   :  { %5646 = vperm.xlu1 %7479, %v5584_v48   ;;  %5641 = vperm.xlu0 %7478, %v5583_v49   ;;  %v7511_v48 = vld [vmem:[%s9721_s3 + $0xe8] sm:$0xff]   ;;  %v7512_v49 = vld [vmem:[%s9721_s3 + $0xf0] sm:$0xff]  }
  0xb9   :  { %5656 = vperm.xlu1 %7479, %v5586_v50   ;;  %5651 = vperm.xlu0 %7478, %v5585_v51   ;;  %v7513_v50 = vld [vmem:[%s9721_s3 + $0xf8] sm:$0xff]   ;;  %v7514_v51 = vld [vmem:[%s9721_s3 + $0x100] ss:$0 sps:$4 sm:$0x11]  }
  0xbd   :  { %5666 = vperm.xlu1 %7479, %v5588_v52   ;;  %5661 = vperm.xlu0 %7478, %v5587_v53   ;;  %v971_v52 = vsel %vm253_vm2, %v7514_v51, 0  ;;  %v7515_v53 = vld [vmem:[%s9721_s3 + $0x138] sm:$0xff]  }
  0xc1   :  { %5676 = vperm.xlu1 %7479, %v5590_v54   ;;  %5671 = vperm.xlu0 %7478, %v5589_v55   ;;  %v7516_v54 = vld [vmem:[%s9721_s3 + $0x140] sm:$0xff]   ;;  %v7517_v55 = vld [vmem:[%s9721_s3 + $0x148] sm:$0xff]  }
  0xc5   :  { %5686 = vperm.xlu1 %7479, %v5592_v58   ;;  %5681 = vperm.xlu0 %7478, %v5591_v59   ;;  %v7520_v58 = vld [vmem:[%s9721_s3 + $0x160] sm:$0xff]   ;;  %v7521_v59 = vld [vmem:[%s9721_s3 + $0x168] ss:$0 sps:$4 sm:$0x11]  }
  0xc9   :  { %5696 = vperm.xlu1 %7479, %v5594_v60   ;;  %5691 = vperm.xlu0 %7478, %v5593_v61   ;;  %v1333_v60 = vsel %vm253_vm2, %v7521_v59, 0  ;;  %v7522_v61 = vld [vmem:[%s9721_s3 + $0x16c] sm:$0xff]  }
  0xcd   :  { %5706 = vperm.xlu1 %7479, %v5596_v0   ;;  %5701 = vperm.xlu0 %7478, %v5595_v1   ;;  %v7525_v0 = vld [vmem:[%s9721_s3 + $0x184] sm:$0xff]   ;;  %v7526_v1 = vld [vmem:[%s9721_s3 + $0x18c] sm:$0xff]  }
  0xd1   :  { %5716 = vperm.xlu1 %7479, %v5598_v4   ;;  %5711 = vperm.xlu0 %7478, %v5597_v5   ;;  %v7529_v4 = vld [vmem:[%s9724_s4 + $0x10] sm:$0xff]  }
  0xd2   :  { %v7527_v5 = vld [vmem:[%s9721_s3 + $0x194] sm:$0xff]  }
  0xd5   :  { %5726 = vperm.xlu1 %7479, %v5600_v6   ;;  %5721 = vperm.xlu0 %7478, %v5599_v7   ;;  %v7528_v6 = vld [vmem:[%s9721_s3 + $0x19c] ss:$0 sps:$4 sm:$0x11]  }
  0xd6   :  { %v1514_v7 = vsel %vm253_vm2, %v7528_v6, 0 }
  0xd9   :  { %5736 = vperm.xlu1 %7479, %v5602_v10   ;;  %5731 = vperm.xlu0 %7478, %v5601_v11  }
  0xdd   :  { %5746 = vperm.xlu1 %7479, %v5604_v14   ;;  %5741 = vperm.xlu0 %7478, %v5603_v15  }
  0xe1   :  { %5756 = vperm.xlu1 %7479, %v5606_v16   ;;  %5751 = vperm.xlu0 %7478, %v5605_v17  }
  0xe5   :  { %5766 = vperm.xlu1 %7479, %v5608_v20   ;;  %5761 = vperm.xlu0 %7478, %v5607_v22  }
  0xe9   :  { %v6753_v25 = vpop.f32.mrb[0].mxu0 }
  0xea   :  { %v173_v26 = vpop.f32.mrb[1].mxu0  ;;  %v182_v27 = vadd.f32 %v6753_v25, %v84_v56  ;;  %v7518_v56 = vld [vmem:[%s9721_s3 + $0x150] sm:$0xff]  }
  0xeb   :  { %v174_v28 = vadd.f32 %v173_v26, %v74_v57  ;;  %v6754_v29 = vpop.f32.mrb[2].mxu0  ;;  %v7519_v57 = vld [vmem:[%s9721_s3 + $0x158] sm:$0xff]  }
  0xec   :  { %v185_v30 = vadd.f32 %v6754_v29, %v89_v62  ;;  %v176_v31 = vpop.f32.mrb[3].mxu0  ;;  %v190_v33 = vmax.f32 %v182_v27, 0.0  ;;  %v7523_v62 = vld [vmem:[%s9721_s3 + $0x174] sm:$0xff]  }
  0xed   :  { %v177_v32 = vadd.f32 %v176_v31, %v79_v63  ;;  %v188_v35 = vmax.f32 %v174_v28, 0.0  ;;  %v7524_v63 = vld [vmem:[%s9721_s3 + $0x17c] sm:$0xff]   ;;  %v7532_v31 = vld [vmem:[%s9721_s3 + $0x68] sm:$0xff]  }
  0xee   :  { %v191_v34 = vmax.f32 %v185_v30, 0.0  ;;  %v7530_v29 = vld [vmem:[%s9724_s4 + $0x18] sm:$0xff]   ;;  %v7531_v30 = vld [vmem:[%s9724_s4] sm:$0xff]  }
  0xef   :  { %v189_v36 = vmax.f32 %v177_v32, 0.0  ;;  %v7533_v32 = vld [vmem:[%s9724_s4 + $0x8] sm:$0xff]  }
  0xf0   :  { %v8193_v37 = vpack.c.bf16 %v191_v34, %v190_v33  ;;  %v7534_v33 = vld [vmem:[%s9721_s3 + $0x70] sm:$0xff]  }
  0xf1   :  { %v8195_v38 = vpack.c.bf16 %v189_v36, %v188_v35  ;;  %v7535_v35 = vld [vmem:[%s9721_s3 + $0x78] sm:$0xff]  }
  0xf3   :  { %6769 = vmatprep.mubr.msk.bf16.mxu1 %vm246_vm3, %v8195_v38  ;;  %6787 = vmatprep.mubr.msk.bf16.mxu0 %vm246_vm3, %v8195_v38 }
  0xf4   :  { %6770 = vmatmul.mubr.msk.bf16.vlgmr.msra.gmra.mrb[0].mxu1 %vm246_vm3, %v8193_v37  ;;  %6788 = vmatmul.mubr.msk.bf16.vlgmr.msra.gmra.mrb[4].mxu0 %vm246_vm3, %v8193_v37 }
  0xf5   :  { %6834 = vmatpush3.bf16.msra.mxu0 %v8014_v21  ;;  %6847 = vmatprep.mubr.msk.bf16.mxu0 %vm246_vm3, %v8195_v38  ;;  %v7505_v21 = vld [vmem:[%s9721_s3 + $0xbc] sm:$0xff]  }
  0xf6   :  { %6835 = vmatprep.subr.bf16.mxu0 %v7502_v39  ;;  %6795 = vmatprep.mubr.msk.bf16.mxu1 %vm434_vm4, %v7529_v4 }
  0xf9   :  { %6836 = vmatpush3.bf16.msra.mxu0 %v7502_v39 }
  0xfa   :  { %6837 = vmatprep.subr.bf16.mxu0 %v7503_v40 }
  0xfd   :  { %6838 = vmatpush3.bf16.msra.mxu0 %v7503_v40 }
  0xfe   :  { %6839 = vmatprep.subr.bf16.mxu0 %v7504_v41 }
 0x101   :  { %6840 = vmatpush3.bf16.msra.mxu0 %v7504_v41 }
 0x102   :  { %6841 = vmatprep.subr.bf16.mxu0 %v7505_v21 }
 0x105   :  { %6842 = vmatpush3.bf16.msra.mxu0 %v7505_v21 }
 0x106   :  { %6843 = vmatprep.subr.bf16.mxu0 %v7506_v42 }
 0x109   :  { %6844 = vmatpush3.bf16.msra.mxu0 %v7506_v42  ;;  %v7536_v42 = vld [vmem:[%s9721_s3 + $0x80] sm:$0xff]  }
 0x10a   :  { %7453 = vmatprep.subr.msk.bf16.mxu0 %vm253_vm2, %v7507_v43  ;;  %v7537_v43 = vld [vmem:[%s9721_s3 + $0x88] sm:$0xff]  }
 0x10d   :  { %6846 = vmatpush3.bf16.msra.mxu0 %v790_v44  ;;  %v7538_v44 = vld [vmem:[%s9721_s3 + $0x90] sm:$0xff]  }
 0x10e   :  { %6859 = vmatprep.subr.bf16.mxu0 %v7508_v45 }
 0x110   :  { %6848 = vmatmul.mubr.msk.bf16.vlgmr.msra.gmra.mrb[8].mxu0 %vm246_vm3, %v8193_v37 }
 0x111   :  { %6860 = vmatpush3.bf16.msra.mxu0 %v7508_v45  ;;  %6873 = vmatprep.mubr.msk.bf16.mxu0 %vm246_vm3, %v8195_v38  ;;  %v7539_v45 = vld [vmem:[%s9721_s3 + $0x98] ss:$0 sps:$4 sm:$0x11]  }
 0x112   :  { %6861 = vmatprep.subr.bf16.mxu0 %v7509_v46 }
 0x115   :  { %6862 = vmatpush3.bf16.msra.mxu0 %v7509_v46  ;;  %v609_v46 = vsel %vm253_vm2, %v7539_v45, 0 }
 0x116   :  { %6863 = vmatprep.subr.bf16.mxu0 %v7510_v47 }
 0x119   :  { %6864 = vmatpush3.bf16.msra.mxu0 %v7510_v47 }
 0x11a   :  { %6865 = vmatprep.subr.bf16.mxu0 %v7511_v48 }
 0x11d   :  { %6866 = vmatpush3.bf16.msra.mxu0 %v7511_v48 }
 0x11e   :  { %6867 = vmatprep.subr.bf16.mxu0 %v7512_v49 }
 0x121   :  { %6868 = vmatpush3.bf16.msra.mxu0 %v7512_v49 }
 0x122   :  { %6869 = vmatprep.subr.bf16.mxu0 %v7513_v50 }
 0x125   :  { %6870 = vmatpush3.bf16.msra.mxu0 %v7513_v50 }
 0x126   :  { %7454 = vmatprep.subr.msk.bf16.mxu0 %vm253_vm2, %v7514_v51 }
 0x129   :  { %6872 = vmatpush3.bf16.msra.mxu0 %v971_v52 }
 0x12a   :  { %6911 = vmatprep.subr.bf16.mxu0 %v7515_v53 }
 0x12c   :  { %6874 = vmatmul.mubr.msk.bf16.vlgmr.msra.gmra.mrb[12].mxu0 %vm246_vm3, %v8193_v37 }
 0x12d   :  { %6912 = vmatpush3.bf16.msra.mxu0 %v7515_v53  ;;  %6925 = vmatprep.mubr.msk.bf16.mxu0 %vm246_vm3, %v8195_v38 }
 0x12e   :  { %6913 = vmatprep.subr.bf16.mxu0 %v7516_v54 }
 0x131   :  { %6914 = vmatpush3.bf16.msra.mxu0 %v7516_v54 }
 0x132   :  { %6915 = vmatprep.subr.bf16.mxu0 %v7517_v55 }
 0x135   :  { %6916 = vmatpush3.bf16.msra.mxu0 %v7517_v55 }
 0x136   :  { %6917 = vmatprep.subr.bf16.mxu0 %v7518_v56 }
 0x139   :  { %6918 = vmatpush3.bf16.msra.mxu0 %v7518_v56 }
 0x13a   :  { %6919 = vmatprep.subr.bf16.mxu0 %v7519_v57 }
 0x13d   :  { %6920 = vmatpush3.bf16.msra.mxu0 %v7519_v57 }
 0x13e   :  { %6921 = vmatprep.subr.bf16.mxu0 %v7520_v58 }
 0x141   :  { %6922 = vmatpush3.bf16.msra.mxu0 %v7520_v58 }
 0x142   :  { %7456 = vmatprep.subr.msk.bf16.mxu0 %vm253_vm2, %v7521_v59 }
 0x145   :  { %6924 = vmatpush3.bf16.msra.mxu0 %v1333_v60 }
 0x146   :  { %6937 = vmatprep.subr.bf16.mxu0 %v7522_v61 }
 0x148   :  { %6926 = vmatmul.mubr.msk.bf16.vlgmr.msra.gmra.mrb[16].mxu0 %vm246_vm3, %v8193_v37 }
 0x149   :  { %6938 = vmatpush3.bf16.msra.mxu0 %v7522_v61  ;;  %6951 = vmatprep.mubr.msk.bf16.mxu0 %vm246_vm3, %v8195_v38 }
 0x14a   :  { %6939 = vmatprep.subr.bf16.mxu0 %v7523_v62 }
 0x14d   :  { %6940 = vmatpush3.bf16.msra.mxu0 %v7523_v62 }
 0x14e   :  { %6941 = vmatprep.subr.bf16.mxu0 %v7524_v63 }
 0x151   :  { %6942 = vmatpush3.bf16.msra.mxu0 %v7524_v63 }
 0x152   :  { %6943 = vmatprep.subr.bf16.mxu0 %v7525_v0 }
 0x155   :  { %6944 = vmatpush3.bf16.msra.mxu0 %v7525_v0 }
 0x156   :  { %6945 = vmatprep.subr.bf16.mxu0 %v7526_v1 }
 0x159   :  { %6946 = vmatpush3.bf16.msra.mxu0 %v7526_v1  ;;  %v7540_v1 = vld [vmem:[%s9724_s4 + $0x20] sm:$0xff]  }
 0x15a   :  { %6947 = vmatprep.subr.bf16.mxu0 %v7527_v5 }
 0x15d   :  { %6948 = vmatpush3.bf16.msra.mxu0 %v7527_v5 }
 0x15e   :  { %7457 = vmatprep.subr.msk.bf16.mxu0 %vm253_vm2, %v7528_v6 }
 0x161   :  { %6950 = vmatpush3.bf16.msra.mxu0 %v1514_v7 }
 0x164   :  { %6952 = vmatmul.mubr.msk.bf16.vlgmr.msra.gmra.mrb[20].mxu0 %vm246_vm3, %v8193_v37 }
 0x1c7   :  { %v6771_v10 = vpop.f32.mrb[0].mxu1  ;;  %v6789_v11 = vpop.f32.mrb[4].mxu0 }
 0x1c8   :  { %v291_v14 = vpop.f32.mrb[1].mxu1  ;;  %v402_v15 = vpop.f32.mrb[5].mxu0 }
 0x1c9   :  { %v6772_v16 = vpop.f32.mrb[2].mxu1  ;;  %v6790_v17 = vpop.f32.mrb[6].mxu0 }
 0x1ca   :  { %v311_v20 = vpack.c.bf16 %v6772_v16, %v6771_v10  ;;  %v423_v22 = vpack.c.bf16 %v6790_v17, %v6789_v11  ;;  %v294_v25 = vpop.f32.mrb[3].mxu1  ;;  %v405_v26 = vpop.f32.mrb[7].mxu0  ;;  %v7543_v16 = vld [vmem:[%s9724_s4 + $0x38] sm:$0xff]   ;;  %v7544_v17 = vld [vmem:[%s9724_s4 + $0x40] sm:$0xff]  }
 0x1cb   :  { %v310_v27 = vpack.c.bf16 %v294_v25, %v291_v14  ;;  %v422_v28 = vpack.c.bf16 %v405_v26, %v402_v15  ;;  %v7541_v14 = vld [vmem:[%s9724_s4 + $0x28] sm:$0xff]   ;;  %v7542_v15 = vld [vmem:[%s9724_s4 + $0x30] sm:$0xff]  }
 0x1cc   :  { %v7547_v25 = vld [vmem:[%s9721_s3 + $0x10c] sm:$0xff]   ;;  %v7548_v26 = vld [vmem:[%s9721_s3 + $0x114] sm:$0xff]  }
 0x1cd   :  { %6791 = vmatprep.subr.bf16.mxu1 %v422_v28 }
 0x1ce   :  { %6792 = vmatpush3.bf16.msra.mxu1 %v422_v28  ;;  %v7550_v28 = vld [vmem:[%s9721_s3 + $0x124] sm:$0xff]  }
 0x1cf   :  { %6793 = vmatprep.subr.bf16.mxu1 %v423_v22 }
 0x1d2   :  { %6794 = vmatpush3.bf16.msra.mxu1 %v423_v22  ;;  %v7546_v22 = vld [vmem:[%s9724_s4 + $0x48] sm:$0xff]  }
 0x1d3   :  { %6799 = vmatprep.subr.bf16.mxu1 %v310_v27 }
 0x1d5   :  { %6796 = vmatmul.mubr.msk.bf16.vlgmr.msra.gmra.mrb[4].mxu1 %vm434_vm4, %v7530_v29  ;;  %v7551_v29 = vld [vmem:[%s9721_s3 + $0x12c] sm:$0xff]  }
 0x1d6   :  { %6800 = vmatpush3.bf16.msra.mxu1 %v310_v27  ;;  %6803 = vmatprep.mubr.msk.bf16.mxu1 %vm434_vm4, %v7531_v30  ;;  %v7549_v27 = vld [vmem:[%s9721_s3 + $0x11c] sm:$0xff]   ;;  %v7552_v30 = vld [vmem:[%s9721_s3 + $0x134] ss:$0 sps:$4 sm:$0x11]  }
 0x1d7   :  { %6801 = vmatprep.subr.bf16.mxu1 %v311_v20 }
 0x1da   :  { %6802 = vmatpush3.bf16.msra.mxu1 %v311_v20  ;;  %v7545_v20 = vld [vmem:[%s9721_s3 + $0x104] sm:$0xff]  }
 0x1db   :  { %6807 = vmatprep.subr.bf16.mxu1 %v7532_v31 }
 0x1e1   :  { %6804 = vmatmul.mubr.msk.bf16.vlgmr.msra.gmra.mrb[4].mxu1 %vm434_vm4, %v7533_v32  ;;  %v7553_v32 = vld [vmem:[%s9724_s4 + $0x50] sm:$0xff]  }
 0x1e2   :  { %6808 = vmatpush3.bf16.msra.mxu1 %v7532_v31  ;;  %6821 = vmatprep.mubr.msk.bf16.mxu1 %vm246_vm3, %v8195_v38  ;;  %v1152_v31 = vsel %vm253_vm2, %v7552_v30, 0 }
 0x1e3   :  { %v6849_v34 = vpop.f32.mrb[8].mxu0  ;;  %6809 = vmatprep.subr.bf16.mxu1 %v7534_v33 }
 0x1e4   :  { %v826_v36 = vpop.f32.mrb[9].mxu0 }
 0x1e5   :  { %v6850_v39 = vpop.f32.mrb[10].mxu0 }
 0x1e6   :  { %v847_v40 = vpack.c.bf16 %v6850_v39, %v6849_v34  ;;  %6810 = vmatpush3.bf16.msra.mxu1 %v7534_v33  ;;  %v829_v41 = vpop.f32.mrb[11].mxu0 }
 0x1e7   :  { %v846_v21 = vpack.c.bf16 %v829_v41, %v826_v36  ;;  %6811 = vmatprep.subr.bf16.mxu1 %v7535_v35  ;;  %v7554_v41 = vld [vmem:[%s9724_s4 + $0x58] sm:$0xff]  }
 0x1ea   :  { %6812 = vmatpush3.bf16.msra.mxu1 %v7535_v35 }
 0x1eb   :  { %6813 = vmatprep.subr.bf16.mxu1 %v7536_v42 }
 0x1ee   :  { %6814 = vmatpush3.bf16.msra.mxu1 %v7536_v42  ;;  %v7556_v42 = vld [vmem:[%s9724_s4 + $0x68] sm:$0xff]  }
 0x1ef   :  { %6815 = vmatprep.subr.bf16.mxu1 %v7537_v43 }
 0x1f2   :  { %6816 = vmatpush3.bf16.msra.mxu1 %v7537_v43  ;;  %v7557_v43 = vld [vmem:[%s9724_s4 + $0x70] sm:$0xff]  }
 0x1f3   :  { %6817 = vmatprep.subr.bf16.mxu1 %v7538_v44 }
 0x1f6   :  { %6818 = vmatpush3.bf16.msra.mxu1 %v7538_v44  ;;  %v7558_v44 = vld [vmem:[%s9721_s3 + $0x1a0] sm:$0xff]  }
 0x1f7   :  { %7452 = vmatprep.subr.msk.bf16.mxu1 %vm253_vm2, %v7539_v45  ;;  %v7559_v45 = vld [vmem:[%s9724_s4 + $0x78] sm:$0xff]  }
 0x1fa   :  { %6820 = vmatpush3.bf16.msra.mxu1 %v609_v46  ;;  %v7560_v46 = vld [vmem:[%s9721_s3 + $0x1a8] sm:$0xff]  }
 0x1fd   :  { %6822 = vmatmul.mubr.msk.bf16.vlgmr.msra.gmra.mrb[8].mxu1 %vm246_vm3, %v8193_v37 }
 0x1fe   :  { %6829 = vmatprep.mubr.msk.bf16.mxu1 %vm434_vm4, %v7540_v1 }
 0x1ff   :  { %v6875_v47 = vpop.f32.mrb[12].mxu0 }
 0x200   :  { %v1007_v48 = vpop.f32.mrb[13].mxu0 }
 0x201   :  { %v6876_v49 = vpop.f32.mrb[14].mxu0 }
 0x202   :  { %v1028_v50 = vpack.c.bf16 %v6876_v49, %v6875_v47  ;;  %v1010_v51 = vpop.f32.mrb[15].mxu0  ;;  %v7561_v47 = vld [vmem:[%s9721_s3 + $0x1b0] sm:$0xff]   ;;  %v7563_v49 = vld [vmem:[%s9721_s3 + $0x1c0] sm:$0xff]  }
 0x203   :  { %v1027_v52 = vpack.c.bf16 %v1010_v51, %v1007_v48  ;;  %v7562_v48 = vld [vmem:[%s9721_s3 + $0x1b8] sm:$0xff]  }
 0x21b   :  { %v6927_v53 = vpop.f32.mrb[16].mxu0 }
 0x21c   :  { %v1369_v54 = vpop.f32.mrb[17].mxu0 }
 0x21d   :  { %v6928_v55 = vpop.f32.mrb[18].mxu0 }
 0x21e   :  { %v8354_v56 = vpack.c.bf16 %v6928_v55, %v6927_v53  ;;  %v1372_v57 = vpop.f32.mrb[19].mxu0  ;;  %v7568_v53 = vld [vmem:[%s9725_s6] sm:$0xff]  }
 0x21f   :  { %v8356_v58 = vpack.c.bf16 %v1372_v57, %v1369_v54  ;;  %v7569_v54 = vld [vmem:[%s9725_s6 + $0x8] sm:$0xff]   ;;  %6989 = vmatprep.subr.bf16.mxu0 %v7568_v53 }
 0x220   :  { %6990 = vmatpush3.bf16.msra.mxu0 %v7568_v53 }
 0x221   :  { %6991 = vmatprep.subr.bf16.mxu0 %v7569_v54 }
 0x224   :  { %6992 = vmatpush3.bf16.msra.mxu0 %v7569_v54 }
 0x237   :  { %v6953_v59 = vpop.f32.mrb[20].mxu0 }
 0x238   :  { %v1550_v60 = vpop.f32.mrb[21].mxu0 }
 0x239   :  { %v6954_v61 = vpop.f32.mrb[22].mxu0 }
 0x23a   :  { %v8358_v62 = vpack.c.bf16 %v6954_v61, %v6953_v59  ;;  %v1553_v63 = vpop.f32.mrb[23].mxu0  ;;  %v7570_v61 = vld [vmem:[%s9725_s6 + $0x10] sm:$0xff]  }
 0x23b   :  { %v8360_v0 = vpack.c.bf16 %v1553_v63, %v1550_v60  ;;  %v7567_v60 = vld [vmem:[%s9724_s4 + $0x88] sm:$0xff]   ;;  %6993 = vmatprep.subr.bf16.mxu0 %v7570_v61 }
 0x23c   :  { %6994 = vmatpush3.bf16.msra.mxu0 %v7570_v61 }
 0x2d0   :  { %v6823_v4 = vpop.f32.mrb[8].mxu1 }
 0x2d1   :  { %v645_v5 = vpop.f32.mrb[9].mxu1 }
 0x2d2   :  { %v6824_v6 = vpop.f32.mrb[10].mxu1 }
 0x2d3   :  { %v666_v7 = vpack.c.bf16 %v6824_v6, %v6823_v4  ;;  %v648_v10 = vpop.f32.mrb[11].mxu1 }
 0x2d4   :  { %v665_v11 = vpack.c.bf16 %v648_v10, %v645_v5 }
 0x2d6   :  { %6825 = vmatprep.subr.bf16.mxu1 %v665_v11 }
 0x2d7   :  { %6826 = vmatpush3.bf16.msra.mxu1 %v665_v11 }
 0x2d8   :  { %6827 = vmatprep.subr.bf16.mxu1 %v666_v7 }
 0x2db   :  { %6828 = vmatpush3.bf16.msra.mxu1 %v666_v7 }
 0x2dc   :  { %6851 = vmatprep.subr.bf16.mxu1 %v846_v21 }
 0x2de   :  { %6830 = vmatmul.mubr.msk.bf16.vlgmr.msra.gmra.mrb[4].mxu1 %vm434_vm4, %v7541_v14 }
 0x2df   :  { %6852 = vmatpush3.bf16.msra.mxu1 %v846_v21  ;;  %6855 = vmatprep.mubr.msk.bf16.mxu1 %vm434_vm4, %v7542_v15  ;;  %v7555_v21 = vld [vmem:[%s9724_s4 + $0x60] sm:$0xff]  }
 0x2e0   :  { %6853 = vmatprep.subr.bf16.mxu1 %v847_v40 }
 0x2e3   :  { %6854 = vmatpush3.bf16.msra.mxu1 %v847_v40 }
 0x2e4   :  { %6877 = vmatprep.subr.bf16.mxu1 %v1027_v52 }
 0x2ea   :  { %6856 = vmatmul.mubr.msk.bf16.vlgmr.msra.gmra.mrb[4].mxu1 %vm434_vm4, %v7543_v16 }
 0x2eb   :  { %6878 = vmatpush3.bf16.msra.mxu1 %v1027_v52  ;;  %6881 = vmatprep.mubr.msk.bf16.mxu1 %vm434_vm4, %v7544_v17  ;;  %v7566_v52 = vld [vmem:[%s9724_s4 + $0x80] sm:$0xff]  }
 0x2ec   :  { %6879 = vmatprep.subr.bf16.mxu1 %v1028_v50 }
 0x2ef   :  { %6880 = vmatpush3.bf16.msra.mxu1 %v1028_v50  ;;  %v7565_v50 = vld [vmem:[%s9721_s3 + $0x1d0] ss:$0 sps:$4 sm:$0x11]  }
 0x2f0   :  { %6885 = vmatprep.subr.bf16.mxu1 %v7545_v20  ;;  %v1695_v51 = vsel %vm253_vm2, %v7565_v50, 0 }
 0x2f6   :  { %6882 = vmatmul.mubr.msk.bf16.vlgmr.msra.gmra.mrb[4].mxu1 %vm434_vm4, %v7546_v22 }
 0x2f7   :  { %6886 = vmatpush3.bf16.msra.mxu1 %v7545_v20  ;;  %6899 = vmatprep.mubr.msk.bf16.mxu1 %vm246_vm3, %v8195_v38 }
 0x2f8   :  { %6887 = vmatprep.subr.bf16.mxu1 %v7547_v25 }
 0x2fb   :  { %6888 = vmatpush3.bf16.msra.mxu1 %v7547_v25 }
 0x2fc   :  { %6889 = vmatprep.subr.bf16.mxu1 %v7548_v26 }
 0x2ff   :  { %6890 = vmatpush3.bf16.msra.mxu1 %v7548_v26  ;;  %v7576_v26 = vld [vmem:[%s9725_s6 + $0x38] sm:$0xff]  }
 0x300   :  { %6891 = vmatprep.subr.bf16.mxu1 %v7549_v27 }
 0x303   :  { %6892 = vmatpush3.bf16.msra.mxu1 %v7549_v27  ;;  %v7577_v27 = vld [vmem:[%s9725_s6 + $0x40] sm:$0xff]  }
 0x304   :  { %6893 = vmatprep.subr.bf16.mxu1 %v7550_v28 }
 0x307   :  { %6894 = vmatpush3.bf16.msra.mxu1 %v7550_v28  ;;  %v7578_v28 = vld [vmem:[%s9725_s6 + $0x48] sm:$0xff]  }
 0x308   :  { %6895 = vmatprep.subr.bf16.mxu1 %v7551_v29 }
 0x30b   :  { %6896 = vmatpush3.bf16.msra.mxu1 %v7551_v29  ;;  %v7579_v29 = vld [vmem:[%s9725_s6 + $0x50] ss:$0 sps:$4 sm:$0x11]  }
 0x30c   :  { %7455 = vmatprep.subr.msk.bf16.mxu1 %vm253_vm2, %v7552_v30  ;;  %v2197_v30 = vsel %vm253_vm2, %v7579_v29, 0 }
 0x30f   :  { %6898 = vmatpush3.bf16.msra.mxu1 %v1152_v31  ;;  %v7580_v31 = vld [vmem:[%s9725_s6 + $0x54] sm:$0xff]  }
 0x312   :  { %6900 = vmatmul.mubr.msk.bf16.vlgmr.msra.gmra.mrb[12].mxu1 %vm246_vm3, %v8193_v37 }
 0x313   :  { %6907 = vmatprep.mubr.msk.bf16.mxu1 %vm434_vm4, %v7553_v32  ;;  %v7581_v32 = vld [vmem:[%s9725_s6 + $0x5c] sm:$0xff]  }
 0x3e5   :  { %v6901_v33 = vpop.f32.mrb[12].mxu1 }
 0x3e6   :  { %v1188_v34 = vpop.f32.mrb[13].mxu1 }
 0x3e7   :  { %v6902_v35 = vpop.f32.mrb[14].mxu1 }
 0x3e8   :  { %v1209_v36 = vpack.c.bf16 %v6902_v35, %v6901_v33  ;;  %v1191_v39 = vpop.f32.mrb[15].mxu1  ;;  %v7582_v33 = vld [vmem:[%s9725_s6 + $0x64] sm:$0xff]  }
 0x3e9   :  { %v1208_v40 = vpack.c.bf16 %v1191_v39, %v1188_v34  ;;  %v7583_v34 = vld [vmem:[%s9725_s6 + $0x6c] ss:$0 sps:$4 sm:$0x11]   ;;  %v7585_v39 = vld [vmem:[%s9725_s6 + $0x94] sm:$0xff]  }
 0x3ea   :  { %v2354_v35 = vsel %vm253_vm2, %v7583_v34, 0 }
 0x3eb   :  { %6903 = vmatprep.subr.bf16.mxu1 %v1208_v40 }
 0x3ec   :  { %6904 = vmatpush3.bf16.msra.mxu1 %v1208_v40  ;;  %v7586_v40 = vld [vmem:[%s9725_s6 + $0x9c] sm:$0xff]  }
 0x3ed   :  { %6905 = vmatprep.subr.bf16.mxu1 %v1209_v36 }
 0x3f0   :  { %6906 = vmatpush3.bf16.msra.mxu1 %v1209_v36  ;;  %v7584_v36 = vld [vmem:[%s9725_s6 + $0x8c] sm:$0xff]  }
 0x3f1   :  { %6929 = vmatprep.subr.bf16.mxu1 %v8356_v58 }
 0x3f3   :  { %6908 = vmatmul.mubr.msk.bf16.vlgmr.msra.gmra.mrb[4].mxu1 %vm434_vm4, %v7554_v41  ;;  %v7587_v41 = vld [vmem:[%s9725_s6 + $0xa4] ss:$0 sps:$4 sm:$0x11]  }
 0x3f4   :  { %6930 = vmatpush3.bf16.msra.mxu1 %v8356_v58  ;;  %6933 = vmatprep.mubr.msk.bf16.mxu1 %vm434_vm4, %v7555_v21  ;;  %v2668_v21 = vsel %vm253_vm2, %v7587_v41, 0 }
 0x3f5   :  { %6931 = vmatprep.subr.bf16.mxu1 %v8354_v56 }
 0x3f8   :  { %6932 = vmatpush3.bf16.msra.mxu1 %v8354_v56 }
 0x3f9   :  { %6955 = vmatprep.subr.bf16.mxu1 %v8360_v0 }
 0x3ff   :  { %6934 = vmatmul.mubr.msk.bf16.vlgmr.msra.gmra.mrb[4].mxu1 %vm434_vm4, %v7556_v42  ;;  %v7588_v42 = vld [vmem:[%s9725_s6 + $0xa8] sm:$0xff]  }
 0x400   :  { %6956 = vmatpush3.bf16.msra.mxu1 %v8360_v0  ;;  %6959 = vmatprep.mubr.msk.bf16.mxu1 %vm434_vm4, %v7557_v43  ;;  %v7572_v0 = vld [vmem:[%s9725_s6 + $0x1c] sm:$0xff]   ;;  %v7589_v43 = vld [vmem:[%s9725_s6 + $0xb0] sm:$0xff]  }
 0x401   :  { %6957 = vmatprep.subr.bf16.mxu1 %v8358_v62 }
 0x404   :  { %6958 = vmatpush3.bf16.msra.mxu1 %v8358_v62  ;;  %v7571_v62 = vld [vmem:[%s9725_s6 + $0x18] ss:$0 sps:$4 sm:$0x11]  }
 0x405   :  { %6963 = vmatprep.subr.bf16.mxu1 %v7558_v44  ;;  %7459 = vmatprep.subr.msk.bf16.mxu0 %vm253_vm2, %v7571_v62  ;;  %v1892_v63 = vsel %vm253_vm2, %v7571_v62, 0 }
 0x406   :  { %6996 = vmatpush3.bf16.msra.mxu0 %v1892_v63  ;;  %v7597_v63 = vld [vmem:[%s9726_s7 + $0x18] sm:$0xff]  }
 0x407   :  { %7001 = vmatprep.subr.bf16.mxu0 %v7572_v0 }
 0x40b   :  { %6960 = vmatmul.mubr.msk.bf16.vlgmr.msra.gmra.mrb[4].mxu1 %vm434_vm4, %v7559_v45  ;;  %v7591_v45 = vld [vmem:[%s9725_s6 + $0xc0] ss:$0 sps:$4 sm:$0x11]  }
 0x40c   :  { %6964 = vmatpush3.bf16.msra.mxu1 %v7558_v44  ;;  %6977 = vmatprep.mubr.msk.bf16.mxu1 %vm246_vm3, %v8195_v38  ;;  %v7564_v38 = vld [vmem:[%s9721_s3 + $0x1c8] sm:$0xff]   ;;  %v7590_v44 = vld [vmem:[%s9725_s6 + $0xb8] sm:$0xff]  }
 0x40d   :  { %6965 = vmatprep.subr.bf16.mxu1 %v7560_v46 }
 0x410   :  { %6966 = vmatpush3.bf16.msra.mxu1 %v7560_v46  ;;  %v2825_v46 = vsel %vm253_vm2, %v7591_v45, 0 }
 0x411   :  { %6967 = vmatprep.subr.bf16.mxu1 %v7561_v47 }
 0x414   :  { %6968 = vmatpush3.bf16.msra.mxu1 %v7561_v47  ;;  %v7592_v47 = vld [vmem:[%s9725_s6 + $0xc4] sm:$0xff]  }
 0x415   :  { %6969 = vmatprep.subr.bf16.mxu1 %v7562_v48 }
 0x418   :  { %6970 = vmatpush3.bf16.msra.mxu1 %v7562_v48  ;;  %v7593_v48 = vld [vmem:[%s9725_s6 + $0xcc] sm:$0xff]  }
 0x419   :  { %6971 = vmatprep.subr.bf16.mxu1 %v7563_v49 }
 0x41c   :  { %6972 = vmatpush3.bf16.msra.mxu1 %v7563_v49  ;;  %v7594_v49 = vld [vmem:[%s9725_s6 + $0xd4] sm:$0xff]  }
 0x41d   :  { %6973 = vmatprep.subr.bf16.mxu1 %v7564_v38 }
 0x420   :  { %6974 = vmatpush3.bf16.msra.mxu1 %v7564_v38  ;;  %v7595_v38 = vld [vmem:[%s9725_s6 + $0xdc] ss:$0 sps:$4 sm:$0x11]  }
 0x421   :  { %7458 = vmatprep.subr.msk.bf16.mxu1 %vm253_vm2, %v7565_v50  ;;  %v2982_v50 = vsel %vm253_vm2, %v7595_v38, 0 }
 0x424   :  { %6976 = vmatpush3.bf16.msra.mxu1 %v1695_v51  ;;  %v7596_v51 = vld [vmem:[%s9726_s7 + $0x10] sm:$0xff]  }
 0x427   :  { %6978 = vmatmul.mubr.msk.bf16.vlgmr.msra.gmra.mrb[16].mxu1 %vm246_vm3, %v8193_v37 }
 0x428   :  { %6985 = vmatprep.mubr.msk.bf16.mxu1 %vm434_vm4, %v7566_v52 }
 0x4fa   :  { %v6979_v55 = vpop.f32.mrb[16].mxu1 }
 0x4fb   :  { %v1731_v37 = vpop.f32.mrb[17].mxu1 }
 0x4fc   :  { %v6980_v56 = vpop.f32.mrb[18].mxu1 }
 0x4fd   :  { %v1752_v57 = vpack.c.bf16 %v6980_v56, %v6979_v55  ;;  %v1734_v58 = vpop.f32.mrb[19].mxu1 }
 0x4fe   :  { %v1751_v59 = vpack.c.bf16 %v1734_v58, %v1731_v37 }
 0x500   :  { %6981 = vmatprep.subr.bf16.mxu1 %v1751_v59 }
 0x501   :  { %6982 = vmatpush3.bf16.msra.mxu1 %v1751_v59 }
 0x502   :  { %6983 = vmatprep.subr.bf16.mxu1 %v1752_v57 }
 0x505   :  { %6984 = vmatpush3.bf16.msra.mxu1 %v1752_v57 }
 0x508   :  { %6986 = vmatmul.mubr.msk.bf16.vlgmr.msra.gmra.mrb[4].mxu1 %vm434_vm4, %v7567_v60 }
 0x509   :  { %7017 = vmatprep.mubr.msk.bf16.mxu1 %vm434_vm4, %v7596_v51 }
 0x5db   :  { %v6987_v1 = vpop.f32.mrb[4].mxu1 }
 0x5dc   :  { %v1848_v4 = vadd.f32 %v6987_v1, %v8155_v9  ;;  %v1803_v5 = vpop.f32.mrb[5].mxu1  ;;  %v7573_v9 = vld [vmem:[%s9725_s6 + $0x24] sm:$0xff]  }
 0x5dd   :  { %v1846_v6 = vadd.f32 %v8139_v3, %v1803_v5  ;;  %v6988_v7 = vpop.f32.mrb[6].mxu1  ;;  %v7575_v3 = vld [vmem:[%s9725_s6 + $0x34] ss:$0 sps:$4 sm:$0x11]  }
 0x5de   :  { %v1849_v10 = vadd.f32 %v6988_v7, %v8153_v8  ;;  %v1806_v11 = vpop.f32.mrb[7].mxu1  ;;  %v1852_v15 = vmax.f32 %v1848_v4, 0.0  ;;  %v1979_v8 = vsel %vm253_vm2, %v7575_v3, 0 }
 0x5df   :  { %v1847_v14 = vadd.f32 %v8137_v2, %v1806_v11  ;;  %v1850_v17 = vmax.f32 %v1846_v6, 0.0  ;;  %v7574_v2 = vld [vmem:[%s9725_s6 + $0x2c] sm:$0xff]  }
 0x5e0   :  { %v1853_v16 = vmax.f32 %v1849_v10, 0.0  ;;  %v7599_v11 = vld [vmem:[%s9726_s7 + $0x8] sm:$0xff]  }
 0x5e1   :  { %v1851_v20 = vmax.f32 %v1847_v14, 0.0  ;;  %v7600_v14 = vld [vmem:[%s9726_s7 + $0x20] sm:$0xff]  }
 0x5e2   :  { %v8501_v22 = vpack.c.bf16 %v1853_v16, %v1852_v15 }
 0x5e3   :  { %v8503_v25 = vpack.c.bf16 %v1851_v20, %v1850_v17  ;;  %v7601_v20 = vld [vmem:[%s9726_s7 + $0x28] sm:$0xff]  }
 0x5e5   :  { %6997 = vmatprep.mubr.msk.bf16.mxu0 %vm1884_vm5, %v8503_v25 }
 0x5e6   :  { %6998 = vmatmul.mubr.msk.bf16.vlgmr.msra.gmra.mrb[24].mxu0 %vm1884_vm5, %v8501_v22 }
 0x5e7   :  { %7002 = vmatpush3.bf16.msra.mxu0 %v7572_v0  ;;  %7009 = vmatprep.mubr.msk.bf16.mxu0 %vm1884_vm5, %v8503_v25  ;;  %v7598_v0 = vld [vmem:[%s9726_s7] sm:$0xff]  }
 0x5e8   :  { %7003 = vmatprep.subr.bf16.mxu0 %v7573_v9 }
 0x5eb   :  { %7004 = vmatpush3.bf16.msra.mxu0 %v7573_v9 }
 0x5ec   :  { %7005 = vmatprep.subr.bf16.mxu0 %v7574_v2 }
 0x5ef   :  { %7006 = vmatpush3.bf16.msra.mxu0 %v7574_v2 }
 0x5f0   :  { %7460 = vmatprep.subr.msk.bf16.mxu0 %vm253_vm2, %v7575_v3  ;;  %v7602_v3 = vld [vmem:[%s9726_s7 + $0x30] sm:$0xff]  }
 0x5f3   :  { %7008 = vmatpush3.bf16.msra.mxu0 %v1979_v8 }
 0x5f4   :  { %7029 = vmatprep.subr.bf16.mxu0 %v7576_v26 }
 0x5f6   :  { %7010 = vmatmul.mubr.msk.bf16.vlgmr.msra.gmra.mrb[28].mxu0 %vm1884_vm5, %v8501_v22 }
 0x5f7   :  { %7030 = vmatpush3.bf16.msra.mxu0 %v7576_v26  ;;  %7037 = vmatprep.mubr.msk.bf16.mxu0 %vm1884_vm5, %v8503_v25  ;;  %v7603_v26 = vld [vmem:[%s9725_s6 + $0x70] sm:$0xff]  }
 0x5f8   :  { %7031 = vmatprep.subr.bf16.mxu0 %v7577_v27 }
 0x5fb   :  { %7032 = vmatpush3.bf16.msra.mxu0 %v7577_v27  ;;  %v7604_v27 = vld [vmem:[%s9726_s7 + $0x38] sm:$0xff]  }
 0x5fc   :  { %7033 = vmatprep.subr.bf16.mxu0 %v7578_v28 }
 0x5ff   :  { %7034 = vmatpush3.bf16.msra.mxu0 %v7578_v28 }
 0x600   :  { %7461 = vmatprep.subr.msk.bf16.mxu0 %vm253_vm2, %v7579_v29  ;;  %v7605_v29 = vld [vmem:[%s9725_s6 + $0x78] sm:$0xff]  }
 0x603   :  { %7036 = vmatpush3.bf16.msra.mxu0 %v2197_v30 }
 0x604   :  { %7049 = vmatprep.subr.bf16.mxu0 %v7580_v31 }
 0x606   :  { %7038 = vmatmul.mubr.msk.bf16.vlgmr.msra.gmra.mrb[32].mxu0 %vm1884_vm5, %v8501_v22 }
 0x607   :  { %7050 = vmatpush3.bf16.msra.mxu0 %v7580_v31  ;;  %7057 = vmatprep.mubr.msk.bf16.mxu0 %vm1884_vm5, %v8503_v25 }
 0x608   :  { %7051 = vmatprep.subr.bf16.mxu0 %v7581_v32 }
 0x60b   :  { %7052 = vmatpush3.bf16.msra.mxu0 %v7581_v32 }
 0x60c   :  { %7053 = vmatprep.subr.bf16.mxu0 %v7582_v33 }
 0x60f   :  { %7054 = vmatpush3.bf16.msra.mxu0 %v7582_v33 }
 0x610   :  { %7462 = vmatprep.subr.msk.bf16.mxu0 %vm253_vm2, %v7583_v34 }
 0x613   :  { %7056 = vmatpush3.bf16.msra.mxu0 %v2354_v35  ;;  %v7606_v35 = vld [vmem:[%s9725_s6 + $0x80] sm:$0xff]  }
 0x614   :  { %7089 = vmatprep.subr.bf16.mxu0 %v7584_v36 }
 0x616   :  { %7058 = vmatmul.mubr.msk.bf16.vlgmr.msra.gmra.mrb[36].mxu0 %vm1884_vm5, %v8501_v22 }
 0x617   :  { %7090 = vmatpush3.bf16.msra.mxu0 %v7584_v36  ;;  %7097 = vmatprep.mubr.msk.bf16.mxu0 %vm1884_vm5, %v8503_v25  ;;  %v7607_v36 = vld [vmem:[%s9725_s6 + $0x88] ss:$0 sps:$4 sm:$0x11]  }
 0x618   :  { %7091 = vmatprep.subr.bf16.mxu0 %v7585_v39 }
 0x61b   :  { %7092 = vmatpush3.bf16.msra.mxu0 %v7585_v39  ;;  %v2511_v39 = vsel %vm253_vm2, %v7607_v36, 0 }
 0x61c   :  { %7093 = vmatprep.subr.bf16.mxu0 %v7586_v40 }
 0x61f   :  { %7094 = vmatpush3.bf16.msra.mxu0 %v7586_v40 }
 0x620   :  { %7464 = vmatprep.subr.msk.bf16.mxu0 %vm253_vm2, %v7587_v41 }
 0x623   :  { %7096 = vmatpush3.bf16.msra.mxu0 %v2668_v21 }
 0x624   :  { %7109 = vmatprep.subr.bf16.mxu0 %v7588_v42 }
 0x626   :  { %7098 = vmatmul.mubr.msk.bf16.vlgmr.msra.gmra.mrb[40].mxu0 %vm1884_vm5, %v8501_v22 }
 0x627   :  { %7110 = vmatpush3.bf16.msra.mxu0 %v7588_v42  ;;  %7117 = vmatprep.mubr.msk.bf16.mxu0 %vm1884_vm5, %v8503_v25 }
 0x628   :  { %7111 = vmatprep.subr.bf16.mxu0 %v7589_v43 }
 0x62b   :  { %7112 = vmatpush3.bf16.msra.mxu0 %v7589_v43 }
 0x62c   :  { %7113 = vmatprep.subr.bf16.mxu0 %v7590_v44 }
 0x62f   :  { %7114 = vmatpush3.bf16.msra.mxu0 %v7590_v44 }
 0x630   :  { %7465 = vmatprep.subr.msk.bf16.mxu0 %vm253_vm2, %v7591_v45 }
 0x633   :  { %7116 = vmatpush3.bf16.msra.mxu0 %v2825_v46 }
 0x634   :  { %7129 = vmatprep.subr.bf16.mxu0 %v7592_v47 }
 0x636   :  { %7118 = vmatmul.mubr.msk.bf16.vlgmr.msra.gmra.mrb[44].mxu0 %vm1884_vm5, %v8501_v22 }
 0x637   :  { %7130 = vmatpush3.bf16.msra.mxu0 %v7592_v47  ;;  %7137 = vmatprep.mubr.msk.bf16.mxu0 %vm1884_vm5, %v8503_v25 }
 0x638   :  { %7131 = vmatprep.subr.bf16.mxu0 %v7593_v48 }
 0x63b   :  { %7132 = vmatpush3.bf16.msra.mxu0 %v7593_v48 }
 0x63c   :  { %7133 = vmatprep.subr.bf16.mxu0 %v7594_v49 }
 0x63f   :  { %7134 = vmatpush3.bf16.msra.mxu0 %v7594_v49 }
 0x640   :  { %7466 = vmatprep.subr.msk.bf16.mxu0 %vm253_vm2, %v7595_v38 }
 0x643   :  { %7136 = vmatpush3.bf16.msra.mxu0 %v2982_v50  ;;  %v7608_v50 = vld [vmem:[%s9726_s7 + $0x40] sm:$0xff]  }
 0x646   :  { %7138 = vmatmul.mubr.msk.bf16.vlgmr.msra.gmra.mrb[48].mxu0 %vm1884_vm5, %v8501_v22 }
 0x6b9   :  { %v6999_v52 = vpop.f32.mrb[24].mxu0 }
 0x6ba   :  { %v1928_v53 = vpop.f32.mrb[25].mxu0 }
 0x6bb   :  { %v7000_v54 = vpop.f32.mrb[26].mxu0 }
 0x6bc   :  { %v1948_v55 = vpack.c.bf16 %v7000_v54, %v6999_v52  ;;  %v1931_v37 = vpop.f32.mrb[27].mxu0 }
 0x6bd   :  { %v1947_v56 = vpack.c.bf16 %v1931_v37, %v1928_v53 }
 0x6c9   :  { %v7011_v57 = vpop.f32.mrb[28].mxu0 }
 0x6ca   :  { %v2015_v58 = vpop.f32.mrb[29].mxu0 }
 0x6cb   :  { %v7012_v59 = vpop.f32.mrb[30].mxu0 }
 0x6cc   :  { %v2036_v60 = vpack.c.bf16 %v7012_v59, %v7011_v57  ;;  %v2018_v61 = vpop.f32.mrb[31].mxu0  ;;  %v7610_v57 = vld [vmem:[%s9726_s7 + $0x50] sm:$0xff]   ;;  %v7612_v59 = vld [vmem:[%s9726_s7 + $0x60] sm:$0xff]  }
 0x6cd   :  { %v2035_v62 = vpack.c.bf16 %v2018_v61, %v2015_v58  ;;  %v7611_v58 = vld [vmem:[%s9726_s7 + $0x58] sm:$0xff]   ;;  %v7614_v61 = vld [vmem:[%s9726_s7 + $0x70] sm:$0xff]  }
 0x6cf   :  { %7013 = vmatprep.subr.bf16.mxu1 %v2035_v62 }
 0x6d0   :  { %7014 = vmatpush3.bf16.msra.mxu1 %v2035_v62  ;;  %v7615_v62 = vld [vmem:[%s9725_s6 + $0xe0] sm:$0xff]  }
 0x6d1   :  { %7015 = vmatprep.subr.bf16.mxu1 %v2036_v60 }
 0x6d4   :  { %7016 = vmatpush3.bf16.msra.mxu1 %v2036_v60  ;;  %v7613_v60 = vld [vmem:[%s9726_s7 + $0x68] sm:$0xff]  }
 0x6d5   :  { %7021 = vmatprep.subr.bf16.mxu1 %v1947_v56 }
 0x6d7   :  { %7018 = vmatmul.mubr.msk.bf16.vlgmr.msra.gmra.mrb[20].mxu1 %vm434_vm4, %v7597_v63  ;;  %v7616_v63 = vld [vmem:[%s9726_s7 + $0x78] sm:$0xff]  }
 0x6d8   :  { %7022 = vmatpush3.bf16.msra.mxu1 %v1947_v56  ;;  %7025 = vmatprep.mubr.msk.bf16.mxu1 %vm434_vm4, %v7598_v0  ;;  %v7609_v56 = vld [vmem:[%s9726_s7 + $0x48] sm:$0xff]  }
 0x6d9   :  { %7023 = vmatprep.subr.bf16.mxu1 %v1948_v55  ;;  %v7039_v1 = vpop.f32.mrb[32].mxu0  ;;  %v7617_v0 = vld [vmem:[%s9725_s6 + $0xe8] sm:$0xff]  }
 0x6da   :  { %v2233_v4 = vpop.f32.mrb[33].mxu0 }
 0x6db   :  { %v7040_v5 = vpop.f32.mrb[34].mxu0 }
 0x6dc   :  { %v2254_v6 = vpack.c.bf16 %v7040_v5, %v7039_v1  ;;  %7024 = vmatpush3.bf16.msra.mxu1 %v1948_v55  ;;  %v2236_v7 = vpop.f32.mrb[35].mxu0  ;;  %v7618_v1 = vld [vmem:[%s9725_s6 + $0xf0] sm:$0xff]  }
 0x6dd   :  { %v2253_v10 = vpack.c.bf16 %v2236_v7, %v2233_v4  ;;  %v7619_v4 = vld [vmem:[%s9725_s6 + $0xf8] ss:$0 sps:$4 sm:$0x11]  }
 0x6de   :  { %v3139_v5 = vsel %vm253_vm2, %v7619_v4, 0 }
 0x6df   :  { %7041 = vmatprep.subr.bf16.mxu1 %v2253_v10 }
 0x6e3   :  { %7026 = vmatmul.mubr.msk.bf16.vlgmr.msra.gmra.mrb[20].mxu1 %vm434_vm4, %v7599_v11 }
 0x6e4   :  { %7042 = vmatpush3.bf16.msra.mxu1 %v2253_v10  ;;  %7045 = vmatprep.mubr.msk.bf16.mxu1 %vm434_vm4, %v7600_v14 }
 0x6e5   :  { %7043 = vmatprep.subr.bf16.mxu1 %v2254_v6 }
 0x6e8   :  { %7044 = vmatpush3.bf16.msra.mxu1 %v2254_v6 }
 0x6e9   :  { %v7059_v15 = vpop.f32.mrb[36].mxu0 }
 0x6ea   :  { %v2390_v16 = vpop.f32.mrb[37].mxu0 }
 0x6eb   :  { %v7060_v17 = vpop.f32.mrb[38].mxu0 }
 0x6ec   :  { %v2411_v9 = vpack.c.bf16 %v7060_v17, %v7059_v15  ;;  %v2393_v2 = vpop.f32.mrb[39].mxu0  ;;  %v7623_v17 = vld [vmem:[%s9727_s9 + $0x18] sm:$0xff]  }
 0x6ed   :  { %v2410_v8 = vpack.c.bf16 %v2393_v2, %v2390_v16  ;;  %v7621_v16 = vld [vmem:[%s9726_s7 + $0x88] sm:$0xff]  }
 0x6ef   :  { %7046 = vmatmul.mubr.msk.bf16.vlgmr.msra.gmra.mrb[20].mxu1 %vm434_vm4, %v7601_v20  ;;  %7061 = vmatprep.subr.bf16.mxu1 %v2410_v8  ;;  %v7624_v20 = vld [vmem:[%s9727_s9 + $0x8] ss:$0 sps:$4 sm:$0x11]  }
 0x6f0   :  { %7062 = vmatpush3.bf16.msra.mxu1 %v2410_v8  ;;  %7065 = vmatprep.mubr.msk.bf16.mxu1 %vm434_vm4, %v7602_v3  ;;  %v3320_v2 = vsel %vm253_vm2, %v7624_v20, 0  ;;  %v7626_v8 = vld [vmem:[%s9727_s9 + $0xc] sm:$0xff]  }
 0x6f1   :  { %7063 = vmatprep.subr.bf16.mxu1 %v2411_v9 }
 0x6f4   :  { %7064 = vmatpush3.bf16.msra.mxu1 %v2411_v9  ;;  %v7625_v9 = vld [vmem:[%s9727_s9 + $0x20] ss:$0 sps:$4 sm:$0x11]  }
 0x6f5   :  { %7069 = vmatprep.subr.bf16.mxu1 %v7603_v26  ;;  %v3593_v3 = vsel %vm253_vm2, %v7625_v9, 0 }
 0x6f9   :  { %v7099_v28 = vpop.f32.mrb[40].mxu0 }
 0x6fa   :  { %v2704_v30 = vpop.f32.mrb[41].mxu0 }
 0x6fb   :  { %7066 = vmatmul.mubr.msk.bf16.vlgmr.msra.gmra.mrb[20].mxu1 %vm434_vm4, %v7604_v27  ;;  %v7100_v31 = vpop.f32.mrb[42].mxu0 }
 0x6fc   :  { %7070 = vmatpush3.bf16.msra.mxu1 %v7603_v26  ;;  %v2725_v32 = vpack.c.bf16 %v7100_v31, %v7099_v28  ;;  %7077 = vmatprep.mubr.msk.bf16.mxu1 %vm1884_vm5, %v8503_v25  ;;  %v2707_v33 = vpop.f32.mrb[43].mxu0  ;;  %v7627_v26 = vld [vmem:[%s9727_s9 + $0x24] sm:$0xff]  }
 0x6fd   :  { %v2724_v34 = vpack.c.bf16 %v2707_v33, %v2704_v30  ;;  %7071 = vmatprep.subr.bf16.mxu1 %v7605_v29 }
 0x700   :  { %7072 = vmatpush3.bf16.msra.mxu1 %v7605_v29 }
 0x701   :  { %7073 = vmatprep.subr.bf16.mxu1 %v7606_v35 }
 0x704   :  { %7074 = vmatpush3.bf16.msra.mxu1 %v7606_v35 }
 0x705   :  { %7463 = vmatprep.subr.msk.bf16.mxu1 %vm253_vm2, %v7607_v36 }
 0x708   :  { %7076 = vmatpush3.bf16.msra.mxu1 %v2511_v39 }
 0x709   :  { %v7119_v40 = vpop.f32.mrb[44].mxu0 }
 0x70a   :  { %v2861_v41 = vpop.f32.mrb[45].mxu0 }
 0x70b   :  { %7078 = vmatmul.mubr.msk.bf16.vlgmr.msra.gmra.mrb[24].mxu1 %vm1884_vm5, %v8501_v22  ;;  %v7120_v21 = vpop.f32.mrb[46].mxu0 }
 0x70c   :  { %v2882_v42 = vpack.c.bf16 %v7120_v21, %v7119_v40  ;;  %v2864_v43 = vpop.f32.mrb[47].mxu0  ;;  %7085 = vmatprep.mubr.msk.bf16.mxu1 %vm434_vm4, %v7608_v50  ;;  %v7636_v50 = vld [vmem:[%s9727_s9 + $0x54] sm:$0xff]  }
 0x70d   :  { %v2881_v44 = vpack.c.bf16 %v2864_v43, %v2861_v41  ;;  %v7631_v43 = vld [vmem:[%s9727_s9 + $0x38] ss:$0 sps:$4 sm:$0x11]  }
 0x719   :  { %v7139_v45 = vpop.f32.mrb[48].mxu0 }
 0x71a   :  { %v3018_v46 = vpop.f32.mrb[49].mxu0 }
 0x71b   :  { %v7140_v47 = vpop.f32.mrb[50].mxu0 }
 0x71c   :  { %v3039_v48 = vpack.c.bf16 %v7140_v47, %v7139_v45  ;;  %v3021_v49 = vpop.f32.mrb[51].mxu0  ;;  %v7632_v45 = vld [vmem:[%s9727_s9 + $0x3c] sm:$0xff]  }
 0x71d   :  { %v3038_v38 = vpack.c.bf16 %v3021_v49, %v3018_v46  ;;  %v7633_v46 = vld [vmem:[%s9727_s9 + $0x44] ss:$0 sps:$4 sm:$0x11]   ;;  %v7635_v49 = vld [vmem:[%s9727_s9 + $0x50] ss:$0 sps:$4 sm:$0x11]  }
 0x71e   :  { %v4016_v47 = vsel %vm253_vm2, %v7633_v46, 0 }
 0x7de   :  { %v7079_v51 = vpop.f32.mrb[24].mxu1 }
 0x7df   :  { %v2547_v52 = vpop.f32.mrb[25].mxu1 }
 0x7e0   :  { %v7080_v53 = vpop.f32.mrb[26].mxu1 }
 0x7e1   :  { %v2568_v54 = vpack.c.bf16 %v7080_v53, %v7079_v51  ;;  %v2550_v55 = vpop.f32.mrb[27].mxu1  ;;  %v7637_v51 = vld [vmem:[%s9727_s9 + $0x5c] ss:$0 sps:$4 sm:$0x11]   ;;  %v7638_v53 = vld [vmem:[%s9727_s9 + $0x60] sm:$0xff]  }
 0x7e2   :  { %v2567_v37 = vpack.c.bf16 %v2550_v55, %v2547_v52  ;;  %v4298_v52 = vsel %vm253_vm2, %v7637_v51, 0 }
 0x7e4   :  { %7081 = vmatprep.subr.bf16.mxu1 %v2567_v37 }
 0x7e5   :  { %7082 = vmatpush3.bf16.msra.mxu1 %v2567_v37  ;;  %v7640_v37 = vld [vmem:[%s9728_s10 + $0x10] sm:$0xff]  }
 0x7e6   :  { %7083 = vmatprep.subr.bf16.mxu1 %v2568_v54 }
 0x7e9   :  { %7084 = vmatpush3.bf16.msra.mxu1 %v2568_v54  ;;  %v7639_v54 = vld [vmem:[%s9727_s9 + $0x68] ss:$0 sps:$4 sm:$0x11]  }
 0x7ea   :  { %7101 = vmatprep.subr.bf16.mxu1 %v2724_v34  ;;  %v4439_v55 = vsel %vm253_vm2, %v7639_v54, 0 }
 0x7ec   :  { %7086 = vmatmul.mubr.msk.bf16.vlgmr.msra.gmra.mrb[20].mxu1 %vm434_vm4, %v7609_v56 }
 0x7ed   :  { %7102 = vmatpush3.bf16.msra.mxu1 %v2724_v34  ;;  %7105 = vmatprep.mubr.msk.bf16.mxu1 %vm434_vm4, %v7610_v57 }
 0x7ee   :  { %7103 = vmatprep.subr.bf16.mxu1 %v2725_v32 }
 0x7f1   :  { %7104 = vmatpush3.bf16.msra.mxu1 %v2725_v32 }
 0x7f2   :  { %7121 = vmatprep.subr.bf16.mxu1 %v2881_v44 }
 0x7f8   :  { %7106 = vmatmul.mubr.msk.bf16.vlgmr.msra.gmra.mrb[20].mxu1 %vm434_vm4, %v7611_v58 }
 0x7f9   :  { %7122 = vmatpush3.bf16.msra.mxu1 %v2881_v44  ;;  %7125 = vmatprep.mubr.msk.bf16.mxu1 %vm434_vm4, %v7612_v59  ;;  %v3875_v44 = vsel %vm253_vm2, %v7631_v43, 0 }
 0x7fa   :  { %7123 = vmatprep.subr.bf16.mxu1 %v2882_v42 }
 0x7fd   :  { %7124 = vmatpush3.bf16.msra.mxu1 %v2882_v42  ;;  %v7630_v42 = vld [vmem:[%s9727_s9 + $0x30] sm:$0xff]  }
 0x7fe   :  { %7141 = vmatprep.subr.bf16.mxu1 %v3038_v38 }
 0x804   :  { %7126 = vmatmul.mubr.msk.bf16.vlgmr.msra.gmra.mrb[20].mxu1 %vm434_vm4, %v7613_v60 }
 0x805   :  { %7142 = vmatpush3.bf16.msra.mxu1 %v3038_v38  ;;  %7145 = vmatprep.mubr.msk.bf16.mxu1 %vm434_vm4, %v7614_v61  ;;  %v4157_v38 = vsel %vm253_vm2, %v7635_v49, 0 }
 0x806   :  { %7143 = vmatprep.subr.bf16.mxu1 %v3039_v48 }
 0x809   :  { %7144 = vmatpush3.bf16.msra.mxu1 %v3039_v48  ;;  %v7634_v48 = vld [vmem:[%s9727_s9 + $0x48] sm:$0xff]  }
 0x80a   :  { %7149 = vmatprep.subr.bf16.mxu1 %v7615_v62 }
 0x810   :  { %7146 = vmatmul.mubr.msk.bf16.vlgmr.msra.gmra.mrb[20].mxu1 %vm434_vm4, %v7616_v63 }
 0x811   :  { %7150 = vmatpush3.bf16.msra.mxu1 %v7615_v62  ;;  %7157 = vmatprep.mubr.msk.bf16.mxu1 %vm1884_vm5, %v8503_v25  ;;  %v7620_v25 = vld [vmem:[%s9726_s7 + $0x80] sm:$0xff]  }
 0x812   :  { %7151 = vmatprep.subr.bf16.mxu1 %v7617_v0 }
 0x815   :  { %7152 = vmatpush3.bf16.msra.mxu1 %v7617_v0 }
 0x816   :  { %7153 = vmatprep.subr.bf16.mxu1 %v7618_v1 }
 0x819   :  { %7154 = vmatpush3.bf16.msra.mxu1 %v7618_v1 }
 0x81a   :  { %7467 = vmatprep.subr.msk.bf16.mxu1 %vm253_vm2, %v7619_v4 }
 0x81d   :  { %7156 = vmatpush3.bf16.msra.mxu1 %v3139_v5 }
 0x820   :  { %7158 = vmatmul.mubr.msk.bf16.vlgmr.msra.gmra.mrb[28].mxu1 %vm1884_vm5, %v8501_v22  ;;  %v7622_v22 = vld [vmem:[%s9727_s9] sm:$0xff]  }
 0x821   :  { %7165 = vmatprep.mubr.msk.bf16.mxu1 %vm434_vm4, %v7620_v25  ;;  %7169 = vmatprep.subr.bf16.mxu0 %v7622_v22 }
 0x822   :  { %7170 = vmatpush3.bf16.msra.mxu0 %v7622_v22 }
 0x823   :  { %7468 = vmatprep.subr.msk.bf16.mxu0 %vm253_vm2, %v7624_v20 }
 0x826   :  { %7172 = vmatpush3.bf16.msra.mxu0 %v3320_v2 }
 0x827   :  { %7177 = vmatprep.subr.bf16.mxu0 %v7626_v8 }
 0x8f3   :  { %v7159_v6 = vpop.f32.mrb[28].mxu1 }
 0x8f4   :  { %v3175_v7 = vpop.f32.mrb[29].mxu1 }
 0x8f5   :  { %v7160_v10 = vpop.f32.mrb[30].mxu1 }
 0x8f6   :  { %v3196_v11 = vpack.c.bf16 %v7160_v10, %v7159_v6  ;;  %v3178_v14 = vpop.f32.mrb[31].mxu1 }
 0x8f7   :  { %v3195_v15 = vpack.c.bf16 %v3178_v14, %v3175_v7 }
 0x8f9   :  { %7161 = vmatprep.subr.bf16.mxu1 %v3195_v15 }
 0x8fa   :  { %7162 = vmatpush3.bf16.msra.mxu1 %v3195_v15 }
 0x8fb   :  { %7163 = vmatprep.subr.bf16.mxu1 %v3196_v11 }
 0x8fe   :  { %7164 = vmatpush3.bf16.msra.mxu1 %v3196_v11 }
 0x8ff   :  { %7201 = vmatprep.subr.bf16.mxu1 %v7623_v17 }
 0x901   :  { %7166 = vmatmul.mubr.msk.bf16.vlgmr.msra.gmra.mrb[20].mxu1 %vm434_vm4, %v7621_v16 }
 0x902   :  { %7202 = vmatpush3.bf16.msra.mxu1 %v7623_v17 }
 0x903   :  { %7470 = vmatprep.subr.msk.bf16.mxu1 %vm253_vm2, %v7625_v9 }
 0x906   :  { %7204 = vmatpush3.bf16.msra.mxu1 %v3593_v3 }
 0x907   :  { %7217 = vmatprep.subr.bf16.mxu1 %v7627_v26 }
 0x9d4   :  { %v7167_v27 = vpop.f32.mrb[20].mxu1 }
 0x9d5   :  { %v3292_v28 = vadd.f32 %v7167_v27, %v8181_v19  ;;  %v3247_v29 = vpop.f32.mrb[21].mxu1  ;;  %v7628_v19 = vld [vmem:[%s9727_s9 + $0x14] ss:$0 sps:$4 sm:$0x11]   ;;  %v7642_v27 = vld [vmem:[%s9728_s10] sm:$0xff]  }
 0x9d6   :  { %v3290_v30 = vadd.f32 %v8165_v13, %v3247_v29  ;;  %v7168_v31 = vpop.f32.mrb[22].mxu1  ;;  %v3391_v13 = vsel %vm253_vm2, %v7628_v19, 0 }
 0x9d7   :  { %v3293_v32 = vadd.f32 %v7168_v31, %v8179_v18  ;;  %v3250_v33 = vpop.f32.mrb[23].mxu1  ;;  %v3296_v35 = vmax.f32 %v3292_v28, 0.0 }
 0x9d8   :  { %v3291_v34 = vadd.f32 %v8163_v12, %v3250_v33  ;;  %v3294_v39 = vmax.f32 %v3290_v30, 0.0  ;;  %v7629_v12 = vld [vmem:[%s9727_s9 + $0x2c] ss:$0 sps:$4 sm:$0x11]  }
 0x9d9   :  { %v3297_v36 = vmax.f32 %v3293_v32, 0.0  ;;  %v3734_v18 = vsel %vm253_vm2, %v7629_v12, 0 }
 0x9da   :  { %v3295_v40 = vmax.f32 %v3291_v34, 0.0 }
 0x9db   :  { %v8748_v41 = vpack.c.bf16 %v3297_v36, %v3296_v35 }
 0x9dc   :  { %v3298_v21 = vpack.c.bf16 %v3295_v40, %v3294_v39  ;;  %v7643_v39 = vld [vmem:[%s9728_s10 + $0x8] sm:$0xff]   ;;  %v7644_v40 = vld [vmem:[%s9728_s10 + $0x20] sm:$0xff]  }
 0x9de   :  { %7173 = vmatprep.mubr.msk.bf16.mxu0 %vm3312_vm6, %v3298_v21  ;;  %7205 = vmatprep.mubr.msk.bf16.mxu1 %vm3312_vm6, %v3298_v21 }
 0x9df   :  { %7174 = vmatmul.mubr.msk.bf16.vlgmr.msra.gmra.mrb[52].mxu0 %vm3312_vm6, %v8748_v41  ;;  %7206 = vmatmul.mubr.msk.bf16.vlgmr.msra.gmra.mrb[32].mxu1 %vm3312_vm6, %v8748_v41 }
 0x9e0   :  { %7178 = vmatpush3.bf16.msra.mxu0 %v7626_v8  ;;  %7181 = vmatprep.mubr.msk.bf16.mxu0 %vm3312_vm6, %v3298_v21  ;;  %v7641_v8 = vld [vmem:[%s9728_s10 + $0x18] sm:$0xff]  }
 0x9e1   :  { %7218 = vmatpush3.bf16.msra.mxu1 %v7627_v26  ;;  %7221 = vmatprep.mubr.msk.bf16.mxu1 %vm3312_vm6, %v3298_v21 }
 0x9e2   :  { %7469 = vmatprep.subr.msk.bf16.mxu0 %vm253_vm2, %v7628_v19  ;;  %7471 = vmatprep.subr.msk.bf16.mxu1 %vm253_vm2, %v7629_v12 }
 0x9e4   :  { %7180 = vmatpush3.bf16.msra.mxu0 %v3391_v13 }
 0x9e5   :  { %7220 = vmatpush3.bf16.msra.mxu1 %v3734_v18 }
 0x9e6   :  { %7233 = vmatprep.subr.bf16.mxu1 %v7630_v42 }
 0x9e7   :  { %7182 = vmatmul.mubr.msk.bf16.vlgmr.msra.gmra.mrb[56].mxu0 %vm3312_vm6, %v8748_v41 }
 0x9e8   :  { %7222 = vmatmul.mubr.msk.bf16.vlgmr.msra.gmra.mrb[36].mxu1 %vm3312_vm6, %v8748_v41  ;;  %7189 = vmatprep.mubr.msk.bf16.mxu0 %vm434_vm4, %v7640_v37  ;;  %v7648_v37 = vld [vmem:[%s9728_s10 + $0x40] sm:$0xff]  }
 0x9e9   :  { %7234 = vmatpush3.bf16.msra.mxu1 %v7630_v42  ;;  %7237 = vmatprep.mubr.msk.bf16.mxu1 %vm3312_vm6, %v3298_v21 }
 0x9ea   :  { %7472 = vmatprep.subr.msk.bf16.mxu1 %vm253_vm2, %v7631_v43 }
 0x9ed   :  { %7236 = vmatpush3.bf16.msra.mxu1 %v3875_v44  ;;  %v7645_v44 = vld [vmem:[%s9728_s10 + $0x28] sm:$0xff]  }
 0x9ee   :  { %7249 = vmatprep.subr.bf16.mxu1 %v7632_v45 }
 0x9f0   :  { %7238 = vmatmul.mubr.msk.bf16.vlgmr.msra.gmra.mrb[40].mxu1 %vm3312_vm6, %v8748_v41 }
 0x9f1   :  { %7250 = vmatpush3.bf16.msra.mxu1 %v7632_v45  ;;  %7253 = vmatprep.mubr.msk.bf16.mxu1 %vm3312_vm6, %v3298_v21 }
 0x9f2   :  { %7473 = vmatprep.subr.msk.bf16.mxu1 %vm253_vm2, %v7633_v46  ;;  %v7646_v46 = vld [vmem:[%s9728_s10 + $0x30] sm:$0xff]  }
 0x9f5   :  { %7252 = vmatpush3.bf16.msra.mxu1 %v4016_v47 }
 0x9f6   :  { %7265 = vmatprep.subr.bf16.mxu1 %v7634_v48 }
 0x9f8   :  { %7254 = vmatmul.mubr.msk.bf16.vlgmr.msra.gmra.mrb[44].mxu1 %vm3312_vm6, %v8748_v41 }
 0x9f9   :  { %7266 = vmatpush3.bf16.msra.mxu1 %v7634_v48  ;;  %7269 = vmatprep.mubr.msk.bf16.mxu1 %vm3312_vm6, %v3298_v21 }
 0x9fa   :  { %7474 = vmatprep.subr.msk.bf16.mxu1 %vm253_vm2, %v7635_v49 }
 0x9fd   :  { %7268 = vmatpush3.bf16.msra.mxu1 %v4157_v38 }
 0x9fe   :  { %7281 = vmatprep.subr.bf16.mxu1 %v7636_v50 }
 0xa00   :  { %7270 = vmatmul.mubr.msk.bf16.vlgmr.msra.gmra.mrb[48].mxu1 %vm3312_vm6, %v8748_v41 }
 0xa01   :  { %7282 = vmatpush3.bf16.msra.mxu1 %v7636_v50  ;;  %7285 = vmatprep.mubr.msk.bf16.mxu1 %vm3312_vm6, %v3298_v21 }
 0xa02   :  { %7475 = vmatprep.subr.msk.bf16.mxu1 %vm253_vm2, %v7637_v51 }
 0xa05   :  { %7284 = vmatpush3.bf16.msra.mxu1 %v4298_v52 }
 0xa06   :  { %7297 = vmatprep.subr.bf16.mxu1 %v7638_v53 }
 0xa08   :  { %7286 = vmatmul.mubr.msk.bf16.vlgmr.msra.gmra.mrb[52].mxu1 %vm3312_vm6, %v8748_v41 }
 0xa09   :  { %7298 = vmatpush3.bf16.msra.mxu1 %v7638_v53  ;;  %7301 = vmatprep.mubr.msk.bf16.mxu1 %vm3312_vm6, %v3298_v21 }
 0xa0a   :  { %7476 = vmatprep.subr.msk.bf16.mxu1 %vm253_vm2, %v7639_v54 }
 0xa0d   :  { %7300 = vmatpush3.bf16.msra.mxu1 %v4439_v55  ;;  %v7647_v55 = vld [vmem:[%s9728_s10 + $0x38] sm:$0xff]  }
 0xa10   :  { %7302 = vmatmul.mubr.msk.bf16.vlgmr.msra.gmra.mrb[56].mxu1 %vm3312_vm6, %v8748_v41 }
 0xab2   :  { %v7175_v56 = vpop.f32.mrb[52].mxu0  ;;  %v7207_v57 = vpop.f32.mrb[32].mxu1 }
 0xab3   :  { %v3356_v58 = vpop.f32.mrb[53].mxu0  ;;  %v3629_v59 = vpop.f32.mrb[33].mxu1 }
 0xab4   :  { %v7176_v60 = vpop.f32.mrb[54].mxu0  ;;  %v7208_v61 = vpop.f32.mrb[34].mxu1 }
 0xab5   :  { %v3376_v62 = vpack.c.bf16 %v7176_v60, %v7175_v56  ;;  %v3650_v63 = vpack.c.bf16 %v7208_v61, %v7207_v57  ;;  %v3359_v0 = vpop.f32.mrb[55].mxu0  ;;  %v3632_v1 = vpop.f32.mrb[35].mxu1  ;;  %v7649_v56 = vld [vmem:[%s9728_s10 + $0x48] sm:$0xff]   ;;  %v7650_v57 = vld [vmem:[%s9728_s10 + $0x50] sm:$0xff]  }
 0xab6   :  { %v3375_v4 = vpack.c.bf16 %v3359_v0, %v3356_v58  ;;  %v3649_v5 = vpack.c.bf16 %v3632_v1, %v3629_v59  ;;  %v7651_v58 = vld [vmem:[%s9728_s10 + $0x58] sm:$0xff]   ;;  %v7652_v59 = vld [vmem:[%s9728_s10 + $0x60] sm:$0xff]   ;;  %v7653_v60 = vld [vmem:[%s9728_s10 + $0x68] sm:$0xff]  }
 0xab7   :  { %v7654_v61 = vld [vmem:[%s9728_s10 + $0x70] sm:$0xff]   ;;  %v7657_v0 = vld [vmem:[%s9728_s10 + $0x88] sm:$0xff]   ;;  %v7658_v1 = vld [vmem:[%s9729_s12] sm:$0xff]  }
 0xaba   :  { %v7183_v25 = vpop.f32.mrb[56].mxu0 }
 0xabb   :  { %v7223_v6 = vpop.f32.mrb[36].mxu1  ;;  %v3427_v7 = vpop.f32.mrb[57].mxu0 }
 0xabc   :  { %v3770_v10 = vpop.f32.mrb[37].mxu1  ;;  %v7184_v11 = vpop.f32.mrb[58].mxu0 }
 0xabd   :  { %v3448_v14 = vpack.c.bf16 %v7184_v11, %v7183_v25  ;;  %v7224_v15 = vpop.f32.mrb[38].mxu1  ;;  %v3430_v16 = vpop.f32.mrb[59].mxu0 }
 0xabe   :  { %v3791_v22 = vpack.c.bf16 %v7224_v15, %v7223_v6  ;;  %v3447_v17 = vpack.c.bf16 %v3430_v16, %v3427_v7  ;;  %v3773_v20 = vpop.f32.mrb[39].mxu1 }
 0xabf   :  { %v3790_v9 = vpack.c.bf16 %v3773_v20, %v3770_v10  ;;  %v4588_v10 = vpop.permute.xlu1 %4587 }
 0xac0   :  { %7185 = vmatprep.subr.bf16.mxu0 %v3447_v17 }
 0xac1   :  { %7186 = vmatpush3.bf16.msra.mxu0 %v3447_v17 }
 0xac2   :  { %7187 = vmatprep.subr.bf16.mxu0 %v3448_v14 }
 0xac3   :  { %v7239_v2 = vpop.f32.mrb[40].mxu1 }
 0xac4   :  { %v3911_v3 = vpop.f32.mrb[41].mxu1 }
 0xac5   :  { %v7240_v26 = vpop.f32.mrb[42].mxu1  ;;  %7188 = vmatpush3.bf16.msra.mxu0 %v3448_v14 }
 0xac6   :  { %v3932_v28 = vpack.c.bf16 %v7240_v26, %v7239_v2  ;;  %v3914_v29 = vpop.f32.mrb[43].mxu1  ;;  %7193 = vmatprep.subr.bf16.mxu0 %v3375_v4  ;;  %v7662_v26 = vld [vmem:[%s9729_s12 + $0x10] sm:$0xff]  }
 0xac7   :  { %v3931_v30 = vpack.c.bf16 %v3914_v29, %v3911_v3  ;;  %v7665_v29 = vld [vmem:[%s9729_s12 + $0x48] sm:$0xff]  }
 0xac8   :  { %7190 = vmatmul.mubr.msk.bf16.vlgmr.msra.gmra.mrb[60].mxu0 %vm434_vm4, %v7641_v8 }
 0xac9   :  { %7194 = vmatpush3.bf16.msra.mxu0 %v3375_v4  ;;  %7197 = vmatprep.mubr.msk.bf16.mxu0 %vm434_vm4, %v7642_v27  ;;  %v7659_v4 = vld [vmem:[%s9729_s12 + $0x30] sm:$0xff]   ;;  %v7663_v27 = vld [vmem:[%s9729_s12 + $0x40] sm:$0xff]  }
 0xaca   :  { %7195 = vmatprep.subr.bf16.mxu0 %v3376_v62  ;;  %7329 = vmatprep.mubr.msk.bf16.mxu1 %vm434_vm4, %v7659_v4 }
 0xacb   :  { %v7255_v31 = vpop.f32.mrb[44].mxu1 }
 0xacc   :  { %v4052_v32 = vpop.f32.mrb[45].mxu1 }
 0xacd   :  { %v7256_v33 = vpop.f32.mrb[46].mxu1  ;;  %7196 = vmatpush3.bf16.msra.mxu0 %v3376_v62  ;;  %v7655_v62 = vld [vmem:[%s9728_s10 + $0x78] sm:$0xff]  }
 0xace   :  { %v4073_v34 = vpack.c.bf16 %v7256_v33, %v7255_v31  ;;  %v4055_v35 = vpop.f32.mrb[47].mxu1  ;;  %7209 = vmatprep.subr.bf16.mxu0 %v3649_v5  ;;  %v7667_v31 = vld [vmem:[%s9729_s12 + $0x50] sm:$0xff]   ;;  %v7669_v33 = vld [vmem:[%s9729_s12 + $0x58] sm:$0xff]  }
 0xacf   :  { %v4072_v36 = vpack.c.bf16 %v4055_v35, %v4052_v32  ;;  %v7668_v32 = vld [vmem:[%s9729_s12 + $0x28] sm:$0xff]  }
 0xad0   :  { %v7671_v35 = vld [vmem:[%s9729_s12 + $0x68] sm:$0xff]  }
 0xad3   :  { %v7271_v41 = vpop.f32.mrb[48].mxu1 }
 0xad4   :  { %v4193_v21 = vpop.f32.mrb[49].mxu1  ;;  %7198 = vmatmul.mubr.msk.bf16.vlgmr.msra.gmra.mrb[60].mxu0 %vm434_vm4, %v7643_v39  ;;  %v7673_v39 = vld [vmem:[%s9729_s12 + $0x78] sm:$0xff]  }
 0xad5   :  { %7210 = vmatpush3.bf16.msra.mxu0 %v3649_v5  ;;  %v7272_v19 = vpop.f32.mrb[50].mxu1  ;;  %7213 = vmatprep.mubr.msk.bf16.mxu0 %vm434_vm4, %v7644_v40  ;;  %v4583_v5 = vpop.permute.xlu0 %4582 }
 0xad6   :  { %v4214_v12 = vpack.c.bf16 %v7272_v19, %v7271_v41  ;;  %7211 = vmatprep.subr.bf16.mxu0 %v3650_v63  ;;  %v4196_v13 = vpop.f32.mrb[51].mxu1  ;;  %v4672_v40 = vpop.permute.xlu1 %4671 }
 0xad7   :  { %v4213_v18 = vpack.c.bf16 %v4196_v13, %v4193_v21 }
 0xad9   :  { %7212 = vmatpush3.bf16.msra.mxu0 %v3650_v63  ;;  %v7656_v63 = vld [vmem:[%s9728_s10 + $0x80] sm:$0xff]   ;;  %v4667_v41 = vpop.permute.xlu0 %4666 }
 0xada   :  { %7225 = vmatprep.subr.bf16.mxu0 %v3790_v9  ;;  %v4682_v21 = vpop.permute.xlu1 %4681 }
 0xadb   :  { %v7287_v42 = vpop.f32.mrb[52].mxu1 }
 0xadc   :  { %v4334_v43 = vpop.f32.mrb[53].mxu1 }
 0xadd   :  { %v7288_v45 = vpop.f32.mrb[54].mxu1  ;;  %v4677_v19 = vpop.permute.xlu0 %4676 }
 0xade   :  { %v4355_v47 = vpack.c.bf16 %v7288_v45, %v7287_v42  ;;  %v4337_v48 = vpop.f32.mrb[55].mxu1 }
 0xadf   :  { %v4354_v49 = vpack.c.bf16 %v4337_v48, %v4334_v43 }
 0xae0   :  { %7214 = vmatmul.mubr.msk.bf16.vlgmr.msra.gmra.mrb[60].mxu0 %vm434_vm4, %v7645_v44 }
 0xae1   :  { %7226 = vmatpush3.bf16.msra.mxu0 %v3790_v9  ;;  %7229 = vmatprep.mubr.msk.bf16.mxu0 %vm434_vm4, %v7646_v46  ;;  %v4687_v13 = vpop.permute.xlu0 %4686 }
 0xae2   :  { %7227 = vmatprep.subr.bf16.mxu0 %v3791_v22 }
 0xae3   :  { %v7303_v38 = vpop.f32.mrb[56].mxu1 }
 0xae4   :  { %v4475_v50 = vpop.f32.mrb[57].mxu1 }
 0xae5   :  { %7228 = vmatpush3.bf16.msra.mxu0 %v3791_v22  ;;  %v7304_v51 = vpop.f32.mrb[58].mxu1  ;;  %v4697_v42 = vpop.permute.xlu0 %4696 }
 0xae6   :  { %v4496_v52 = vpack.c.bf16 %v7304_v51, %v7303_v38  ;;  %7241 = vmatprep.subr.bf16.mxu0 %v3931_v30  ;;  %v4478_v53 = vpop.f32.mrb[59].mxu1 }
 0xae7   :  { %v4495_v54 = vpack.c.bf16 %v4478_v53, %v4475_v50 }
 0xae9   :  { %v8967_v44 = vpop.permute.xlu0 %4706 }
 0xaec   :  { %7230 = vmatmul.mubr.msk.bf16.vlgmr.msra.gmra.mrb[60].mxu0 %vm434_vm4, %v7647_v55 }
 0xaed   :  { %7242 = vmatpush3.bf16.msra.mxu0 %v3931_v30  ;;  %7245 = vmatprep.mubr.msk.bf16.mxu0 %vm434_vm4, %v7648_v37  ;;  %v7666_v30 = vld [vmem:[%s9729_s12 + $0x20] sm:$0xff]   ;;  %v8971_v46 = vpop.permute.xlu0 %4716 }
 0xaee   :  { %7243 = vmatprep.subr.bf16.mxu0 %v3932_v28 }
 0xaf1   :  { %7244 = vmatpush3.bf16.msra.mxu0 %v3932_v28  ;;  %v7664_v28 = vld [vmem:[%s9729_s12 + $0x18] sm:$0xff]   ;;  %v8975_v48 = vpop.permute.xlu0 %4726 }
 0xaf2   :  { %7257 = vmatprep.subr.bf16.mxu0 %v4072_v36 }
 0xaf5   :  { %v8979_v38 = vpop.permute.xlu0 %4736 }
 0xaf8   :  { %7246 = vmatmul.mubr.msk.bf16.vlgmr.msra.gmra.mrb[60].mxu0 %vm434_vm4, %v7649_v56 }
 0xaf9   :  { %7258 = vmatpush3.bf16.msra.mxu0 %v4072_v36  ;;  %7261 = vmatprep.mubr.msk.bf16.mxu0 %vm434_vm4, %v7650_v57  ;;  %v7672_v36 = vld [vmem:[%s9729_s12 + $0x70] sm:$0xff]   ;;  %v8983_v51 = vpop.permute.xlu0 %4746 }
 0xafa   :  { %7259 = vmatprep.subr.bf16.mxu0 %v4073_v34 }
 0xafd   :  { %7260 = vmatpush3.bf16.msra.mxu0 %v4073_v34  ;;  %v7670_v34 = vld [vmem:[%s9729_s12 + $0x60] sm:$0xff]   ;;  %v8987_v53 = vpop.permute.xlu0 %4756 }
 0xafe   :  { %7273 = vmatprep.subr.bf16.mxu0 %v4213_v18 }
 0xb01   :  { %v8991_v55 = vpop.permute.xlu0 %4766 }
 0xb04   :  { %7262 = vmatmul.mubr.msk.bf16.vlgmr.msra.gmra.mrb[60].mxu0 %vm434_vm4, %v7651_v58 }
 0xb05   :  { %7274 = vmatpush3.bf16.msra.mxu0 %v4213_v18  ;;  %7277 = vmatprep.mubr.msk.bf16.mxu0 %vm434_vm4, %v7652_v59  ;;  %v8995_v56 = vpop.permute.xlu0 %4776 }
 0xb06   :  { %7275 = vmatprep.subr.bf16.mxu0 %v4214_v12 }
 0xb09   :  { %7276 = vmatpush3.bf16.msra.mxu0 %v4214_v12  ;;  %v4692_v12 = vpop.permute.xlu1 %4691  ;;  %v8999_v58 = vpop.permute.xlu0 %4786 }
 0xb0a   :  { %7289 = vmatprep.subr.bf16.mxu0 %v4354_v49 }
 0xb0d   :  { %v4702_v18 = vpop.permute.xlu1 %4701 }
 0xb10   :  { %7278 = vmatmul.mubr.msk.bf16.vlgmr.msra.gmra.mrb[60].mxu0 %vm434_vm4, %v7653_v60  ;;  %v9003_v60 = vpop.permute.xlu0 %4796 }
 0xb11   :  { %7290 = vmatpush3.bf16.msra.mxu0 %v4354_v49  ;;  %7293 = vmatprep.mubr.msk.bf16.mxu0 %vm434_vm4, %v7654_v61  ;;  %v8965_v43 = vpop.permute.xlu1 %4711 }
 0xb12   :  { %7291 = vmatprep.subr.bf16.mxu0 %v4355_v47 }
 0xb15   :  { %7292 = vmatpush3.bf16.msra.mxu0 %v4355_v47  ;;  %v8969_v45 = vpop.permute.xlu1 %4721 }
 0xb16   :  { %7305 = vmatprep.subr.bf16.mxu0 %v4495_v54 }
 0xb19   :  { %v8973_v47 = vpop.permute.xlu1 %4731 }
 0xb1c   :  { %7294 = vmatmul.mubr.msk.bf16.vlgmr.msra.gmra.mrb[60].mxu0 %vm434_vm4, %v7655_v62 }
 0xb1d   :  { %7306 = vmatpush3.bf16.msra.mxu0 %v4495_v54  ;;  %7309 = vmatprep.mubr.msk.bf16.mxu0 %vm434_vm4, %v7656_v63  ;;  %v8977_v49 = vpop.permute.xlu1 %4741 }
 0xb1e   :  { %7307 = vmatprep.subr.bf16.mxu0 %v4496_v52 }
 0xb21   :  { %7308 = vmatpush3.bf16.msra.mxu0 %v4496_v52  ;;  %v8981_v50 = vpop.permute.xlu1 %4751 }
 0xb25   :  { %v8985_v52 = vpop.permute.xlu1 %4761 }
 0xb28   :  { %7310 = vmatmul.mubr.msk.bf16.vlgmr.msra.gmra.mrb[60].mxu0 %vm434_vm4, %v7657_v0 }
 0xb29   :  { %7317 = vmatprep.mubr.msk.bf16.mxu0 %vm434_vm4, %v7658_v1  ;;  %v8989_v54 = vpop.permute.xlu1 %4771 }
 0xb2d   :  { %v8993_v37 = vpop.permute.xlu1 %4781 }
 0xb31   :  { %v8997_v57 = vpop.permute.xlu1 %4791 }
 0xb35   :  { %v9001_v59 = vpop.permute.xlu1 %4801 }
 0xbfb   :  { %v7311_v25 = vpop.f32.mrb[60].mxu0 }
 0xbfc   :  { %v4592_v6 = vadd.f32 %v7311_v25, %v4583_v5  ;;  %v4547_v7 = vpop.f32.mrb[61].mxu0 }
 0xbfd   :  { %v4590_v11 = vadd.f32 %v8191_v24, %v4547_v7  ;;  %v7312_v14 = vpop.f32.mrb[62].mxu0  ;;  %v7660_v24 = vld [vmem:[%s9729_s12 + $0x8] sm:$0xff]  }
 0xbfe   :  { %v4593_v15 = vadd.f32 %v7312_v14, %v4588_v10  ;;  %v4550_v16 = vpop.f32.mrb[63].mxu0  ;;  %v4596_v17 = vmax.f32 %v4592_v6, 0.0 }
 0xbff   :  { %v4591_v22 = vadd.f32 %v8189_v23, %v4550_v16  ;;  %v4594_v9 = vmax.f32 %v4590_v11, 0.0  ;;  %v7661_v23 = vld [vmem:[%s9729_s12 + $0x38] sm:$0xff]   ;;  %v9021_v16 = vpop.permute.xlu1 %4811 }
 0xc00   :  { %v4597_v20 = vmax.f32 %v4593_v15, 0.0 }
 0xc01   :  { %v4595_v2 = vmax.f32 %v4591_v22, 0.0  ;;  %v9023_v22 = vpop.permute.xlu0 %4806 }
 0xc02   :  { %v4599_v3 = vpack.c.bf16 %v4597_v20, %v4596_v17 }
 0xc03   :  { %v4598_v8 = vpack.c.bf16 %v4595_v2, %v4594_v9 }
 0xc05   :  { %7313 = vmatprep.subr.bf16.mxu0 %v4598_v8  ;;  %7349 = vmatprep.subr.bf16.mxu1 %v4598_v8 }
 0xc06   :  { %7314 = vmatpush3.bf16.msra.mxu0 %v4598_v8  ;;  %7351 = vmatpush3.bf16.msra.mxu1 %v4598_v8 }
 0xc07   :  { %7315 = vmatprep.subr.bf16.mxu0 %v4599_v3  ;;  %7350 = vmatprep.subr.bf16.mxu1 %v4599_v3 }
 0xc0a   :  { %7316 = vmatpush3.bf16.msra.mxu0 %v4599_v3  ;;  %7352 = vmatpush3.bf16.msra.mxu1 %v4599_v3 }
 0xc0d   :  { %7318 = vmatmul.mubr.msk.bf16.vlgmr.msra.gmra.mrb[64].mxu0 %vm434_vm4, %v7660_v24  ;;  %7330 = vmatmul.mubr.msk.bf16.vlgmr.msra.gmra.mrb[60].mxu1 %vm434_vm4, %v7661_v23 }
 0xc0e   :  { %7321 = vmatprep.mubr.msk.bf16.mxu0 %vm434_vm4, %v7662_v26  ;;  %7333 = vmatprep.mubr.msk.bf16.mxu1 %vm434_vm4, %v7663_v27 }
 0xc15   :  { %7322 = vmatmul.mubr.msk.bf16.gmra.mrb[68].mxu0 %vm434_vm4, %v7664_v28  ;;  %7334 = vmatmul.mubr.msk.bf16.gmra.mrb[64].mxu1 %vm434_vm4, %v7665_v29 }
 0xc16   :  { %7325 = vmatprep.mubr.msk.bf16.mxu0 %vm434_vm4, %v7666_v30  ;;  %7337 = vmatprep.mubr.msk.bf16.mxu1 %vm434_vm4, %v7667_v31 }
 0xc1d   :  { %7326 = vmatmul.mubr.msk.bf16.gmra.mrb[72].mxu0 %vm434_vm4, %v7668_v32  ;;  %7338 = vmatmul.mubr.msk.bf16.gmra.mrb[68].mxu1 %vm434_vm4, %v7669_v33 }
 0xc1e   :  { %7341 = vmatprep.mubr.msk.bf16.mxu1 %vm434_vm4, %v7670_v34 }
 0xc25   :  { %7342 = vmatmul.mubr.msk.bf16.gmra.mrb[72].mxu1 %vm434_vm4, %v7671_v35 }
 0xc26   :  { %7345 = vmatprep.mubr.msk.bf16.mxu1 %vm434_vm4, %v7672_v36 }
 0xc2d   :  { %7346 = vmatmul.mubr.msk.bf16.gmra.mrb[76].mxu1 %vm434_vm4, %v7673_v39 }
 0xce0   :  { %v7319_v61 = vpop.f32.mrb[64].mxu0  ;;  %v9005_v62 = vpop.f32.mrb[60].mxu1 }
 0xce1   :  { %v4986_v63 = vpop.f32.mrb[65].mxu0  ;;  %v5034_v0 = vpop.f32.mrb[61].mxu1  ;;  %v9011_v7 = vadd.f32 %v7319_v61, %v4677_v19 }
 0xce2   :  { %v9007_v1 = vadd.f32 %v4986_v63, %v4667_v41  ;;  %v7320_v4 = vpop.f32.mrb[66].mxu0  ;;  %v9009_v5 = vpop.f32.mrb[62].mxu1 }
 0xce3   :  { %v4989_v25 = vpop.f32.mrb[67].mxu0  ;;  %v5037_v6 = vpop.f32.mrb[63].mxu1  ;;  %v9017_v14 = vadd.f32 %v7320_v4, %v4682_v21  ;;  %v5117_v20 = vsel %vm5113_vm7, %v9011_v7, 0.0 }
 0xce4   :  { %v9013_v10 = vadd.f32 %v4989_v25, %v4672_v40  ;;  %v5114_v11 = vsel %vm5113_vm7, %v9007_v1, 0.0  ;;  %v9045_v40 = vpop.permute.xlu1 %4821  ;;  %v9047_v41 = vpop.permute.xlu0 %4816 }
 0xce5   :  { %v5119_v23 = vsel %vm5113_vm7, %v9017_v14, 0.0 }
 0xce6   :  { %v5115_v15 = vsel %vm5113_vm7, %v9013_v10, 0.0 }
 0xce7   :  { %v5116_v17 = vadd.f32 %v5115_v15, %v5114_v11 }
 0xce8   :  { %v7323_v9 = vpop.f32.mrb[68].mxu0  ;;  %v9027_v2 = vpop.f32.mrb[64].mxu1 }
 0xce9   :  { %v5118_v3 = vadd.f32 %v5117_v20, %v5116_v17  ;;  %v5002_v8 = vpop.f32.mrb[69].mxu0  ;;  %v5050_v24 = vpop.f32.mrb[65].mxu1  ;;  %v9035_v32 = vadd.f32 %v7323_v9, %v4697_v42 }
 0xcea   :  { %v9031_v26 = vadd.f32 %v5002_v8, %v4687_v13  ;;  %v7324_v27 = vpop.f32.mrb[70].mxu0  ;;  %v9033_v28 = vpop.f32.mrb[66].mxu1 }
 0xceb   :  { %v5120_v29 = vadd.f32 %v5119_v23, %v5118_v3  ;;  %v5005_v30 = vpop.f32.mrb[71].mxu0  ;;  %v5053_v31 = vpop.f32.mrb[67].mxu1  ;;  %v9041_v36 = vadd.f32 %v7324_v27, %v4702_v18  ;;  %v5125_v19 = vsel %vm5113_vm7, %v9035_v32, 0.0 }
 0xcec   :  { %v5121_v33 = vsel %vm5113_vm7, %v9031_v26, 0.0  ;;  %v9039_v34 = vadd.f32 %v5005_v30, %v4692_v12  ;;  %v9071_v30 = vpop.permute.xlu1 %5392 }
 0xced   :  { %v5122_v35 = vadd.f32 %v5121_v33, %v5120_v29  ;;  %v5127_v18 = vsel %vm5113_vm7, %v9041_v36, 0.0  ;;  %v9074_v33 = vadd.f32 %v5034_v0, %v8975_v48  ;;  %v9087_v48 = vadd.f32 %v9005_v62, %v8979_v38 }
 0xcee   :  { %v5123_v39 = vsel %vm5113_vm7, %v9039_v34, 0.0  ;;  %v9104_v62 = vadd.f32 %v5050_v24, %v8983_v51 }
 0xcef   :  { %v5124_v21 = vadd.f32 %v5123_v39, %v5122_v35  ;;  %v9078_v39 = vpop.permute.xlu0 %5387  ;;  %v5137_v0 = vsel %vm5113_vm7, %v9074_v33, 0.0  ;;  %v5141_v38 = vsel %vm5113_vm7, %v9087_v48, 0.0 }
 0xcf0   :  { %v7327_v13 = vpop.f32.mrb[72].mxu0  ;;  %v9051_v42 = vpop.f32.mrb[68].mxu1  ;;  %v5145_v51 = vsel %vm5113_vm7, %v9104_v62, 0.0 }
 0xcf1   :  { %v5126_v61 = vadd.f32 %v5125_v19, %v5124_v21  ;;  %v5018_v12 = vpop.f32.mrb[73].mxu0  ;;  %v5066_v63 = vpop.f32.mrb[69].mxu1  ;;  %v9059_v9 = vadd.f32 %v7327_v13, %v8971_v46 }
 0xcf2   :  { %v9056_v4 = vadd.f32 %v5018_v12, %v8967_v44  ;;  %v7328_v25 = vpop.f32.mrb[74].mxu0  ;;  %v7340_v11 = vpop.f32.mrb[70].mxu1 }
 0xcf3   :  { %v5128_v15 = vadd.f32 %v5127_v18, %v5126_v61  ;;  %v5021_v17 = vpop.f32.mrb[75].mxu0  ;;  %v5069_v20 = vpop.f32.mrb[71].mxu1  ;;  %v9067_v27 = vadd.f32 %v7328_v25, %v8969_v45  ;;  %v5133_v46 = vsel %vm5113_vm7, %v9059_v9, 0.0  ;;  %v9081_v45 = vadd.f32 %v5037_v6, %v8973_v47 }
 0xcf4   :  { %v5129_v3 = vsel %vm5113_vm7, %v9056_v4, 0.0  ;;  %v9064_v8 = vadd.f32 %v5021_v17, %v8965_v43  ;;  %v9093_v25 = vadd.f32 %v9009_v5, %v8977_v49  ;;  %v9097_v6 = vpop.permute.xlu1 %5402  ;;  %v9109_v5 = vadd.f32 %v5053_v31, %v8981_v50 }
 0xcf5   :  { %v5130_v23 = vadd.f32 %v5129_v3, %v5128_v15  ;;  %v5135_v19 = vsel %vm5113_vm7, %v9067_v27, 0.0  ;;  %v5139_v47 = vsel %vm5113_vm7, %v9081_v45, 0.0  ;;  %v9099_v15 = vpop.permute.xlu0 %5397 }
 0xcf6   :  { %v5131_v44 = vsel %vm5113_vm7, %v9064_v8, 0.0  ;;  %v5143_v49 = vsel %vm5113_vm7, %v9093_v25, 0.0  ;;  %v5147_v50 = vsel %vm5113_vm7, %v9109_v5, 0.0 }
 0xcf7   :  { %v5132_v29 = vadd.f32 %v5131_v44, %v5130_v23 }
 0xcf8   :  { %v7343_v35 = vpop.f32.mrb[72].mxu1  ;;  %v9117_v24 = vpop.permute.xlu1 %5412 }
 0xcf9   :  { %v5134_v43 = vadd.f32 %v5133_v46, %v5132_v29  ;;  %v5082_v21 = vpop.f32.mrb[73].mxu1 }
 0xcfa   :  { %v7344_v13 = vpop.f32.mrb[74].mxu1 }
 0xcfb   :  { %v5136_v61 = vadd.f32 %v5135_v19, %v5134_v43  ;;  %v5085_v12 = vpop.f32.mrb[75].mxu1  ;;  %v9113_v19 = vadd.f32 %v9027_v2, %v8987_v53  ;;  %v9130_v2 = vadd.f32 %v5066_v63, %v8991_v55 }
 0xcfd   :  { %v5138_v18 = vadd.f32 %v5137_v0, %v5136_v61  ;;  %v9119_v61 = vpop.permute.xlu0 %5407  ;;  %v5149_v53 = vsel %vm5113_vm7, %v9113_v19, 0.0  ;;  %v5153_v55 = vsel %vm5113_vm7, %v9130_v2, 0.0 }
 0xcff   :  { %v5140_v17 = vadd.f32 %v5139_v47, %v5138_v18  ;;  %v9123_v18 = vadd.f32 %v9033_v28, %v8985_v52 }
 0xd00   :  { %v7347_v3 = vpop.f32.mrb[76].mxu1 }
 0xd01   :  { %v5142_v23 = vadd.f32 %v5141_v38, %v5140_v17  ;;  %v5098_v44 = vpop.f32.mrb[77].mxu1  ;;  %v5151_v17 = vsel %vm5113_vm7, %v9123_v18, 0.0  ;;  %v9135_v38 = vadd.f32 %v5069_v20, %v8989_v54  ;;  %v9139_v52 = vpop.permute.xlu0 %5417 }
 0xd02   :  { %v7348_v29 = vpop.f32.mrb[78].mxu1 }
 0xd03   :  { %v5144_v46 = vadd.f32 %v5143_v49, %v5142_v23  ;;  %v5101_v43 = vpop.f32.mrb[79].mxu1  ;;  %v9137_v23 = vpop.permute.xlu1 %5422  ;;  %v9143_v49 = vadd.f32 %v9051_v42, %v8995_v56  ;;  %v5155_v54 = vsel %vm5113_vm7, %v9135_v38, 0.0 }
 0xd05   :  { %v5146_v0 = vadd.f32 %v5145_v51, %v5144_v46  ;;  %v9148_v46 = vadd.f32 %v7340_v11, %v8993_v37  ;;  %v5157_v51 = vsel %vm5113_vm7, %v9143_v49, 0.0  ;;  %v9157_v56 = vpop.permute.xlu0 %5427  ;;  %v5086_v37 = vadd.f32 %v5085_v12, %v8997_v57 }
 0xd07   :  { %v5148_v31 = vadd.f32 %v5147_v50, %v5146_v0  ;;  %v5083_v0 = vadd.f32 %v5082_v21, %v8999_v58  ;;  %v9155_v50 = vpop.permute.xlu1 %5432  ;;  %v5163_v58 = vsel %vm5113_vm7, %v5086_v37, 0.0 }
 0xd09   :  { %v5150_v47 = vadd.f32 %v5149_v53, %v5148_v31  ;;  %v5159_v31 = vsel %vm5113_vm7, %v9148_v46, 0.0  ;;  %v5091_v53 = vadd.f32 %v7343_v35, %v9003_v60  ;;  %v5102_v60 = vadd.f32 %v5101_v43, %v9021_v16 }
 0xd0b   :  { %v5152_v28 = vadd.f32 %v5151_v17, %v5150_v47  ;;  %v5161_v47 = vsel %vm5113_vm7, %v5083_v0, 0.0  ;;  %v9166_v21 = vpop.permute.xlu1 %5442 }
 0xd0d   :  { %v5154_v63 = vadd.f32 %v5153_v55, %v5152_v28  ;;  %v5094_v28 = vadd.f32 %v7344_v13, %v9001_v59  ;;  %v9168_v55 = vpop.permute.xlu0 %5437 }
 0xd0f   :  { %v5156_v20 = vadd.f32 %v5155_v54, %v5154_v63  ;;  %v5165_v54 = vsel %vm5113_vm7, %v5091_v53, 0.0  ;;  %v5167_v12 = vsel %vm5113_vm7, %v5094_v28, 0.0  ;;  %v9176_v13 = vpop.permute.xlu1 %5452 }
 0xd11   :  { %v5158_v42 = vadd.f32 %v5157_v51, %v5156_v20  ;;  %v5099_v20 = vadd.f32 %v5098_v44, %v9023_v22  ;;  %v5107_v51 = vadd.f32 %v7347_v3, %v9047_v41 }
 0xd13   :  { %v5160_v11 = vadd.f32 %v5159_v31, %v5158_v42  ;;  %v5169_v59 = vsel %vm5113_vm7, %v5099_v20, 0.0  ;;  %v9178_v42 = vpop.permute.xlu0 %5447  ;;  %v5173_v44 = vsel %vm5113_vm7, %v5107_v51, 0.0  ;;  %v9184_v43 = vpop.permute.xlu1 %5462 }
 0xd14   :  { %9734 = vst [vmem:[#allocation2_spill] sm:$0xff] %v9184_v43 }
 0xd15   :  { %v5162_v17 = vadd.f32 %v5161_v47, %v5160_v11  ;;  %v5110_v11 = vadd.f32 %v7348_v29, %v9045_v40  ;;  %v5171_v47 = vsel %vm5113_vm7, %v5102_v60, 0.0 }
 0xd17   :  { %v5164_v63 = vadd.f32 %v5163_v58, %v5162_v17  ;;  %v5175_v16 = vsel %vm5113_vm7, %v5110_v11, 0.0  ;;  %v9186_v41 = vpop.permute.xlu0 %5457 }
 0xd18   :  { %9735 = vst [vmem:[#allocation3_spill] sm:$0xff] %v9186_v41 }
 0xd19   :  { %v5166_v57 = vadd.f32 %v5165_v54, %v5164_v63  ;;  %v9188_v54 = vpop.permute.xlu1 %5472 }
 0xd1a   :  { %9736 = vst [vmem:[#allocation4_spill] sm:$0xff] %v9188_v54 }
 0xd1b   :  { %v5168_v35 = vadd.f32 %v5167_v12, %v5166_v57  ;;  %v9190_v57 = vpop.permute.xlu0 %5467 }
 0xd1c   :  { %9737 = vst [vmem:[#allocation5_spill] sm:$0xff] %v9190_v57 }
 0xd1d   :  { %v5170_v31 = vadd.f32 %v5169_v59, %v5168_v35  ;;  %v9192_v35 = vpop.permute.xlu1 %5482 }
 0xd1e   :  { %9738 = vst [vmem:[#allocation6_spill] sm:$0xff] %v9192_v35 }
 0xd1f   :  { %v5172_v22 = vadd.f32 %v5171_v47, %v5170_v31  ;;  %v9194_v59 = vpop.permute.xlu0 %5477 }
 0xd20   :  { %9739 = vst [vmem:[#allocation7_spill] sm:$0xff] %v9194_v59 }
 0xd21   :  { %v5174_v17 = vadd.f32 %v5173_v44, %v5172_v22  ;;  %v9198_v22 = vpop.permute.xlu1 %5492 }
 0xd22   :  { %9740 = vst [vmem:[#allocation8_spill] sm:$0xff] %v9198_v22 }
 0xd23   :  { %v5176_v3 = vadd.f32 %v5175_v16, %v5174_v17  ;;  %v9200_v44 = vpop.permute.xlu0 %5487 }
 0xd24   :  { %9741 = vst [vmem:[#allocation9_spill] sm:$0xff] %v9200_v44 }
 0xd25   :  { %v5177_v58 = vrot.slane %v5176_v3, 4 }
 0xd27   :  { %v5178_v63 = vadd.f32 %v5177_v58, %v5176_v3 }
 0xd29   :  { %v5179_v40 = vrot.slane %v5178_v63, 2 }
 0xd2b   :  { %v5180_v29 = vadd.f32 %v5179_v40, %v5178_v63 }
 0xd2d   :  { %v5181_v12 = vrot.slane %v5180_v29, 1 }
 0xd2f   :  { %v5182_v31 = vadd.f32 %v5181_v12, %v5180_v29  ;;  %v9236_v12 = vpop.permute.xlu0 %5497 }
 0xd30   :  { %9743 = vst [vmem:[#allocation11_spill] sm:$0xff] %v9236_v12 }
 0xd31   :  { %v9196_v47 = vmul.f32 0.00390625, %v5182_v31 }
 0xd33   :  { %v9204_v17 = vsub.f32 %v9064_v8, %v9196_v47  ;;  %v9208_v16 = vsub.f32 %v9067_v27, %v9196_v47  ;;  %v9211_v3 = vsub.f32 %v5083_v0, %v9196_v47  ;;  %v9214_v58 = vsub.f32 %v5086_v37, %v9196_v47  ;;  %v9234_v37 = vpop.permute.xlu1 %5502  ;;  %v9260_v31 = vpop.permute.xlu0 %5507 }
 0xd34   :  { %v9217_v63 = vsub.f32 %v5091_v53, %v9196_v47  ;;  %v9220_v40 = vsub.f32 %v5094_v28, %v9196_v47  ;;  %v9223_v29 = vsub.f32 %v5099_v20, %v9196_v47  ;;  %v9226_v8 = vsub.f32 %v5102_v60, %v9196_v47  ;;  %9742 = vst [vmem:[#allocation10_spill] sm:$0xff] %v9234_v37 }
 0xd35   :  { %v9229_v27 = vsub.f32 %v5107_v51, %v9196_v47  ;;  %v9232_v0 = vsub.f32 %v5110_v11, %v9196_v47  ;;  %v9240_v53 = vsub.f32 %v9007_v1, %v9196_v47  ;;  %v9244_v28 = vsub.f32 %v9013_v10, %v9196_v47  ;;  %9745 = vst [vmem:[#allocation13_spill] sm:$0xff] %v9260_v31 }
 0xd36   :  { %v9248_v20 = vsub.f32 %v9011_v7, %v9196_v47  ;;  %v9252_v60 = vsub.f32 %v9017_v14, %v9196_v47  ;;  %v9264_v10 = vsub.f32 %v9031_v26, %v9196_v47  ;;  %v9270_v14 = vsub.f32 %v9039_v34, %v9196_v47 }
 0xd37   :  { %v5217_v51 = vmul.f32 %v9240_v53, %v9240_v53  ;;  %v5218_v11 = vmul.f32 %v9244_v28, %v9244_v28  ;;  %v9258_v1 = vpop.permute.xlu1 %5512  ;;  %v9278_v31 = vsub.f32 %v9035_v32, %v9196_v47  ;;  %v9285_v59 = vpop.permute.xlu0 %5517 }
 0xd38   :  { %9744 = vst [vmem:[#allocation12_spill] sm:$0xff] %v9258_v1  ;;  %v5219_v7 = vmul.f32 %v9248_v20, %v9248_v20  ;;  %v5220_v37 = vmul.f32 %v9252_v60, %v9252_v60  ;;  %v5221_v26 = vmul.f32 %v9264_v10, %v9264_v10  ;;  %9747 = vst [vmem:[#allocation15_spill] sm:$0xff] %v9285_v59 }
 0xd39   :  { %v5249_v12 = vsel %vm5113_vm7, %v5217_v51, 0.0  ;;  %v5250_v1 = vsel %vm5113_vm7, %v5218_v11, 0.0  ;;  %v9289_v51 = vsub.f32 %v9041_v36, %v9196_v47 }
 0xd3a   :  { %v5251_v22 = vadd.f32 %v5250_v1, %v5249_v12  ;;  %v5252_v44 = vsel %vm5113_vm7, %v5219_v7, 0.0  ;;  %v5222_v12 = vmul.f32 %v9270_v14, %v9270_v14  ;;  %v5254_v32 = vsel %vm5113_vm7, %v5220_v37, 0.0 }
 0xd3b   :  { %v9283_v34 = vpop.permute.xlu1 %5522  ;;  %v9296_v1 = vsub.f32 %v9056_v4, %v9196_v47  ;;  %v5224_v36 = vmul.f32 %v9289_v51, %v9289_v51  ;;  %v9306_v37 = vpop.permute.xlu0 %5527  ;;  %v9310_v4 = vsub.f32 %v9059_v9, %v9196_v47 }
 0xd3c   :  { %v5253_v35 = vadd.f32 %v5252_v44, %v5251_v22  ;;  %9746 = vst [vmem:[#allocation14_spill] sm:$0xff] %v9283_v34  ;;  %v5223_v22 = vmul.f32 %v9278_v31, %v9278_v31  ;;  %v5256_v44 = vsel %vm5113_vm7, %v5221_v26, 0.0  ;;  %v5258_v34 = vsel %vm5113_vm7, %v5222_v12, 0.0  ;;  %9749 = vst [vmem:[#allocation17_spill] sm:$0xff] %v9306_v37 }
 0xd3d   :  { %v5262_v12 = vsel %vm5113_vm7, %v5224_v36, 0.0  ;;  %v5227_v9 = vmul.f32 %v9310_v4, %v9310_v4  ;;  %v5228_v36 = vmul.f32 %v9208_v16, %v9208_v16 }
 0xd3e   :  { %v5255_v11 = vadd.f32 %v5254_v32, %v5253_v35  ;;  %v5225_v35 = vmul.f32 %v9296_v1, %v9296_v1  ;;  %v5260_v26 = vsel %vm5113_vm7, %v5223_v22, 0.0 }
 0xd3f   :  { %v9304_v54 = vpop.permute.xlu1 %5532  ;;  %v9327_v22 = vpop.permute.xlu0 %5537 }
 0xd40   :  { %v5257_v7 = vadd.f32 %v5256_v44, %v5255_v11  ;;  %9748 = vst [vmem:[#allocation16_spill] sm:$0xff] %v9304_v54  ;;  %v5226_v11 = vmul.f32 %v9204_v17, %v9204_v17  ;;  %v9320_v44 = vsub.f32 %v9074_v33, %v9196_v47  ;;  %9751 = vst [vmem:[#allocation19_spill] sm:$0xff] %v9327_v22 }
 0xd42   :  { %v5259_v59 = vadd.f32 %v5258_v34, %v5257_v7  ;;  %v5264_v7 = vsel %vm5113_vm7, %v5225_v35, 0.0  ;;  %v5266_v33 = vsel %vm5113_vm7, %v5226_v11, 0.0  ;;  %v5229_v35 = vmul.f32 %v9320_v44, %v9320_v44 }
 0xd43   :  { %v9325_v37 = vpop.permute.xlu1 %5542  ;;  %v5270_v11 = vsel %vm5113_vm7, %v5228_v36, 0.0 }
 0xd44   :  { %v5261_v32 = vadd.f32 %v5260_v26, %v5259_v59  ;;  %9750 = vst [vmem:[#allocation18_spill] sm:$0xff] %v9325_v37  ;;  %v9331_v59 = vsub.f32 %v9081_v45, %v9196_v47  ;;  %v9345_v45 = vsub.f32 %v9093_v25, %v9196_v47  ;;  %v9356_v37 = vsub.f32 %v9104_v62, %v9196_v47 }
 0xd45   :  { %v5272_v25 = vsel %vm5113_vm7, %v5229_v35, 0.0  ;;  %v9370_v62 = vsub.f32 %v9113_v19, %v9196_v47 }
 0xd46   :  { %v5263_v34 = vadd.f32 %v5262_v12, %v5261_v32  ;;  %v9338_v32 = vsub.f32 %v9087_v48, %v9196_v47  ;;  %v5268_v12 = vsel %vm5113_vm7, %v5227_v9, 0.0  ;;  %v9352_v48 = vpop.permute.xlu0 %5611  ;;  %v5232_v36 = vmul.f32 %v9345_v45, %v9345_v45 }
 0xd47   :  { %9753 = vst [vmem:[#allocation21_spill] sm:$0xff] %v9352_v48  ;;  %v9381_v48 = vsub.f32 %v9123_v18, %v9196_v47  ;;  %v9395_v18 = vsub.f32 %v9135_v38, %v9196_v47 }
 0xd48   :  { %v5265_v54 = vadd.f32 %v5264_v7, %v5263_v34  ;;  %v5230_v7 = vmul.f32 %v9331_v59, %v9331_v59  ;;  %v5231_v9 = vmul.f32 %v9338_v32, %v9338_v32  ;;  %v5278_v19 = vsel %vm5113_vm7, %v5232_v36, 0.0 }
 0xd4a   :  { %v5267_v26 = vadd.f32 %v5266_v33, %v5265_v54  ;;  %v9350_v33 = vpop.permute.xlu1 %5616  ;;  %v5276_v35 = vsel %vm5113_vm7, %v5231_v9, 0.0  ;;  %v5235_v9 = vmul.f32 %v9370_v62, %v9370_v62 }
 0xd4b   :  { %9752 = vst [vmem:[#allocation20_spill] sm:$0xff] %v9350_v33  ;;  %v5233_v33 = vmul.f32 %v9356_v37, %v9356_v37 }
 0xd4c   :  { %v5269_v34 = vadd.f32 %v5268_v12, %v5267_v26  ;;  %v9363_v12 = vsub.f32 %v9109_v5, %v9196_v47  ;;  %v9377_v5 = vpop.permute.xlu0 %5621  ;;  %v5284_v38 = vsel %vm5113_vm7, %v5235_v9, 0.0 }
 0xd4d   :  { %9755 = vst [vmem:[#allocation23_spill] sm:$0xff] %v9377_v5  ;;  %v9406_v5 = vsub.f32 %v9143_v49, %v9196_v47 }
 0xd4e   :  { %v5271_v54 = vadd.f32 %v5270_v11, %v5269_v34  ;;  %v5274_v34 = vsel %vm5113_vm7, %v5230_v7, 0.0  ;;  %v5234_v7 = vmul.f32 %v9363_v12, %v9363_v12 }
 0xd4f   :  { %v5239_v49 = vmul.f32 %v9406_v5, %v9406_v5 }
 0xd50   :  { %v5273_v26 = vadd.f32 %v5272_v25, %v5271_v54  ;;  %v9375_v25 = vpop.permute.xlu1 %5626  ;;  %v5282_v36 = vsel %vm5113_vm7, %v5234_v7, 0.0  ;;  %v5238_v7 = vmul.f32 %v9395_v18, %v9395_v18 }
 0xd51   :  { %9754 = vst [vmem:[#allocation22_spill] sm:$0xff] %v9375_v25  ;;  %v5236_v25 = vmul.f32 %v9381_v48, %v9381_v48 }
 0xd52   :  { %v5275_v11 = vadd.f32 %v5274_v34, %v5273_v26  ;;  %v9388_v34 = vsub.f32 %v9130_v2, %v9196_v47  ;;  %v9402_v2 = vpop.permute.xlu0 %5631 }
 0xd53   :  { %9757 = vst [vmem:[#allocation25_spill] sm:$0xff] %v9402_v2 }
 0xd54   :  { %v5277_v54 = vadd.f32 %v5276_v35, %v5275_v11  ;;  %v5280_v11 = vsel %vm5113_vm7, %v5233_v33, 0.0  ;;  %v5237_v33 = vmul.f32 %v9388_v34, %v9388_v34 }
 0xd56   :  { %v5279_v26 = vadd.f32 %v5278_v19, %v5277_v54  ;;  %v9400_v19 = vpop.permute.xlu1 %5636  ;;  %v9423_v9 = vpop.permute.xlu0 %5641 }
 0xd57   :  { %9756 = vst [vmem:[#allocation24_spill] sm:$0xff] %v9400_v19  ;;  %v5288_v19 = vsel %vm5113_vm7, %v5237_v33, 0.0  ;;  %9759 = vst [vmem:[#allocation27_spill] sm:$0xff] %v9423_v9  ;;  %v5242_v33 = vmul.f32 %v9214_v58, %v9214_v58 }
 0xd58   :  { %v5281_v35 = vadd.f32 %v5280_v11, %v5279_v26  ;;  %v9413_v11 = vsub.f32 %v9148_v46, %v9196_v47  ;;  %v5290_v47 = vsel %vm5113_vm7, %v5238_v7, 0.0  ;;  %v5243_v7 = vmul.f32 %v9217_v63, %v9217_v63 }
 0xd5a   :  { %v5283_v54 = vadd.f32 %v5282_v36, %v5281_v35  ;;  %v5286_v35 = vsel %vm5113_vm7, %v5236_v25, 0.0  ;;  %v9421_v22 = vpop.permute.xlu1 %5646  ;;  %v5240_v46 = vmul.f32 %v9413_v11, %v9413_v11  ;;  %v5241_v25 = vmul.f32 %v9211_v3, %v9211_v3 }
 0xd5b   :  { %9758 = vst [vmem:[#allocation26_spill] sm:$0xff] %v9421_v22  ;;  %v9436_v22 = vpop.permute.xlu0 %5651 }
 0xd5c   :  { %v5285_v26 = vadd.f32 %v5284_v38, %v5283_v54  ;;  %v5292_v38 = vsel %vm5113_vm7, %v5239_v49, 0.0  ;;  %9761 = vst [vmem:[#allocation29_spill] sm:$0xff] %v9436_v22  ;;  %v5244_v49 = vmul.f32 %v9220_v40, %v9220_v40 }
 0xd5e   :  { %v5287_v36 = vadd.f32 %v5286_v35, %v5285_v26 }
 0xd5f   :  { %v9449_v22 = vpop.permute.xlu0 %5661 }
 0xd60   :  { %v5289_v2 = vadd.f32 %v5288_v19, %v5287_v36  ;;  %v5294_v19 = vsel %vm5113_vm7, %v5240_v46, 0.0  ;;  %v9434_v36 = vpop.permute.xlu1 %5656  ;;  %v5245_v46 = vmul.f32 %v9223_v29, %v9223_v29  ;;  %9763 = vst [vmem:[#allocation31_spill] sm:$0xff] %v9449_v22 }
 0xd61   :  { %9760 = vst [vmem:[#allocation28_spill] sm:$0xff] %v9434_v36 }
 0xd62   :  { %v5291_v54 = vadd.f32 %v5290_v47, %v5289_v2  ;;  %v5296_v2 = vsel %vm5113_vm7, %v5241_v25, 0.0  ;;  %v5246_v25 = vmul.f32 %v9226_v8, %v9226_v8 }
 0xd63   :  { %v9462_v22 = vpop.permute.xlu0 %5671 }
 0xd64   :  { %v5293_v26 = vadd.f32 %v5292_v38, %v5291_v54  ;;  %v5298_v54 = vsel %vm5113_vm7, %v5242_v33, 0.0  ;;  %v9447_v36 = vpop.permute.xlu1 %5666  ;;  %v5247_v33 = vmul.f32 %v9229_v27, %v9229_v27  ;;  %9765 = vst [vmem:[#allocation33_spill] sm:$0xff] %v9462_v22 }
 0xd65   :  { %9762 = vst [vmem:[#allocation30_spill] sm:$0xff] %v9447_v36 }
 0xd66   :  { %v5295_v35 = vadd.f32 %v5294_v19, %v5293_v26  ;;  %v5300_v26 = vsel %vm5113_vm7, %v5243_v7, 0.0  ;;  %v5248_v7 = vmul.f32 %v9232_v0, %v9232_v0  ;;  %v5308_v9 = vsel %vm5113_vm7, %v5247_v33, 0.0 }
 0xd68   :  { %v5297_v47 = vadd.f32 %v5296_v2, %v5295_v35  ;;  %v5302_v35 = vsel %vm5113_vm7, %v5244_v49, 0.0  ;;  %v9460_v36 = vpop.permute.xlu1 %5676 }
 0xd69   :  { %9764 = vst [vmem:[#allocation32_spill] sm:$0xff] %v9460_v36 }
 0xd6a   :  { %v5299_v38 = vadd.f32 %v5298_v54, %v5297_v47  ;;  %v5304_v47 = vsel %vm5113_vm7, %v5245_v46, 0.0  ;;  %v9468_v46 = vpop.permute.xlu0 %5681 }
 0xd6c   :  { %v5301_v19 = vadd.f32 %v5300_v26, %v5299_v38  ;;  %v5306_v38 = vsel %vm5113_vm7, %v5246_v25, 0.0  ;;  %v9466_v43 = vpop.permute.xlu1 %5686 }
 0xd6e   :  { %v5303_v2 = vadd.f32 %v5302_v35, %v5301_v19  ;;  %v5310_v19 = vsel %vm5113_vm7, %v5248_v7, 0.0 }
 0xd70   :  { %v5305_v54 = vadd.f32 %v5304_v47, %v5303_v2  ;;  %v9470_v25 = vpop.permute.xlu1 %5696 }
 0xd72   :  { %v5307_v26 = vadd.f32 %v5306_v38, %v5305_v54  ;;  %v9472_v54 = vpop.permute.xlu0 %5691 }
 0xd74   :  { %v5309_v49 = vadd.f32 %v5308_v9, %v5307_v26  ;;  %v9474_v33 = vpop.permute.xlu1 %5706 }
 0xd76   :  { %v5311_v35 = vadd.f32 %v5310_v19, %v5309_v49  ;;  %v9476_v9 = vpop.permute.xlu0 %5701 }
 0xd78   :  { %v5312_v57 = vrot.slane %v5311_v35, 4  ;;  %v9478_v26 = vpop.permute.xlu1 %5716 }
 0xd79   :  { %9766 = vst [vmem:[#allocation34_spill] sm:$0xff] %v9478_v26 }
 0xd7a   :  { %v5313_v2 = vadd.f32 %v5312_v57, %v5311_v35  ;;  %v9480_v49 = vpop.permute.xlu0 %5711 }
 0xd7b   :  { %9767 = vst [vmem:[#allocation35_spill] sm:$0xff] %v9480_v49 }
 0xd7c   :  { %v5314_v47 = vrot.slane %v5313_v2, 2  ;;  %v9482_v57 = vpop.permute.xlu1 %5726 }
 0xd7d   :  { %9768 = vst [vmem:[#allocation36_spill] sm:$0xff] %v9482_v57 }
 0xd7e   :  { %v5315_v41 = vadd.f32 %v5314_v47, %v5313_v2  ;;  %v9484_v19 = vpop.permute.xlu0 %5721 }
 0xd7f   :  { %9769 = vst [vmem:[#allocation37_spill] sm:$0xff] %v9484_v19 }
 0xd80   :  { %v5316_v38 = vrot.slane %v5315_v41, 1  ;;  %v9502_v49 = vpop.permute.xlu1 %5736 }
 0xd81   :  { %9770 = vst [vmem:[#allocation38_spill] sm:$0xff] %v9502_v49 }
 0xd82   :  { %v5317_v36 = vadd.f32 %v5316_v38, %v5315_v41 }
 0xd84   :  { %v5318_v22 = vmul.f32 0.00390625, %v5317_v36 }
 0xd86   :  { %v5319_v7 = vadd.f32 1e-05, %v5318_v22 }
 0xd88   :  { %7674 = vrsqrt.f32 %v5319_v7 }
 0xd92   :  { %v7675_v35 = vpop.eup %7674 }
 0xd93   :  { %v5321_v2 = vmul.f32 %v7675_v35, %v9240_v53  ;;  %v5322_v41 = vmul.f32 %v7675_v35, %v9244_v28  ;;  %v5323_v36 = vmul.f32 %v7675_v35, %v9248_v20  ;;  %v5324_v47 = vmul.f32 %v7675_v35, %v9252_v60 }
 0xd94   :  { %v5325_v22 = vmul.f32 %v7675_v35, %v9264_v10  ;;  %v5326_v38 = vmul.f32 %v7675_v35, %v9270_v14  ;;  %v5327_v7 = vmul.f32 %v7675_v35, %v9278_v31  ;;  %v5328_v26 = vmul.f32 %v7675_v35, %v9289_v51  ;;  %v9504_v31 = vpop.permute.xlu0 %5731 }
 0xd95   :  { %v5329_v57 = vmul.f32 %v7675_v35, %v9296_v1  ;;  %v5330_v19 = vmul.f32 %v7675_v35, %v9204_v17  ;;  %v5331_v53 = vmul.f32 %v7675_v35, %v9310_v4  ;;  %v5332_v28 = vmul.f32 %v7675_v35, %v9208_v16  ;;  %9771 = vst [vmem:[#allocation39_spill] sm:$0xff] %v9504_v31  ;;  %v9530_v31 = vpop.permute.xlu1 %5746 }
 0xd96   :  { %v5333_v20 = vmul.f32 %v7675_v35, %v9320_v44  ;;  %v5334_v60 = vmul.f32 %v7675_v35, %v9331_v59  ;;  %v5335_v10 = vmul.f32 %v7675_v35, %v9338_v32  ;;  %v5336_v14 = vmul.f32 %v7675_v35, %v9345_v45 }
 0xd97   :  { %v5337_v51 = vmul.f32 %v7675_v35, %v9356_v37  ;;  %v5338_v17 = vmul.f32 %v7675_v35, %v9363_v12  ;;  %v5339_v1 = vmul.f32 %v7675_v35, %v9370_v62  ;;  %v5340_v16 = vmul.f32 %v7675_v35, %v9381_v48 }
 0xd98   :  { %v5341_v4 = vmul.f32 %v7675_v35, %v9388_v34  ;;  %v5342_v44 = vmul.f32 %v7675_v35, %v9395_v18  ;;  %v5343_v59 = vmul.f32 %v7675_v35, %v9406_v5  ;;  %v5344_v32 = vmul.f32 %v7675_v35, %v9413_v11 }
 0xd99   :  { %v5345_v45 = vmul.f32 %v7675_v35, %v9211_v3  ;;  %v5346_v49 = vmul.f32 %v7675_v35, %v9214_v58  ;;  %v5347_v37 = vmul.f32 %v7675_v35, %v9217_v63  ;;  %v5348_v12 = vmul.f32 %v7675_v35, %v9220_v40 }
 0xd9a   :  { %v5349_v62 = vmul.f32 %v7675_v35, %v9223_v29  ;;  %v5350_v48 = vmul.f32 %v7675_v35, %v9226_v8  ;;  %v5351_v34 = vmul.f32 %v7675_v35, %v9229_v27  ;;  %v5352_v18 = vmul.f32 %v7675_v35, %v9232_v0  ;;  %v9532_v27 = vpop.permute.xlu0 %5741  ;;  %v9772_v0 = vld [vmem:[#allocation3_spill] sm:$0xff]  ;;  %v9773_v35 = vld [vmem:[#allocation2_spill] sm:$0xff] }
 0xd9b   :  { %v5545_v5 = vmul.f32 %v9078_v39, %v5321_v2  ;;  %v5546_v11 = vmul.f32 %v9071_v30, %v5322_v41  ;;  %v5547_v3 = vmul.f32 %v9099_v15, %v5323_v36  ;;  %v5548_v58 = vmul.f32 %v9097_v6, %v5324_v47  ;;  %v9775_v41 = vld [vmem:[#allocation4_spill] sm:$0xff]  ;;  %v9776_v47 = vld [vmem:[#allocation7_spill] sm:$0xff] }
 0xd9c   :  { %v5549_v63 = vmul.f32 %v9119_v61, %v5325_v22  ;;  %v5550_v40 = vmul.f32 %v9117_v24, %v5326_v38  ;;  %v5551_v29 = vmul.f32 %v9139_v52, %v5327_v7  ;;  %v5552_v8 = vmul.f32 %v9137_v23, %v5328_v26  ;;  %v9774_v26 = vld [vmem:[#allocation5_spill] sm:$0xff]  ;;  %v9779_v22 = vld [vmem:[#allocation8_spill] sm:$0xff]  ;;  %v9780_v38 = vld [vmem:[#allocation11_spill] sm:$0xff] }
 0xd9d   :  { %v5553_v39 = vmul.f32 %v9157_v56, %v5329_v57  ;;  %v5554_v30 = vmul.f32 %v9155_v50, %v5330_v19  ;;  %v5555_v15 = vmul.f32 %v9168_v55, %v5331_v53  ;;  %v5556_v6 = vmul.f32 %v9166_v21, %v5332_v28  ;;  %v9777_v57 = vld [vmem:[#allocation6_spill] sm:$0xff]  ;;  %v9778_v19 = vld [vmem:[#allocation9_spill] sm:$0xff] }
 0xd9e   :  { %v5557_v61 = vmul.f32 %v9178_v42, %v5333_v20  ;;  %v5558_v24 = vmul.f32 %v9176_v13, %v5334_v60  ;;  %v5559_v52 = vmul.f32 %v9772_v0, %v5335_v10  ;;  %v5560_v23 = vmul.f32 %v9773_v35, %v5336_v14  ;;  %v9781_v7 = vld [vmem:[#allocation10_spill] sm:$0xff]  ;;  %v9782_v53 = vld [vmem:[#allocation13_spill] sm:$0xff]  ;;  %v9783_v20 = vld [vmem:[#allocation12_spill] sm:$0xff] }
 0xd9f   :  { %v5561_v2 = vmul.f32 %v9774_v26, %v5337_v51  ;;  %v5562_v36 = vmul.f32 %v9775_v41, %v5338_v17  ;;  %v5563_v56 = vmul.f32 %v9776_v47, %v5339_v1  ;;  %v5564_v50 = vmul.f32 %v9777_v57, %v5340_v16  ;;  %v9784_v10 = vld [vmem:[#allocation15_spill] sm:$0xff]  ;;  %v9785_v51 = vld [vmem:[#allocation14_spill] sm:$0xff]  ;;  %v9786_v0 = vld [vmem:[#allocation17_spill] sm:$0xff]  ;;  %v5757_v47 = vpop.permute.xlu1 %5756 }
 0xda0   :  { %v5565_v55 = vmul.f32 %v9778_v19, %v5341_v4  ;;  %v5566_v21 = vmul.f32 %v9779_v22, %v5342_v44  ;;  %v5567_v42 = vmul.f32 %v9780_v38, %v5343_v59  ;;  %v5568_v13 = vmul.f32 %v9781_v7, %v5344_v32  ;;  %v9787_v35 = vld [vmem:[#allocation16_spill] sm:$0xff]  ;;  %v9788_v26 = vld [vmem:[#allocation19_spill] sm:$0xff]  ;;  %v9789_v41 = vld [vmem:[#allocation18_spill] sm:$0xff]  ;;  %v5752_v59 = vpop.permute.xlu0 %5751 }
 0xda1   :  { %v5569_v28 = vmul.f32 %v9782_v53, %v5345_v45  ;;  %v5570_v60 = vmul.f32 %v9783_v20, %v5346_v49  ;;  %v5571_v14 = vmul.f32 %v9784_v10, %v5347_v37  ;;  %v5572_v17 = vmul.f32 %v9785_v51, %v5348_v12  ;;  %v9790_v57 = vld [vmem:[#allocation21_spill] sm:$0xff]  ;;  %v9791_v19 = vld [vmem:[#allocation20_spill] sm:$0xff]  ;;  %v9792_v22 = vld [vmem:[#allocation23_spill] sm:$0xff] }
 0xda2   :  { %v5573_v1 = vmul.f32 %v9786_v0, %v5349_v62  ;;  %v5574_v16 = vmul.f32 %v9787_v35, %v5350_v48  ;;  %v5575_v4 = vmul.f32 %v9788_v26, %v5351_v34  ;;  %v5576_v44 = vmul.f32 %v9789_v41, %v5352_v18  ;;  %v9793_v38 = vld [vmem:[#allocation22_spill] sm:$0xff]  ;;  %v9794_v7 = vld [vmem:[#allocation25_spill] sm:$0xff]  ;;  %v9795_v53 = vld [vmem:[#allocation24_spill] sm:$0xff] }
 0xda3   :  { %v5769_v32 = vadd.f32 %v9790_v57, %v5545_v5  ;;  %v5770_v45 = vadd.f32 %v9791_v19, %v5546_v11  ;;  %v5771_v49 = vadd.f32 %v9792_v22, %v5547_v3  ;;  %v5772_v37 = vadd.f32 %v9793_v38, %v5548_v58  ;;  %v9796_v20 = vld [vmem:[#allocation27_spill] sm:$0xff]  ;;  %v9797_v10 = vld [vmem:[#allocation26_spill] sm:$0xff]  ;;  %v9798_v51 = vld [vmem:[#allocation29_spill] sm:$0xff] }
 0xda4   :  { %v5773_v12 = vadd.f32 %v9794_v7, %v5549_v63  ;;  %v5774_v62 = vadd.f32 %v9795_v53, %v5550_v40  ;;  %v5775_v48 = vadd.f32 %v9796_v20, %v5551_v29  ;;  %v5776_v34 = vadd.f32 %v9797_v10, %v5552_v8  ;;  %v9799_v0 = vld [vmem:[#allocation28_spill] sm:$0xff]  ;;  %v9800_v26 = vld [vmem:[#allocation31_spill] sm:$0xff]  ;;  %v9801_v41 = vld [vmem:[#allocation30_spill] sm:$0xff] }
 0xda5   :  { %v5777_v18 = vadd.f32 %v9798_v51, %v5553_v39  ;;  %v5778_v35 = vadd.f32 %v9799_v0, %v5554_v30  ;;  %v5779_v5 = vadd.f32 %v9800_v26, %v5555_v15  ;;  %v5780_v11 = vadd.f32 %v9801_v41, %v5556_v6  ;;  %5801 = vst.msk [vmem:[%s9730_s16] sm:$0xff] %vm5113_vm7, %v5769_v32  ;;  %v9802_v3 = vld [vmem:[#allocation33_spill] sm:$0xff]  ;;  %v9803_v63 = vld [vmem:[#allocation32_spill] sm:$0xff] }
 0xda6   :  { %5802 = vst.msk [vmem:[%s9730_s16 + $0x8] sm:$0xff] %vm5113_vm7, %v5770_v45  ;;  %5803 = vst.msk [vmem:[%s9730_s16 + $0x10] sm:$0xff] %vm5113_vm7, %v5771_v49  ;;  %v5781_v58 = vadd.f32 %v9802_v3, %v5557_v61  ;;  %v5782_v40 = vadd.f32 %v9803_v63, %v5558_v24  ;;  %v5783_v29 = vadd.f32 %v9468_v46, %v5559_v52  ;;  %v9806_v15 = vld [vmem:[#allocation37_spill] sm:$0xff]  ;;  %v9807_v61 = vld [vmem:[#allocation36_spill] sm:$0xff]  ;;  %v5767_v52 = vpop.permute.xlu1 %5766 }
 0xda7   :  { %5804 = vst.msk [vmem:[%s9730_s16 + $0x18] sm:$0xff] %vm5113_vm7, %v5772_v37  ;;  %v5784_v8 = vadd.f32 %v9466_v43, %v5560_v23  ;;  %5805 = vst.msk [vmem:[%s9730_s16 + $0x20] sm:$0xff] %vm5113_vm7, %v5773_v12  ;;  %v5785_v43 = vadd.f32 %v9472_v54, %v5561_v2  ;;  %v5786_v46 = vadd.f32 %v9470_v25, %v5562_v36  ;;  %v9804_v25 = vld [vmem:[#allocation35_spill] sm:$0xff]  ;;  %v5762_v23 = vpop.permute.xlu0 %5761 }
 0xda8   :  { %5806 = vst.msk [vmem:[%s9730_s16 + $0x28] sm:$0xff] %vm5113_vm7, %v5774_v62  ;;  %5807 = vst.msk [vmem:[%s9730_s16 + $0x30] sm:$0xff] %vm5113_vm7, %v5775_v48  ;;  %v5787_v39 = vadd.f32 %v9476_v9, %v5563_v56  ;;  %v5788_v30 = vadd.f32 %v9474_v33, %v5564_v50  ;;  %v5789_v54 = vadd.f32 %v9804_v25, %v5565_v55  ;;  %v9805_v33 = vld [vmem:[#allocation34_spill] sm:$0xff]  ;;  %v9808_v2 = vld [vmem:[#allocation39_spill] sm:$0xff] }
 0xda9   :  { %5808 = vst.msk [vmem:[%s9730_s16 + $0x38] sm:$0xff] %vm5113_vm7, %v5776_v34  ;;  %5809 = vst.msk [vmem:[%s9730_s16 + $0x40] sm:$0xff] %vm5113_vm7, %v5777_v18  ;;  %v5790_v9 = vadd.f32 %v9805_v33, %v5566_v21  ;;  %v5791_v6 = vadd.f32 %v9806_v15, %v5567_v42  ;;  %v5792_v24 = vadd.f32 %v9807_v61, %v5568_v13  ;;  %v9809_v56 = vld [vmem:[#allocation38_spill] sm:$0xff] }
 0xdaa   :  { %5810 = vst.msk [vmem:[%s9730_s16 + $0x48] sm:$0xff] %vm5113_vm7, %v5778_v35  ;;  %5811 = vst.msk [vmem:[%s9730_s16 + $0x50] sm:$0xff] %vm5113_vm7, %v5779_v5  ;;  %v5793_v36 = vadd.f32 %v9808_v2, %v5569_v28  ;;  %v5794_v50 = vadd.f32 %v9809_v56, %v5570_v60  ;;  %v5795_v55 = vadd.f32 %v9532_v27, %v5571_v14 }
 0xdab   :  { %5812 = vst.msk [vmem:[%s9730_s16 + $0x58] sm:$0xff] %vm5113_vm7, %v5780_v11  ;;  %5813 = vst.msk [vmem:[%s9730_s16 + $0x60] sm:$0xff] %vm5113_vm7, %v5781_v58  ;;  %v5796_v21 = vadd.f32 %v9530_v31, %v5572_v17  ;;  %v5797_v31 = vadd.f32 %v5752_v59, %v5573_v1  ;;  %v5798_v27 = vadd.f32 %v5757_v47, %v5574_v16 }
 0xdac   :  { %5814 = vst.msk [vmem:[%s9730_s16 + $0x68] sm:$0xff] %vm5113_vm7, %v5782_v40  ;;  %5815 = vst.msk [vmem:[%s9730_s16 + $0x70] sm:$0xff] %vm5113_vm7, %v5783_v29  ;;  %v5799_v42 = vadd.f32 %v5762_v23, %v5575_v4  ;;  %v5800_v13 = vadd.f32 %v5767_v52, %v5576_v44 }
 0xdad   :  { %5816 = vst.msk [vmem:[%s9730_s16 + $0x78] sm:$0xff] %vm5113_vm7, %v5784_v8  ;;  %5817 = vst.msk [vmem:[%s9730_s16 + $0x80] sm:$0xff] %vm5113_vm7, %v5785_v43 }
 0xdae   :  { %5818 = vst.msk [vmem:[%s9730_s16 + $0x88] sm:$0xff] %vm5113_vm7, %v5786_v46  ;;  %5819 = vst.msk [vmem:[%s9730_s16 + $0x90] sm:$0xff] %vm5113_vm7, %v5787_v39 }
 0xdaf   :  { %5820 = vst.msk [vmem:[%s9730_s16 + $0x98] sm:$0xff] %vm5113_vm7, %v5788_v30  ;;  %5821 = vst.msk [vmem:[%s9730_s16 + $0xa0] sm:$0xff] %vm5113_vm7, %v5789_v54 }
 0xdb0   :  { %5822 = vst.msk [vmem:[%s9730_s16 + $0xa8] sm:$0xff] %vm5113_vm7, %v5790_v9  ;;  %5823 = vst.msk [vmem:[%s9730_s16 + $0xb0] sm:$0xff] %vm5113_vm7, %v5791_v6 }
 0xdb1   :  { %5824 = vst.msk [vmem:[%s9730_s16 + $0xb8] sm:$0xff] %vm5113_vm7, %v5792_v24  ;;  %5825 = vst.msk [vmem:[%s9730_s16 + $0xc0] sm:$0xff] %vm5113_vm7, %v5793_v36 }
 0xdb2   :  { %5826 = vst.msk [vmem:[%s9730_s16 + $0xc8] sm:$0xff] %vm5113_vm7, %v5794_v50  ;;  %5827 = vst.msk [vmem:[%s9730_s16 + $0xd0] sm:$0xff] %vm5113_vm7, %v5795_v55 }
 0xdb3   :  { %5828 = vst.msk [vmem:[%s9730_s16 + $0xd8] sm:$0xff] %vm5113_vm7, %v5796_v21  ;;  %5829 = vst.msk [vmem:[%s9730_s16 + $0xe0] sm:$0xff] %vm5113_vm7, %v5797_v31 }
 0xdb4   :  { %5830 = vst.msk [vmem:[%s9730_s16 + $0xe8] sm:$0xff] %vm5113_vm7, %v5798_v27  ;;  %5831 = vst.msk [vmem:[%s9730_s16 + $0xf0] sm:$0xff] %vm5113_vm7, %v5799_v42 }
 0xdb5   :  { %5832 = vst.msk [vmem:[%s9730_s16 + $0xf8] sm:$0xff] %vm5113_vm7, %v5800_v13 }

</bundles_post_ra>
